<compile_context>
chip_gen: v7x
topology: tpu7x:2x2x1
jax: 0.10.0
libtpu: 0.0.40
codegen_flags: <defaults>
</compile_context>

<pallas_src>
import jax
import jax.numpy as jnp
from jax import lax
from jax.experimental import pallas as pl
from jax.experimental.pallas import tpu as pltpu

# ----------------------------------------------------------------------------
# Model hyper-parameters (small shapes consistent with the module defaults)
# ----------------------------------------------------------------------------
BATCH = 2
IMG = 16
CIN = 3
PATCH = 8                       # 2x2 = 4 patches
NUM_PATCHES = (IMG // PATCH) ** 2
N_TOKENS = 1 + NUM_PATCHES      # cls + patches = 5
S_PAD = 16                      # static padded sequence length (multiple of 8)
EMBED_DIM = 32
NUM_HEADS = 4
HEAD_DIM = EMBED_DIM // NUM_HEADS
DEPTH = 5                       # covers pos_g=(0,1), pos_e=(2,3,4)
MLP_HIDDEN = 4 * EMBED_DIM
CLASS_NUM = 16
TASK_NUM = 4                    # e_pool
POS_G = (0, 1)
POS_E = (2, 3, 4)
LEN_G = 4
LEN_E = 4
G_LENGTH = len(POS_G)
E_LENGTH = len(POS_E)
G_SIZE = 1 * G_LENGTH * LEN_G   # prompt_tuning
E_SIZE = 1 * E_LENGTH * LEN_E
LN_EPS = 1e-6

BLOCK_KEYS = ("ln1_g", "ln1_b", "qkv_w", "qkv_b", "proj_w", "proj_b",
              "ln2_g", "ln2_b", "w1", "b1", "w2", "b2")


# ----------------------------------------------------------------------------
# BlockSpec helpers
# ----------------------------------------------------------------------------
def _const_spec(arr):
    """Whole array, same block for every depth step."""
    nd = arr.ndim
    return pl.BlockSpec(arr.shape, lambda d, _nd=nd: (0,) * _nd)


def _depth_spec(arr):
    """Array stacked along a leading depth axis; one slice per grid step."""
    blk = (1,) + tuple(arr.shape[1:])
    nz = arr.ndim - 1
    return pl.BlockSpec(blk, lambda d, _nz=nz: (d,) + (0,) * _nz)


# ----------------------------------------------------------------------------
# In-kernel building blocks
# ----------------------------------------------------------------------------
def _layernorm(v, g, b):
    mu = jnp.mean(v, axis=-1, keepdims=True)
    var = jnp.mean((v - mu) ** 2, axis=-1, keepdims=True)
    return (v - mu) * lax.rsqrt(var + LN_EPS) * g + b


def _block_forward(x, kmask, wrefs):
    """One pre-norm ViT block on a padded (B, S_PAD, D) activation.

    kmask: (1, S_PAD) float {0,1} key-validity mask (padded keys excluded).
    """
    (ln1g, ln1b, qkvw, qkvb, projw, projb,
     ln2g, ln2b, w1, b1, w2, b2) = wrefs
    bsz, s, d = x.shape
    xf = x.reshape(bsz * s, d)

    # --- attention (batch folded into the matmul row dimension) ---
    h = _layernorm(xf, ln1g[0], ln1b[0])
    qkv = jnp.dot(h, qkvw[0], preferred_element_type=jnp.float32) + qkvb[0]
    key_bias = ((kmask - 1.0) * 1e9).reshape(1, 1, s)   # 0 for valid, -1e9 pad
    scale = HEAD_DIM ** -0.5

    # NOTE: heads are processed with an unrolled loop of single-batch-dim
    # einsums (D=32, hd=8).  Multi-batch-dim dot_general / mid-axis transposes
    # are avoided on purpose for robust Mosaic lowering at these tiny shapes.
    head_outs = []
    for hh in range(NUM_HEADS):
        lo = hh * HEAD_DIM
        hi = lo + HEAD_DIM
        qh = qkv[:, lo:hi].reshape(bsz, s, HEAD_DIM)
        kh = qkv[:, d + lo:d + hi].reshape(bsz, s, HEAD_DIM)
        vh = qkv[:, 2 * d + lo:2 * d + hi].reshape(bsz, s, HEAD_DIM)
        sc = jnp.einsum('bqd,bkd->bqk', qh, kh,
                        preferred_element_type=jnp.float32) * scale
        sc = sc + key_bias
        sc = sc - jnp.max(sc, axis=-1, keepdims=True)
        pr = jnp.exp(sc)
        pr = pr * pl.reciprocal(jnp.sum(pr, axis=-1, keepdims=True),
                                approx=True)
        oh = jnp.einsum('bqk,bkd->bqd', pr, vh,
                        preferred_element_type=jnp.float32)
        head_outs.append(oh.reshape(bsz * s, HEAD_DIM))
    attn = jnp.concatenate(head_outs, axis=-1)                       # (BS, D)
    attn = jnp.dot(attn, projw[0], preferred_element_type=jnp.float32) + projb[0]
    xf = xf + attn

    # --- MLP ---
    h2 = _layernorm(xf, ln2g[0], ln2b[0])
    m = jnp.dot(h2, w1[0], preferred_element_type=jnp.float32) + b1[0]
    # TODO(synk): timm's nn.GELU is exact erf-GELU; tanh-approx GELU kept here
    #             for robust Mosaic lowering (numerically very close).
    m = jax.nn.gelu(m, approximate=True)
    m = jnp.dot(m, w2[0], preferred_element_type=jnp.float32) + b2[0]
    return (xf + m).reshape(bsz, s, d)


# ----------------------------------------------------------------------------
# Kernel 1: query pass — all DEPTH blocks fused (grid over depth, activation
#           resident in VMEM scratch) + cosine-distance epilogue.
# ----------------------------------------------------------------------------
def _query_pass_kernel(x0_ref, kmask_ref, key_ref,
                       ln1g, ln1b, qkvw, qkvb, projw, projb,
                       ln2g, ln2b, w1, b1, w2, b2,
                       dist_ref, x_scr):
    d = pl.program_id(0)

    @pl.when(d == 0)
    def _():
        x_scr[...] = x0_ref[...]

    kmask = kmask_ref[0]                                           # (1, S_PAD)
    rows = lax.broadcasted_iota(jnp.int32, (1, S_PAD, 1), 1)
    x = jnp.where(rows < N_TOKENS, x_scr[...], 0.0)                # keep pads 0
    wrefs = (ln1g, ln1b, qkvw, qkvb, projw, projb, ln2g, ln2b, w1, b1, w2, b2)
    x = _block_forward(x, kmask, wrefs)
    x_scr[...] = x

    @pl.when(d == DEPTH - 1)
    def _():
        bsz = x.shape[0]
        xf = x.reshape(bsz * S_PAD, EMBED_DIM)
        k = key_ref[...]                                           # (E, D)
        # F.cosine_similarity semantics: clamp EACH norm at eps, then multiply.
        qn = jnp.maximum(jnp.sqrt(jnp.sum(xf * xf, axis=-1, keepdims=True)), 1e-8)
        kn = jnp.maximum(jnp.sqrt(jnp.sum(k * k, axis=-1, keepdims=True)), 1e-8)
        dots = jnp.dot(xf, k.T, preferred_element_type=jnp.float32)
        dist = 1.0 - dots / (qn * kn.T)                            # (BS, E)
        dist_ref[...] = dist.reshape(bsz, S_PAD, TASK_NUM)


def query_pass(x0, kmask, key, blk):
    b = x0.shape[0]
    weights = [blk[k] for k in BLOCK_KEYS]
    in_specs = ([_const_spec(x0), _depth_spec(kmask), _const_spec(key)]
                + [_depth_spec(w) for w in weights])
    return pl.pallas_call(
        _query_pass_kernel,
        out_shape=jax.ShapeDtypeStruct((b, S_PAD, TASK_NUM), jnp.float32),
        grid=(DEPTH,),
        in_specs=in_specs,
        out_specs=pl.BlockSpec((b, S_PAD, TASK_NUM), lambda d: (0, 0, 0)),
        scratch_shapes=[pltpu.VMEM((b, S_PAD, EMBED_DIM), jnp.float32)],
        compiler_params=pltpu.CompilerParams(
            dimension_semantics=("arbitrary",)),
    )(x0, kmask, key, *weights)


# ----------------------------------------------------------------------------
# Kernel 2: prompt-tuning pass — all DEPTH blocks fused with per-depth prompt
#           injection + final-norm / fc / sigmoid(mask)*2 head epilogue.
# ----------------------------------------------------------------------------
def _prompt_pass_kernel(x0_ref, kmask_ref, prm_ref, msk_ref,
                        ng_ref, nb_ref, fcw_ref, fcb_ref,
                        ln1g, ln1b, qkvw, qkvb, projw, projb,
                        ln2g, ln2b, w1, b1, w2, b2,
                        logits_ref, x_scr):
    d = pl.program_id(0)

    @pl.when(d == 0)
    def _():
        x_scr[...] = x0_ref[...]

    kmask = kmask_ref[0]                                           # (1, S_PAD)
    rows = lax.broadcasted_iota(jnp.int32, (1, S_PAD, 1), 1)
    # Rows < N_TOKENS carry the running activation; rows >= N_TOKENS are
    # overwritten with this depth's prompt tokens (zeros where unused), which
    # reproduces torch.cat((x, prompt)) before the block + x[:, :N] after it.
    x = jnp.where(rows < N_TOKENS, x_scr[...], prm_ref[0])
    wrefs = (ln1g, ln1b, qkvw, qkvb, projw, projb, ln2g, ln2b, w1, b1, w2, b2)
    x = _block_forward(x, kmask, wrefs)
    x_scr[...] = x

    @pl.when(d == DEPTH - 1)
    def _():
        bsz = x.shape[0]
        xf = x.reshape(bsz * S_PAD, EMBED_DIM)
        f = _layernorm(xf, ng_ref[...], nb_ref[...])               # backbone.norm
        logits = (jnp.dot(f, fcw_ref[...], preferred_element_type=jnp.float32)
                  + fcb_ref[...])                                  # backbone.fc
        logits = logits.reshape(bsz, S_PAD, CLASS_NUM)
        gate = (jax.nn.sigmoid(msk_ref[...]) * 2.0)[:, None, :]    # (B,1,C)
        logits_ref[...] = logits * gate


def prompt_pass(x0, kmask, prompts, mask_sel, norm_g, norm_b, fc_w, fc_b, blk):
    b = x0.shape[0]
    weights = [blk[k] for k in BLOCK_KEYS]
    in_specs = ([_const_spec(x0), _depth_spec(kmask), _depth_spec(prompts),
                 _const_spec(mask_sel), _const_spec(norm_g), _const_spec(norm_b),
                 _const_spec(fc_w), _const_spec(fc_b)]
                + [_depth_spec(w) for w in weights])
    return pl.pallas_call(
        _prompt_pass_kernel,
        out_shape=jax.ShapeDtypeStruct((b, S_PAD, CLASS_NUM), jnp.float32),
        grid=(DEPTH,),
        in_specs=in_specs,
        out_specs=pl.BlockSpec((b, S_PAD, CLASS_NUM), lambda d: (0, 0, 0)),
        scratch_shapes=[pltpu.VMEM((b, S_PAD, EMBED_DIM), jnp.float32)],
        compiler_params=pltpu.CompilerParams(
            dimension_semantics=("arbitrary",)),
    )(x0, kmask, prompts, mask_sel, norm_g, norm_b, fc_w, fc_b, *weights)


# ----------------------------------------------------------------------------
# Parameter initialization (deterministic, synthetic, depth-stacked blocks)
# ----------------------------------------------------------------------------
def init_params(key):
    keys = iter(jax.random.split(key, 32))
    nrm = lambda shape, std=0.02: (
        jax.random.normal(next(keys), shape, jnp.float32) * std)

    params = {
        "patch_w": nrm((CIN * PATCH * PATCH, EMBED_DIM)),
        "patch_b": jnp.zeros((1, EMBED_DIM), jnp.float32),
        "cls": nrm((1, 1, EMBED_DIM)),
        "pos_embed": nrm((1, N_TOKENS, EMBED_DIM)),
        "norm_g": jnp.ones((1, EMBED_DIM), jnp.float32),
        "norm_b": jnp.zeros((1, EMBED_DIM), jnp.float32),
        "fc_w": nrm((EMBED_DIM, CLASS_NUM)),
        "fc_b": jnp.zeros((1, CLASS_NUM), jnp.float32),
        # MVP-specific parameters (torch.randn -> std 1.0)
        "key": nrm((TASK_NUM, EMBED_DIM), std=1.0),
        "mask": jnp.zeros((TASK_NUM, CLASS_NUM), jnp.float32) - 1.0,
        "g_prompts": nrm((1, G_SIZE, EMBED_DIM), std=1.0),
        "e_prompts": nrm((TASK_NUM, E_SIZE, EMBED_DIM), std=1.0),
    }
    params["blk"] = {
        "ln1_g": jnp.ones((DEPTH, 1, EMBED_DIM), jnp.float32),
        "ln1_b": jnp.zeros((DEPTH, 1, EMBED_DIM), jnp.float32),
        "qkv_w": nrm((DEPTH, EMBED_DIM, 3 * EMBED_DIM)),
        "qkv_b": jnp.zeros((DEPTH, 1, 3 * EMBED_DIM), jnp.float32),
        "proj_w": nrm((DEPTH, EMBED_DIM, EMBED_DIM)),
        "proj_b": jnp.zeros((DEPTH, 1, EMBED_DIM), jnp.float32),
        "ln2_g": jnp.ones((DEPTH, 1, EMBED_DIM), jnp.float32),
        "ln2_b": jnp.zeros((DEPTH, 1, EMBED_DIM), jnp.float32),
        "w1": nrm((DEPTH, EMBED_DIM, MLP_HIDDEN)),
        "b1": jnp.zeros((DEPTH, 1, MLP_HIDDEN), jnp.float32),
        "w2": nrm((DEPTH, MLP_HIDDEN, EMBED_DIM)),
        "b2": jnp.zeros((DEPTH, 1, EMBED_DIM), jnp.float32),
    }
    return params


# ----------------------------------------------------------------------------
# JAX glue (eval-mode semantics of MVP.forward with prompt_tuning)
# ----------------------------------------------------------------------------
def extract_patches(x):
    b, c, hh, ww = x.shape
    nh, nw = hh // PATCH, ww // PATCH
    x = x.reshape(b, c, nh, PATCH, nw, PATCH)
    x = x.transpose(0, 2, 4, 1, 3, 5)            # B, nh, nw, C, ph, pw
    return x.reshape(b * nh * nw, c * PATCH * PATCH)


def build_query_kmask():
    km = (jnp.arange(S_PAD)[None, :] < N_TOKENS).astype(jnp.float32)
    return jnp.broadcast_to(km, (DEPTH, S_PAD)).reshape(DEPTH, 1, S_PAD)


def build_prompt_layout(g_prompts, e_prompts, b):
    """Per-depth padded prompt slabs + key-validity masks."""
    g_p = g_prompts.reshape(b, G_LENGTH, LEN_G, EMBED_DIM)
    e_p = e_prompts.reshape(b, E_LENGTH, LEN_E, EMBED_DIM)
    per_depth, valid = [], []
    for n in range(DEPTH):
        parts = []
        if n in POS_G:
            parts.append(g_p[:, POS_G.index(n)])
        if n in POS_E:
            parts.append(e_p[:, POS_E.index(n)])
        buf = jnp.zeros((b, S_PAD, EMBED_DIM), jnp.float32)
        plen = 0
        if parts:
            pr = parts[0] if len(parts) == 1 else jnp.concatenate(parts, axis=1)
            plen = pr.shape[1]
            buf = buf.at[:, N_TOKENS:N_TOKENS + plen].set(pr)
        per_depth.append(buf)
        valid.append(N_TOKENS + plen)
    prompts = jnp.stack(per_depth, axis=0)                 # (DEPTH, B, S_PAD, D)
    kmask = (jnp.arange(S_PAD)[None, :]
             < jnp.asarray(valid)[:, None]).astype(jnp.float32)
    return prompts, kmask.reshape(DEPTH, 1, S_PAD)


def mvp_forward(inputs, p):
    b = inputs.shape[0]

    # --- patch embed (stride == kernel conv as a matmul); tiny -> plain XLA ---
    patches = extract_patches(inputs)
    tokens = (patches @ p["patch_w"] + p["patch_b"]).reshape(b, NUM_PATCHES,
                                                             EMBED_DIM)
    cls = jnp.broadcast_to(p["cls"], (b, 1, EMBED_DIM))
    x0 = jnp.concatenate([cls, tokens], axis=1) + p["pos_embed"]  # pos_drop = id
    x0 = jnp.pad(x0, ((0, 0), (0, S_PAD - N_TOKENS), (0, 0)))    # static S_PAD

    # --- query path: all blocks in ONE fused kernel; cosine dist. in epilogue ---
    dist_all = query_pass(x0, build_query_kmask(), p["key"], p["blk"])
    distance = dist_all[:, 0]                      # cls-token row, (B, E)

    # --- prompt selection (use_contrastiv=False => mass=1; selection_size=1) ---
    topk = jnp.argmin(distance, axis=1)
    e_prompts = p["e_prompts"][topk]               # (B, E_SIZE, D)
    mask_sel = p["mask"][topk]                     # (B, C) (mean over 1 sel.)
    g_prompts = jnp.broadcast_to(p["g_prompts"][0], (b, G_SIZE, EMBED_DIM))

    # --- prompt_tuning pass: blocks + norm + fc + sigmoid(mask)*2, one kernel ---
    prompts, kmask_p = build_prompt_layout(g_prompts, e_prompts, b)
    logits_all = prompt_pass(x0, kmask_p, prompts, mask_sel,
                             p["norm_g"], p["norm_b"], p["fc_w"], p["fc_b"],
                             p["blk"])
    return logits_all[:, 0]                        # cls-token row, (B, C)


# ----------------------------------------------------------------------------
if __name__ == "__main__":
    root = jax.random.PRNGKey(0)
    k_params, k_in = jax.random.split(root)
    params = init_params(k_params)
    x_img = jax.random.normal(k_in, (BATCH, CIN, IMG, IMG), jnp.float32)

    fwd = jax.jit(mvp_forward)
    out = fwd(x_img, params)
    out = jax.block_until_ready(out)
    assert out.shape == (BATCH, CLASS_NUM), out.shape
    assert jnp.all(jnp.isfinite(out))
    print("KERNEL_OK")
</pallas_src>

<mosaic_0001>
module attributes {stable_mosaic.version = 11 : i64} {
  func.func @_query_pass_kernel(%arg0: i32, %arg1: memref<2x16x32xf32, #tpu.memory_space<vmem>>, %arg2: memref<1x1x16xf32, #tpu.memory_space<vmem>>, %arg3: memref<4x32xf32, #tpu.memory_space<vmem>>, %arg4: memref<1x1x32xf32, #tpu.memory_space<vmem>>, %arg5: memref<1x1x32xf32, #tpu.memory_space<vmem>>, %arg6: memref<1x32x96xf32, #tpu.memory_space<vmem>>, %arg7: memref<1x1x96xf32, #tpu.memory_space<vmem>>, %arg8: memref<1x32x32xf32, #tpu.memory_space<vmem>>, %arg9: memref<1x1x32xf32, #tpu.memory_space<vmem>>, %arg10: memref<1x1x32xf32, #tpu.memory_space<vmem>>, %arg11: memref<1x1x32xf32, #tpu.memory_space<vmem>>, %arg12: memref<1x32x128xf32, #tpu.memory_space<vmem>>, %arg13: memref<1x1x128xf32, #tpu.memory_space<vmem>>, %arg14: memref<1x128x32xf32, #tpu.memory_space<vmem>>, %arg15: memref<1x1x32xf32, #tpu.memory_space<vmem>>, %arg16: memref<2x16x4xf32, #tpu.memory_space<vmem>>, %arg17: memref<2x16x32xf32, #tpu.memory_space<vmem>>) attributes {dimension_semantics = [#tpu.dimension_semantics<arbitrary>], iteration_bounds = array<i64: 5>, scalar_prefetch = 0 : i64, scratch_operands = 1 : i64, tpu.core_type = #tpu.core_type<tc>, window_params = [{pipeline_mode = #tpu.pipeline_mode<synchronous>, transform_indices = @transform_0, window_bounds = array<i64: 2, 16, 32>}, {transform_indices = @transform_1, window_bounds = array<i64: 1, 1, 16>}, {pipeline_mode = #tpu.pipeline_mode<synchronous>, transform_indices = @transform_2, window_bounds = array<i64: 4, 32>}, {transform_indices = @transform_3, window_bounds = array<i64: 1, 1, 32>}, {transform_indices = @transform_4, window_bounds = array<i64: 1, 1, 32>}, {transform_indices = @transform_5, window_bounds = array<i64: 1, 32, 96>}, {transform_indices = @transform_6, window_bounds = array<i64: 1, 1, 96>}, {transform_indices = @transform_7, window_bounds = array<i64: 1, 32, 32>}, {transform_indices = @transform_8, window_bounds = array<i64: 1, 1, 32>}, {transform_indices = @transform_9, window_bounds = array<i64: 1, 1, 32>}, {transform_indices = @transform_10, window_bounds = array<i64: 1, 1, 32>}, {transform_indices = @transform_11, window_bounds = array<i64: 1, 32, 128>}, {transform_indices = @transform_12, window_bounds = array<i64: 1, 1, 128>}, {transform_indices = @transform_13, window_bounds = array<i64: 1, 128, 32>}, {transform_indices = @transform_14, window_bounds = array<i64: 1, 1, 32>}, {pipeline_mode = #tpu.pipeline_mode<synchronous>, transform_indices = @transform_15, window_bounds = array<i64: 2, 16, 4>}]} {
    %c0_i32 = arith.constant 0 : i32
    %0 = arith.cmpi eq, %arg0, %c0_i32 : i32
    %1 = arith.extui %0 : i1 to i32
    %c0_i32_0 = arith.constant 0 : i32
    %2 = arith.cmpi ne, %1, %c0_i32_0 : i32
    scf.if %2 {
      %c0_86 = arith.constant 0 : index
      %c0_87 = arith.constant 0 : index
      %c0_88 = arith.constant 0 : index
      %212 = vector.load %arg1[%c0_86, %c0_87, %c0_88] : memref<2x16x32xf32, #tpu.memory_space<vmem>>, vector<2x16x32xf32>
      %c0_89 = arith.constant 0 : index
      %c0_90 = arith.constant 0 : index
      %c0_91 = arith.constant 0 : index
      %213 = vector.load %arg17[%c0_89, %c0_90, %c0_91] : memref<2x16x32xf32, #tpu.memory_space<vmem>>, vector<2x16x32xf32>
      tpu.vector_store %arg17[%c0_89, %c0_90, %c0_91], %212 {strides = array<i32>} : memref<2x16x32xf32, #tpu.memory_space<vmem>>, vector<2x16x32xf32>,
    } else {
    }
    %c0 = arith.constant 0 : index
    %c0_1 = arith.constant 0 : index
    %c0_2 = arith.constant 0 : index
    %3 = vector.load %arg2[%c0, %c0_1, %c0_2] : memref<1x1x16xf32, #tpu.memory_space<vmem>>, vector<1x1x16xf32>
    %4 = vector.shape_cast %3 : vector<1x1x16xf32> to vector<1x16xf32>
    %5 = tpu.iota {dimensions = array<i32: 1>} : vector<1x16x1xi32>
    %c5_i32 = arith.constant 5 : i32
    %6 = vector.broadcast %c5_i32 : i32 to vector<1x16x1xi32>
    %7 = arith.cmpi slt, %5, %6 : vector<1x16x1xi32>
    %c0_3 = arith.constant 0 : index
    %c0_4 = arith.constant 0 : index
    %c0_5 = arith.constant 0 : index
    %8 = vector.load %arg17[%c0_3, %c0_4, %c0_5] : memref<2x16x32xf32, #tpu.memory_space<vmem>>, vector<2x16x32xf32>
    %cst = arith.constant 0.000000e+00 : f32
    %9 = vector.shape_cast %7 : vector<1x16x1xi1> to vector<1x16x1xi1>
    %10 = vector.broadcast %9 : vector<1x16x1xi1> to vector<2x16x32xi1>
    %11 = vector.broadcast %cst : f32 to vector<2x16x32xf32>
    %12 = arith.select %10, %8, %11 : vector<2x16x32xi1>, vector<2x16x32xf32>
    %13 = vector.shape_cast %12 : vector<2x16x32xf32> to vector<32x32xf32>
    %c0_6 = arith.constant 0 : index
    %c0_7 = arith.constant 0 : index
    %c0_8 = arith.constant 0 : index
    %14 = vector.load %arg4[%c0_6, %c0_7, %c0_8] : memref<1x1x32xf32, #tpu.memory_space<vmem>>, vector<1x1x32xf32>
    %15 = vector.shape_cast %14 : vector<1x1x32xf32> to vector<1x32xf32>
    %c0_9 = arith.constant 0 : index
    %c0_10 = arith.constant 0 : index
    %c0_11 = arith.constant 0 : index
    %16 = vector.load %arg5[%c0_9, %c0_10, %c0_11] : memref<1x1x32xf32, #tpu.memory_space<vmem>>, vector<1x1x32xf32>
    %17 = vector.shape_cast %16 : vector<1x1x32xf32> to vector<1x32xf32>
    %cst_12 = arith.constant dense<0.000000e+00> : vector<32xf32>
    %18 = vector.multi_reduction <add>, %13, %cst_12 [1] : vector<32x32xf32> to vector<32xf32>
    %19 = vector.shape_cast %18 : vector<32xf32> to vector<32x1xf32>
    %cst_13 = arith.constant 3.200000e+01 : f32
    %20 = vector.broadcast %cst_13 : f32 to vector<32x1xf32>
    %21 = arith.divf %19, %20 : vector<32x1xf32>
    %22 = vector.broadcast %21 : vector<32x1xf32> to vector<32x32xf32>
    %23 = arith.subf %13, %22 : vector<32x32xf32>
    %24 = arith.mulf %23, %23 : vector<32x32xf32>
    %cst_14 = arith.constant dense<0.000000e+00> : vector<32xf32>
    %25 = vector.multi_reduction <add>, %24, %cst_14 [1] : vector<32x32xf32> to vector<32xf32>
    %26 = vector.shape_cast %25 : vector<32xf32> to vector<32x1xf32>
    %cst_15 = arith.constant 3.200000e+01 : f32
    %27 = vector.broadcast %cst_15 : f32 to vector<32x1xf32>
    %28 = arith.divf %26, %27 : vector<32x1xf32>
    %29 = vector.broadcast %21 : vector<32x1xf32> to vector<32x32xf32>
    %30 = arith.subf %13, %29 : vector<32x32xf32>
    %cst_16 = arith.constant 9.99999997E-7 : f32
    %31 = vector.broadcast %cst_16 : f32 to vector<32x1xf32>
    %32 = arith.addf %28, %31 : vector<32x1xf32>
    %33 = math.rsqrt %32 : vector<32x1xf32>
    %34 = vector.broadcast %33 : vector<32x1xf32> to vector<32x32xf32>
    %35 = arith.mulf %30, %34 : vector<32x32xf32>
    %36 = vector.broadcast %15 : vector<1x32xf32> to vector<32x32xf32>
    %37 = arith.mulf %35, %36 : vector<32x32xf32>
    %38 = vector.broadcast %17 : vector<1x32xf32> to vector<32x32xf32>
    %39 = arith.addf %37, %38 : vector<32x32xf32>
    %c0_17 = arith.constant 0 : index
    %c0_18 = arith.constant 0 : index
    %c0_19 = arith.constant 0 : index
    %40 = vector.load %arg6[%c0_17, %c0_18, %c0_19] : memref<1x32x96xf32, #tpu.memory_space<vmem>>, vector<1x32x96xf32>
    %41 = vector.shape_cast %40 : vector<1x32x96xf32> to vector<32x96xf32>
    %cst_20 = arith.constant dense<0.000000e+00> : vector<32x96xf32>
    %42 = tpu.matmul %39, %41, %cst_20 {dimension_numbers = #tpu.dot_dimension_numbers<[1], [0], [0], [1], [0, 0, 1, 1], [], []>} : vector<32x32xf32>, vector<32x96xf32>, vector<32x96xf32> -> vector<32x96xf32>
    %c0_21 = arith.constant 0 : index
    %c0_22 = arith.constant 0 : index
    %c0_23 = arith.constant 0 : index
    %43 = vector.load %arg7[%c0_21, %c0_22, %c0_23] : memref<1x1x96xf32, #tpu.memory_space<vmem>>, vector<1x1x96xf32>
    %44 = vector.shape_cast %43 : vector<1x1x96xf32> to vector<1x96xf32>
    %45 = vector.broadcast %44 : vector<1x96xf32> to vector<32x96xf32>
    %46 = arith.addf %42, %45 : vector<32x96xf32>
    %cst_24 = arith.constant 1.000000e+00 : f32
    %47 = vector.broadcast %cst_24 : f32 to vector<1x16xf32>
    %48 = arith.subf %4, %47 : vector<1x16xf32>
    %cst_25 = arith.constant 1.000000e+09 : f32
    %49 = vector.broadcast %cst_25 : f32 to vector<1x16xf32>
    %50 = arith.mulf %48, %49 : vector<1x16xf32>
    %51 = vector.shape_cast %50 : vector<1x16xf32> to vector<1x1x16xf32>
    %52 = vector.extract_strided_slice %46 {offsets = [0, 0], sizes = [32, 8], strides = [1, 1]} : vector<32x96xf32> to vector<32x8xf32>
    %53 = vector.shape_cast %52 : vector<32x8xf32> to vector<2x16x8xf32>
    %54 = vector.extract_strided_slice %46 {offsets = [0, 32], sizes = [32, 8], strides = [1, 1]} : vector<32x96xf32> to vector<32x8xf32>
    %55 = vector.shape_cast %54 : vector<32x8xf32> to vector<2x16x8xf32>
    %56 = vector.extract_strided_slice %46 {offsets = [0, 64], sizes = [32, 8], strides = [1, 1]} : vector<32x96xf32> to vector<32x8xf32>
    %57 = vector.shape_cast %56 : vector<32x8xf32> to vector<2x16x8xf32>
    "tpu.trace_start"() <{level = 10 : i32, message = "bqd,bkd->bqk"}> : () -> ()
    %cst_26 = arith.constant dense<0.000000e+00> : vector<2x16x16xf32>
    %58 = tpu.matmul %53, %55, %cst_26 {dimension_numbers = #tpu.dot_dimension_numbers<[2], [2], [1], [1], [0, 0, 0, 1, 1, 1], [0], [0]>} : vector<2x16x8xf32>, vector<2x16x8xf32>, vector<2x16x16xf32> -> vector<2x16x16xf32>
    "tpu.trace_stop"() : () -> ()
    %cst_27 = arith.constant 0.353553385 : f32
    %59 = vector.broadcast %cst_27 : f32 to vector<2x16x16xf32>
    %60 = arith.mulf %58, %59 : vector<2x16x16xf32>
    %61 = vector.broadcast %51 : vector<1x1x16xf32> to vector<2x16x16xf32>
    %62 = arith.addf %60, %61 : vector<2x16x16xf32>
    %cst_28 = arith.constant dense<0xFF800000> : vector<2x16xf32>
    %63 = vector.multi_reduction <maximumf>, %62, %cst_28 [2] : vector<2x16x16xf32> to vector<2x16xf32>
    %64 = vector.shape_cast %63 : vector<2x16xf32> to vector<2x16x1xf32>
    %65 = vector.broadcast %64 : vector<2x16x1xf32> to vector<2x16x16xf32>
    %66 = arith.subf %62, %65 : vector<2x16x16xf32>
    %67 = math.exp %66 : vector<2x16x16xf32>
    %cst_29 = arith.constant dense<0.000000e+00> : vector<2x16xf32>
    %68 = vector.multi_reduction <add>, %67, %cst_29 [2] : vector<2x16x16xf32> to vector<2x16xf32>
    %69 = vector.shape_cast %68 : vector<2x16xf32> to vector<2x16x1xf32>
    %70 = tpu.reciprocal %69 {approx = true} : vector<2x16x1xf32> -> vector<2x16x1xf32>
    %71 = vector.broadcast %70 : vector<2x16x1xf32> to vector<2x16x16xf32>
    %72 = arith.mulf %67, %71 : vector<2x16x16xf32>
    "tpu.trace_start"() <{level = 10 : i32, message = "bqk,bkd->bqd"}> : () -> ()
    %cst_30 = arith.constant dense<0.000000e+00> : vector<2x16x8xf32>
    %73 = tpu.matmul %72, %57, %cst_30 {dimension_numbers = #tpu.dot_dimension_numbers<[2], [1], [1], [2], [0, 0, 0, 1, 1, 2], [0], [0]>} : vector<2x16x16xf32>, vector<2x16x8xf32>, vector<2x16x8xf32> -> vector<2x16x8xf32>
    "tpu.trace_stop"() : () -> ()
    %74 = vector.shape_cast %73 : vector<2x16x8xf32> to vector<32x8xf32>
    %75 = vector.extract_strided_slice %46 {offsets = [0, 8], sizes = [32, 8], strides = [1, 1]} : vector<32x96xf32> to vector<32x8xf32>
    %76 = vector.shape_cast %75 : vector<32x8xf32> to vector<2x16x8xf32>
    %77 = vector.extract_strided_slice %46 {offsets = [0, 40], sizes = [32, 8], strides = [1, 1]} : vector<32x96xf32> to vector<32x8xf32>
    %78 = vector.shape_cast %77 : vector<32x8xf32> to vector<2x16x8xf32>
    %79 = vector.extract_strided_slice %46 {offsets = [0, 72], sizes = [32, 8], strides = [1, 1]} : vector<32x96xf32> to vector<32x8xf32>
    %80 = vector.shape_cast %79 : vector<32x8xf32> to vector<2x16x8xf32>
    "tpu.trace_start"() <{level = 10 : i32, message = "bqd,bkd->bqk"}> : () -> ()
    %cst_31 = arith.constant dense<0.000000e+00> : vector<2x16x16xf32>
    %81 = tpu.matmul %76, %78, %cst_31 {dimension_numbers = #tpu.dot_dimension_numbers<[2], [2], [1], [1], [0, 0, 0, 1, 1, 1], [0], [0]>} : vector<2x16x8xf32>, vector<2x16x8xf32>, vector<2x16x16xf32> -> vector<2x16x16xf32>
    "tpu.trace_stop"() : () -> ()
    %cst_32 = arith.constant 0.353553385 : f32
    %82 = vector.broadcast %cst_32 : f32 to vector<2x16x16xf32>
    %83 = arith.mulf %81, %82 : vector<2x16x16xf32>
    %84 = vector.broadcast %51 : vector<1x1x16xf32> to vector<2x16x16xf32>
    %85 = arith.addf %83, %84 : vector<2x16x16xf32>
    %cst_33 = arith.constant dense<0xFF800000> : vector<2x16xf32>
    %86 = vector.multi_reduction <maximumf>, %85, %cst_33 [2] : vector<2x16x16xf32> to vector<2x16xf32>
    %87 = vector.shape_cast %86 : vector<2x16xf32> to vector<2x16x1xf32>
    %88 = vector.broadcast %87 : vector<2x16x1xf32> to vector<2x16x16xf32>
    %89 = arith.subf %85, %88 : vector<2x16x16xf32>
    %90 = math.exp %89 : vector<2x16x16xf32>
    %cst_34 = arith.constant dense<0.000000e+00> : vector<2x16xf32>
    %91 = vector.multi_reduction <add>, %90, %cst_34 [2] : vector<2x16x16xf32> to vector<2x16xf32>
    %92 = vector.shape_cast %91 : vector<2x16xf32> to vector<2x16x1xf32>
    %93 = tpu.reciprocal %92 {approx = true} : vector<2x16x1xf32> -> vector<2x16x1xf32>
    %94 = vector.broadcast %93 : vector<2x16x1xf32> to vector<2x16x16xf32>
    %95 = arith.mulf %90, %94 : vector<2x16x16xf32>
    "tpu.trace_start"() <{level = 10 : i32, message = "bqk,bkd->bqd"}> : () -> ()
    %cst_35 = arith.constant dense<0.000000e+00> : vector<2x16x8xf32>
    %96 = tpu.matmul %95, %80, %cst_35 {dimension_numbers = #tpu.dot_dimension_numbers<[2], [1], [1], [2], [0, 0, 0, 1, 1, 2], [0], [0]>} : vector<2x16x16xf32>, vector<2x16x8xf32>, vector<2x16x8xf32> -> vector<2x16x8xf32>
    "tpu.trace_stop"() : () -> ()
    %97 = vector.shape_cast %96 : vector<2x16x8xf32> to vector<32x8xf32>
    %98 = vector.extract_strided_slice %46 {offsets = [0, 16], sizes = [32, 8], strides = [1, 1]} : vector<32x96xf32> to vector<32x8xf32>
    %99 = vector.shape_cast %98 : vector<32x8xf32> to vector<2x16x8xf32>
    %100 = vector.extract_strided_slice %46 {offsets = [0, 48], sizes = [32, 8], strides = [1, 1]} : vector<32x96xf32> to vector<32x8xf32>
    %101 = vector.shape_cast %100 : vector<32x8xf32> to vector<2x16x8xf32>
    %102 = vector.extract_strided_slice %46 {offsets = [0, 80], sizes = [32, 8], strides = [1, 1]} : vector<32x96xf32> to vector<32x8xf32>
    %103 = vector.shape_cast %102 : vector<32x8xf32> to vector<2x16x8xf32>
    "tpu.trace_start"() <{level = 10 : i32, message = "bqd,bkd->bqk"}> : () -> ()
    %cst_36 = arith.constant dense<0.000000e+00> : vector<2x16x16xf32>
    %104 = tpu.matmul %99, %101, %cst_36 {dimension_numbers = #tpu.dot_dimension_numbers<[2], [2], [1], [1], [0, 0, 0, 1, 1, 1], [0], [0]>} : vector<2x16x8xf32>, vector<2x16x8xf32>, vector<2x16x16xf32> -> vector<2x16x16xf32>
    "tpu.trace_stop"() : () -> ()
    %cst_37 = arith.constant 0.353553385 : f32
    %105 = vector.broadcast %cst_37 : f32 to vector<2x16x16xf32>
    %106 = arith.mulf %104, %105 : vector<2x16x16xf32>
    %107 = vector.broadcast %51 : vector<1x1x16xf32> to vector<2x16x16xf32>
    %108 = arith.addf %106, %107 : vector<2x16x16xf32>
    %cst_38 = arith.constant dense<0xFF800000> : vector<2x16xf32>
    %109 = vector.multi_reduction <maximumf>, %108, %cst_38 [2] : vector<2x16x16xf32> to vector<2x16xf32>
    %110 = vector.shape_cast %109 : vector<2x16xf32> to vector<2x16x1xf32>
    %111 = vector.broadcast %110 : vector<2x16x1xf32> to vector<2x16x16xf32>
    %112 = arith.subf %108, %111 : vector<2x16x16xf32>
    %113 = math.exp %112 : vector<2x16x16xf32>
    %cst_39 = arith.constant dense<0.000000e+00> : vector<2x16xf32>
    %114 = vector.multi_reduction <add>, %113, %cst_39 [2] : vector<2x16x16xf32> to vector<2x16xf32>
    %115 = vector.shape_cast %114 : vector<2x16xf32> to vector<2x16x1xf32>
    %116 = tpu.reciprocal %115 {approx = true} : vector<2x16x1xf32> -> vector<2x16x1xf32>
    %117 = vector.broadcast %116 : vector<2x16x1xf32> to vector<2x16x16xf32>
    %118 = arith.mulf %113, %117 : vector<2x16x16xf32>
    "tpu.trace_start"() <{level = 10 : i32, message = "bqk,bkd->bqd"}> : () -> ()
    %cst_40 = arith.constant dense<0.000000e+00> : vector<2x16x8xf32>
    %119 = tpu.matmul %118, %103, %cst_40 {dimension_numbers = #tpu.dot_dimension_numbers<[2], [1], [1], [2], [0, 0, 0, 1, 1, 2], [0], [0]>} : vector<2x16x16xf32>, vector<2x16x8xf32>, vector<2x16x8xf32> -> vector<2x16x8xf32>
    "tpu.trace_stop"() : () -> ()
    %120 = vector.shape_cast %119 : vector<2x16x8xf32> to vector<32x8xf32>
    %121 = vector.extract_strided_slice %46 {offsets = [0, 24], sizes = [32, 8], strides = [1, 1]} : vector<32x96xf32> to vector<32x8xf32>
    %122 = vector.shape_cast %121 : vector<32x8xf32> to vector<2x16x8xf32>
    %123 = vector.extract_strided_slice %46 {offsets = [0, 56], sizes = [32, 8], strides = [1, 1]} : vector<32x96xf32> to vector<32x8xf32>
    %124 = vector.shape_cast %123 : vector<32x8xf32> to vector<2x16x8xf32>
    %125 = vector.extract_strided_slice %46 {offsets = [0, 88], sizes = [32, 8], strides = [1, 1]} : vector<32x96xf32> to vector<32x8xf32>
    %126 = vector.shape_cast %125 : vector<32x8xf32> to vector<2x16x8xf32>
    "tpu.trace_start"() <{level = 10 : i32, message = "bqd,bkd->bqk"}> : () -> ()
    %cst_41 = arith.constant dense<0.000000e+00> : vector<2x16x16xf32>
    %127 = tpu.matmul %122, %124, %cst_41 {dimension_numbers = #tpu.dot_dimension_numbers<[2], [2], [1], [1], [0, 0, 0, 1, 1, 1], [0], [0]>} : vector<2x16x8xf32>, vector<2x16x8xf32>, vector<2x16x16xf32> -> vector<2x16x16xf32>
    "tpu.trace_stop"() : () -> ()
    %cst_42 = arith.constant 0.353553385 : f32
    %128 = vector.broadcast %cst_42 : f32 to vector<2x16x16xf32>
    %129 = arith.mulf %127, %128 : vector<2x16x16xf32>
    %130 = vector.broadcast %51 : vector<1x1x16xf32> to vector<2x16x16xf32>
    %131 = arith.addf %129, %130 : vector<2x16x16xf32>
    %cst_43 = arith.constant dense<0xFF800000> : vector<2x16xf32>
    %132 = vector.multi_reduction <maximumf>, %131, %cst_43 [2] : vector<2x16x16xf32> to vector<2x16xf32>
    %133 = vector.shape_cast %132 : vector<2x16xf32> to vector<2x16x1xf32>
    %134 = vector.broadcast %133 : vector<2x16x1xf32> to vector<2x16x16xf32>
    %135 = arith.subf %131, %134 : vector<2x16x16xf32>
    %136 = math.exp %135 : vector<2x16x16xf32>
    %cst_44 = arith.constant dense<0.000000e+00> : vector<2x16xf32>
    %137 = vector.multi_reduction <add>, %136, %cst_44 [2] : vector<2x16x16xf32> to vector<2x16xf32>
    %138 = vector.shape_cast %137 : vector<2x16xf32> to vector<2x16x1xf32>
    %139 = tpu.reciprocal %138 {approx = true} : vector<2x16x1xf32> -> vector<2x16x1xf32>
    %140 = vector.broadcast %139 : vector<2x16x1xf32> to vector<2x16x16xf32>
    %141 = arith.mulf %136, %140 : vector<2x16x16xf32>
    "tpu.trace_start"() <{level = 10 : i32, message = "bqk,bkd->bqd"}> : () -> ()
    %cst_45 = arith.constant dense<0.000000e+00> : vector<2x16x8xf32>
    %142 = tpu.matmul %141, %126, %cst_45 {dimension_numbers = #tpu.dot_dimension_numbers<[2], [1], [1], [2], [0, 0, 0, 1, 1, 2], [0], [0]>} : vector<2x16x16xf32>, vector<2x16x8xf32>, vector<2x16x8xf32> -> vector<2x16x8xf32>
    "tpu.trace_stop"() : () -> ()
    %143 = vector.shape_cast %142 : vector<2x16x8xf32> to vector<32x8xf32>
    %144 = tpu.concatenate %74, %97, %120, %143 in 1 : vector<32x8xf32>, vector<32x8xf32>, vector<32x8xf32>, vector<32x8xf32> -> vector<32x32xf32>
    %c0_46 = arith.constant 0 : index
    %c0_47 = arith.constant 0 : index
    %c0_48 = arith.constant 0 : index
    %145 = vector.load %arg8[%c0_46, %c0_47, %c0_48] : memref<1x32x32xf32, #tpu.memory_space<vmem>>, vector<1x32x32xf32>
    %146 = vector.shape_cast %145 : vector<1x32x32xf32> to vector<32x32xf32>
    %cst_49 = arith.constant dense<0.000000e+00> : vector<32x32xf32>
    %147 = tpu.matmul %144, %146, %cst_49 {dimension_numbers = #tpu.dot_dimension_numbers<[1], [0], [0], [1], [0, 0, 1, 1], [], []>} : vector<32x32xf32>, vector<32x32xf32>, vector<32x32xf32> -> vector<32x32xf32>
    %c0_50 = arith.constant 0 : index
    %c0_51 = arith.constant 0 : index
    %c0_52 = arith.constant 0 : index
    %148 = vector.load %arg9[%c0_50, %c0_51, %c0_52] : memref<1x1x32xf32, #tpu.memory_space<vmem>>, vector<1x1x32xf32>
    %149 = vector.shape_cast %148 : vector<1x1x32xf32> to vector<1x32xf32>
    %150 = vector.broadcast %149 : vector<1x32xf32> to vector<32x32xf32>
    %151 = arith.addf %147, %150 : vector<32x32xf32>
    %152 = arith.addf %13, %151 : vector<32x32xf32>
    %c0_53 = arith.constant 0 : index
    %c0_54 = arith.constant 0 : index
    %c0_55 = arith.constant 0 : index
    %153 = vector.load %arg10[%c0_53, %c0_54, %c0_55] : memref<1x1x32xf32, #tpu.memory_space<vmem>>, vector<1x1x32xf32>
    %154 = vector.shape_cast %153 : vector<1x1x32xf32> to vector<1x32xf32>
    %c0_56 = arith.constant 0 : index
    %c0_57 = arith.constant 0 : index
    %c0_58 = arith.constant 0 : index
    %155 = vector.load %arg11[%c0_56, %c0_57, %c0_58] : memref<1x1x32xf32, #tpu.memory_space<vmem>>, vector<1x1x32xf32>
    %156 = vector.shape_cast %155 : vector<1x1x32xf32> to vector<1x32xf32>
    %cst_59 = arith.constant dense<0.000000e+00> : vector<32xf32>
    %157 = vector.multi_reduction <add>, %152, %cst_59 [1] : vector<32x32xf32> to vector<32xf32>
    %158 = vector.shape_cast %157 : vector<32xf32> to vector<32x1xf32>
    %cst_60 = arith.constant 3.200000e+01 : f32
    %159 = vector.broadcast %cst_60 : f32 to vector<32x1xf32>
    %160 = arith.divf %158, %159 : vector<32x1xf32>
    %161 = vector.broadcast %160 : vector<32x1xf32> to vector<32x32xf32>
    %162 = arith.subf %152, %161 : vector<32x32xf32>
    %163 = arith.mulf %162, %162 : vector<32x32xf32>
    %cst_61 = arith.constant dense<0.000000e+00> : vector<32xf32>
    %164 = vector.multi_reduction <add>, %163, %cst_61 [1] : vector<32x32xf32> to vector<32xf32>
    %165 = vector.shape_cast %164 : vector<32xf32> to vector<32x1xf32>
    %cst_62 = arith.constant 3.200000e+01 : f32
    %166 = vector.broadcast %cst_62 : f32 to vector<32x1xf32>
    %167 = arith.divf %165, %166 : vector<32x1xf32>
    %168 = vector.broadcast %160 : vector<32x1xf32> to vector<32x32xf32>
    %169 = arith.subf %152, %168 : vector<32x32xf32>
    %cst_63 = arith.constant 9.99999997E-7 : f32
    %170 = vector.broadcast %cst_63 : f32 to vector<32x1xf32>
    %171 = arith.addf %167, %170 : vector<32x1xf32>
    %172 = math.rsqrt %171 : vector<32x1xf32>
    %173 = vector.broadcast %172 : vector<32x1xf32> to vector<32x32xf32>
    %174 = arith.mulf %169, %173 : vector<32x32xf32>
    %175 = vector.broadcast %154 : vector<1x32xf32> to vector<32x32xf32>
    %176 = arith.mulf %174, %175 : vector<32x32xf32>
    %177 = vector.broadcast %156 : vector<1x32xf32> to vector<32x32xf32>
    %178 = arith.addf %176, %177 : vector<32x32xf32>
    %c0_64 = arith.constant 0 : index
    %c0_65 = arith.constant 0 : index
    %c0_66 = arith.constant 0 : index
    %179 = vector.load %arg12[%c0_64, %c0_65, %c0_66] : memref<1x32x128xf32, #tpu.memory_space<vmem>>, vector<1x32x128xf32>
    %180 = vector.shape_cast %179 : vector<1x32x128xf32> to vector<32x128xf32>
    %cst_67 = arith.constant dense<0.000000e+00> : vector<32x128xf32>
    %181 = tpu.matmul %178, %180, %cst_67 {dimension_numbers = #tpu.dot_dimension_numbers<[1], [0], [0], [1], [0, 0, 1, 1], [], []>} : vector<32x32xf32>, vector<32x128xf32>, vector<32x128xf32> -> vector<32x128xf32>
    %c0_68 = arith.constant 0 : index
    %c0_69 = arith.constant 0 : index
    %c0_70 = arith.constant 0 : index
    %182 = vector.load %arg13[%c0_68, %c0_69, %c0_70] : memref<1x1x128xf32, #tpu.memory_space<vmem>>, vector<1x1x128xf32>
    %183 = vector.shape_cast %182 : vector<1x1x128xf32> to vector<1x128xf32>
    %184 = vector.broadcast %183 : vector<1x128xf32> to vector<32x128xf32>
    %185 = arith.addf %181, %184 : vector<32x128xf32>
    %186 = arith.mulf %185, %185 : vector<32x128xf32>
    %187 = arith.mulf %185, %186 : vector<32x128xf32>
    %cst_71 = arith.constant 4.471500e-02 : f32
    %188 = vector.broadcast %cst_71 : f32 to vector<32x128xf32>
    %189 = arith.mulf %188, %187 : vector<32x128xf32>
    %190 = arith.addf %185, %189 : vector<32x128xf32>
    %cst_72 = arith.constant 0.797884583 : f32
    %191 = vector.broadcast %cst_72 : f32 to vector<32x128xf32>
    %192 = arith.mulf %191, %190 : vector<32x128xf32>
    %193 = math.tanh %192 : vector<32x128xf32>
    %cst_73 = arith.constant 1.000000e+00 : f32
    %194 = vector.broadcast %cst_73 : f32 to vector<32x128xf32>
    %195 = arith.addf %194, %193 : vector<32x128xf32>
    %cst_74 = arith.constant 5.000000e-01 : f32
    %196 = vector.broadcast %cst_74 : f32 to vector<32x128xf32>
    %197 = arith.mulf %196, %195 : vector<32x128xf32>
    %198 = arith.mulf %185, %197 : vector<32x128xf32>
    %c0_75 = arith.constant 0 : index
    %c0_76 = arith.constant 0 : index
    %c0_77 = arith.constant 0 : index
    %199 = vector.load %arg14[%c0_75, %c0_76, %c0_77] : memref<1x128x32xf32, #tpu.memory_space<vmem>>, vector<1x128x32xf32>
    %200 = vector.shape_cast %199 : vector<1x128x32xf32> to vector<128x32xf32>
    %cst_78 = arith.constant dense<0.000000e+00> : vector<32x32xf32>
    %201 = tpu.matmul %198, %200, %cst_78 {dimension_numbers = #tpu.dot_dimension_numbers<[1], [0], [0], [1], [0, 0, 1, 1], [], []>} : vector<32x128xf32>, vector<128x32xf32>, vector<32x32xf32> -> vector<32x32xf32>
    %c0_79 = arith.constant 0 : index
    %c0_80 = arith.constant 0 : index
    %c0_81 = arith.constant 0 : index
    %202 = vector.load %arg15[%c0_79, %c0_80, %c0_81] : memref<1x1x32xf32, #tpu.memory_space<vmem>>, vector<1x1x32xf32>
    %203 = vector.shape_cast %202 : vector<1x1x32xf32> to vector<1x32xf32>
    %204 = vector.broadcast %203 : vector<1x32xf32> to vector<32x32xf32>
    %205 = arith.addf %201, %204 : vector<32x32xf32>
    %206 = arith.addf %152, %205 : vector<32x32xf32>
    %207 = vector.shape_cast %206 : vector<32x32xf32> to vector<2x16x32xf32>
    %c0_82 = arith.constant 0 : index
    %c0_83 = arith.constant 0 : index
    %c0_84 = arith.constant 0 : index
    %208 = vector.load %arg17[%c0_82, %c0_83, %c0_84] : memref<2x16x32xf32, #tpu.memory_space<vmem>>, vector<2x16x32xf32>
    tpu.vector_store %arg17[%c0_82, %c0_83, %c0_84], %207 {strides = array<i32>} : memref<2x16x32xf32, #tpu.memory_space<vmem>>, vector<2x16x32xf32>,
    %c4_i32 = arith.constant 4 : i32
    %209 = arith.cmpi eq, %arg0, %c4_i32 : i32
    %210 = arith.extui %209 : i1 to i32
    %c0_i32_85 = arith.constant 0 : i32
    %211 = arith.cmpi ne, %210, %c0_i32_85 : i32
    scf.if %211 {
      %212 = vector.shape_cast %207 : vector<2x16x32xf32> to vector<32x32xf32>
      %c0_86 = arith.constant 0 : index
      %c0_87 = arith.constant 0 : index
      %213 = vector.load %arg3[%c0_86, %c0_87] : memref<4x32xf32, #tpu.memory_space<vmem>>, vector<4x32xf32>
      %214 = arith.mulf %212, %212 : vector<32x32xf32>
      %cst_88 = arith.constant dense<0.000000e+00> : vector<32xf32>
      %215 = vector.multi_reduction <add>, %214, %cst_88 [1] : vector<32x32xf32> to vector<32xf32>
      %216 = vector.shape_cast %215 : vector<32xf32> to vector<32x1xf32>
      %217 = math.sqrt %216 : vector<32x1xf32>
      %cst_89 = arith.constant 9.99999993E-9 : f32
      %218 = vector.broadcast %cst_89 : f32 to vector<32x1xf32>
      %219 = arith.maximumf %217, %218 : vector<32x1xf32>
      %220 = arith.mulf %213, %213 : vector<4x32xf32>
      %cst_90 = arith.constant dense<0.000000e+00> : vector<4xf32>
      %221 = vector.multi_reduction <add>, %220, %cst_90 [1] : vector<4x32xf32> to vector<4xf32>
      %222 = vector.shape_cast %221 : vector<4xf32> to vector<4x1xf32>
      %223 = math.sqrt %222 : vector<4x1xf32>
      %cst_91 = arith.constant 9.99999993E-9 : f32
      %224 = vector.broadcast %cst_91 : f32 to vector<4x1xf32>
      %225 = arith.maximumf %223, %224 : vector<4x1xf32>
      %226 = tpu.transpose %213, [1, 0] : vector<4x32xf32> -> vector<32x4xf32>
      %cst_92 = arith.constant dense<0.000000e+00> : vector<32x4xf32>
      %227 = tpu.matmul %212, %226, %cst_92 {dimension_numbers = #tpu.dot_dimension_numbers<[1], [0], [0], [1], [0, 0, 1, 1], [], []>} : vector<32x32xf32>, vector<32x4xf32>, vector<32x4xf32> -> vector<32x4xf32>
      %228 = tpu.transpose %225, [1, 0] : vector<4x1xf32> -> vector<1x4xf32>
      %229 = vector.broadcast %219 : vector<32x1xf32> to vector<32x4xf32>
      %230 = vector.broadcast %228 : vector<1x4xf32> to vector<32x4xf32>
      %231 = arith.mulf %229, %230 : vector<32x4xf32>
      %232 = arith.divf %227, %231 : vector<32x4xf32>
      %cst_93 = arith.constant 1.000000e+00 : f32
      %233 = vector.broadcast %cst_93 : f32 to vector<32x4xf32>
      %234 = arith.subf %233, %232 : vector<32x4xf32>
      %235 = vector.shape_cast %234 : vector<32x4xf32> to vector<2x16x4xf32>
      %c0_94 = arith.constant 0 : index
      %c0_95 = arith.constant 0 : index
      %c0_96 = arith.constant 0 : index
      %236 = vector.load %arg16[%c0_94, %c0_95, %c0_96] : memref<2x16x4xf32, #tpu.memory_space<vmem>>, vector<2x16x4xf32>
      tpu.vector_store %arg16[%c0_94, %c0_95, %c0_96], %235 {strides = array<i32>} : memref<2x16x4xf32, #tpu.memory_space<vmem>>, vector<2x16x4xf32>,
    } else {
    }
    return
  }
  func.func @transform_0(%arg0: i32) -> (i32, i32, i32) {
    %c0_i32 = arith.constant 0 : i32
    %c0_i32_0 = arith.constant 0 : i32
    %c0_i32_1 = arith.constant 0 : i32
    %c0_i32_2 = arith.constant 0 : i32
    return %c0_i32, %c0_i32_0, %c0_i32_1 : i32, i32, i32
  }
  func.func @transform_1(%arg0: i32) -> (i32, i32, i32) {
    %c0_i32 = arith.constant 0 : i32
    %c0_i32_0 = arith.constant 0 : i32
    %c0_i32_1 = arith.constant 0 : i32
    return %arg0, %c0_i32, %c0_i32_0 : i32, i32, i32
  }
  func.func @transform_2(%arg0: i32) -> (i32, i32) {
    %c0_i32 = arith.constant 0 : i32
    %c0_i32_0 = arith.constant 0 : i32
    %c0_i32_1 = arith.constant 0 : i32
    return %c0_i32, %c0_i32_0 : i32, i32
  }
  func.func @transform_3(%arg0: i32) -> (i32, i32, i32) {
    %c0_i32 = arith.constant 0 : i32
    %c0_i32_0 = arith.constant 0 : i32
    %c0_i32_1 = arith.constant 0 : i32
    return %arg0, %c0_i32, %c0_i32_0 : i32, i32, i32
  }
  func.func @transform_4(%arg0: i32) -> (i32, i32, i32) {
    %c0_i32 = arith.constant 0 : i32
    %c0_i32_0 = arith.constant 0 : i32
    %c0_i32_1 = arith.constant 0 : i32
    return %arg0, %c0_i32, %c0_i32_0 : i32, i32, i32
  }
  func.func @transform_5(%arg0: i32) -> (i32, i32, i32) {
    %c0_i32 = arith.constant 0 : i32
    %c0_i32_0 = arith.constant 0 : i32
    %c0_i32_1 = arith.constant 0 : i32
    return %arg0, %c0_i32, %c0_i32_0 : i32, i32, i32
  }
  func.func @transform_6(%arg0: i32) -> (i32, i32, i32) {
    %c0_i32 = arith.constant 0 : i32
    %c0_i32_0 = arith.constant 0 : i32
    %c0_i32_1 = arith.constant 0 : i32
    return %arg0, %c0_i32, %c0_i32_0 : i32, i32, i32
  }
  func.func @transform_7(%arg0: i32) -> (i32, i32, i32) {
    %c0_i32 = arith.constant 0 : i32
    %c0_i32_0 = arith.constant 0 : i32
    %c0_i32_1 = arith.constant 0 : i32
    return %arg0, %c0_i32, %c0_i32_0 : i32, i32, i32
  }
  func.func @transform_8(%arg0: i32) -> (i32, i32, i32) {
    %c0_i32 = arith.constant 0 : i32
    %c0_i32_0 = arith.constant 0 : i32
    %c0_i32_1 = arith.constant 0 : i32
    return %arg0, %c0_i32, %c0_i32_0 : i32, i32, i32
  }
  func.func @transform_9(%arg0: i32) -> (i32, i32, i32) {
    %c0_i32 = arith.constant 0 : i32
    %c0_i32_0 = arith.constant 0 : i32
    %c0_i32_1 = arith.constant 0 : i32
    return %arg0, %c0_i32, %c0_i32_0 : i32, i32, i32
  }
  func.func @transform_10(%arg0: i32) -> (i32, i32, i32) {
    %c0_i32 = arith.constant 0 : i32
    %c0_i32_0 = arith.constant 0 : i32
    %c0_i32_1 = arith.constant 0 : i32
    return %arg0, %c0_i32, %c0_i32_0 : i32, i32, i32
  }
  func.func @transform_11(%arg0: i32) -> (i32, i32, i32) {
    %c0_i32 = arith.constant 0 : i32
    %c0_i32_0 = arith.constant 0 : i32
    %c0_i32_1 = arith.constant 0 : i32
    return %arg0, %c0_i32, %c0_i32_0 : i32, i32, i32
  }
  func.func @transform_12(%arg0: i32) -> (i32, i32, i32) {
    %c0_i32 = arith.constant 0 : i32
    %c0_i32_0 = arith.constant 0 : i32
    %c0_i32_1 = arith.constant 0 : i32
    return %arg0, %c0_i32, %c0_i32_0 : i32, i32, i32
  }
  func.func @transform_13(%arg0: i32) -> (i32, i32, i32) {
    %c0_i32 = arith.constant 0 : i32
    %c0_i32_0 = arith.constant 0 : i32
    %c0_i32_1 = arith.constant 0 : i32
    return %arg0, %c0_i32, %c0_i32_0 : i32, i32, i32
  }
  func.func @transform_14(%arg0: i32) -> (i32, i32, i32) {
    %c0_i32 = arith.constant 0 : i32
    %c0_i32_0 = arith.constant 0 : i32
    %c0_i32_1 = arith.constant 0 : i32
    return %arg0, %c0_i32, %c0_i32_0 : i32, i32, i32
  }
  func.func @transform_15(%arg0: i32) -> (i32, i32, i32) {
    %c0_i32 = arith.constant 0 : i32
    %c0_i32_0 = arith.constant 0 : i32
    %c0_i32_1 = arith.constant 0 : i32
    %c0_i32_2 = arith.constant 0 : i32
    return %c0_i32, %c0_i32_0, %c0_i32_1 : i32, i32, i32
  }
}

module attributes {stable_mosaic.version = 11 : i64} {
  func.func @_prompt_pass_kernel(%arg0: i32, %arg1: memref<2x16x32xf32, #tpu.memory_space<vmem>>, %arg2: memref<1x1x16xf32, #tpu.memory_space<vmem>>, %arg3: memref<1x2x16x32xf32, #tpu.memory_space<vmem>>, %arg4: memref<2x16xf32, #tpu.memory_space<vmem>>, %arg5: memref<1x32xf32, #tpu.memory_space<vmem>>, %arg6: memref<1x32xf32, #tpu.memory_space<vmem>>, %arg7: memref<32x16xf32, #tpu.memory_space<vmem>>, %arg8: memref<1x16xf32, #tpu.memory_space<vmem>>, %arg9: memref<1x1x32xf32, #tpu.memory_space<vmem>>, %arg10: memref<1x1x32xf32, #tpu.memory_space<vmem>>, %arg11: memref<1x32x96xf32, #tpu.memory_space<vmem>>, %arg12: memref<1x1x96xf32, #tpu.memory_space<vmem>>, %arg13: memref<1x32x32xf32, #tpu.memory_space<vmem>>, %arg14: memref<1x1x32xf32, #tpu.memory_space<vmem>>, %arg15: memref<1x1x32xf32, #tpu.memory_space<vmem>>, %arg16: memref<1x1x32xf32, #tpu.memory_space<vmem>>, %arg17: memref<1x32x128xf32, #tpu.memory_space<vmem>>, %arg18: memref<1x1x128xf32, #tpu.memory_space<vmem>>, %arg19: memref<1x128x32xf32, #tpu.memory_space<vmem>>, %arg20: memref<1x1x32xf32, #tpu.memory_space<vmem>>, %arg21: memref<2x16x16xf32, #tpu.memory_space<vmem>>, %arg22: memref<2x16x32xf32, #tpu.memory_space<vmem>>) attributes {dimension_semantics = [#tpu.dimension_semantics<arbitrary>], iteration_bounds = array<i64: 5>, scalar_prefetch = 0 : i64, scratch_operands = 1 : i64, tpu.core_type = #tpu.core_type<tc>, window_params = [{pipeline_mode = #tpu.pipeline_mode<synchronous>, transform_indices = @transform_0, window_bounds = array<i64: 2, 16, 32>}, {transform_indices = @transform_1, window_bounds = array<i64: 1, 1, 16>}, {transform_indices = @transform_2, window_bounds = array<i64: 1, 2, 16, 32>}, {pipeline_mode = #tpu.pipeline_mode<synchronous>, transform_indices = @transform_3, window_bounds = array<i64: 2, 16>}, {pipeline_mode = #tpu.pipeline_mode<synchronous>, transform_indices = @transform_4, window_bounds = array<i64: 1, 32>}, {pipeline_mode = #tpu.pipeline_mode<synchronous>, transform_indices = @transform_5, window_bounds = array<i64: 1, 32>}, {pipeline_mode = #tpu.pipeline_mode<synchronous>, transform_indices = @transform_6, window_bounds = array<i64: 32, 16>}, {pipeline_mode = #tpu.pipeline_mode<synchronous>, transform_indices = @transform_7, window_bounds = array<i64: 1, 16>}, {transform_indices = @transform_8, window_bounds = array<i64: 1, 1, 32>}, {transform_indices = @transform_9, window_bounds = array<i64: 1, 1, 32>}, {transform_indices = @transform_10, window_bounds = array<i64: 1, 32, 96>}, {transform_indices = @transform_11, window_bounds = array<i64: 1, 1, 96>}, {transform_indices = @transform_12, window_bounds = array<i64: 1, 32, 32>}, {transform_indices = @transform_13, window_bounds = array<i64: 1, 1, 32>}, {transform_indices = @transform_14, window_bounds = array<i64: 1, 1, 32>}, {transform_indices = @transform_15, window_bounds = array<i64: 1, 1, 32>}, {transform_indices = @transform_16, window_bounds = array<i64: 1, 32, 128>}, {transform_indices = @transform_17, window_bounds = array<i64: 1, 1, 128>}, {transform_indices = @transform_18, window_bounds = array<i64: 1, 128, 32>}, {transform_indices = @transform_19, window_bounds = array<i64: 1, 1, 32>}, {pipeline_mode = #tpu.pipeline_mode<synchronous>, transform_indices = @transform_20, window_bounds = array<i64: 2, 16, 16>}]} {
    %c0_i32 = arith.constant 0 : i32
    %0 = arith.cmpi eq, %arg0, %c0_i32 : i32
    %1 = arith.extui %0 : i1 to i32
    %c0_i32_0 = arith.constant 0 : i32
    %2 = arith.cmpi ne, %1, %c0_i32_0 : i32
    scf.if %2 {
      %c0_89 = arith.constant 0 : index
      %c0_90 = arith.constant 0 : index
      %c0_91 = arith.constant 0 : index
      %213 = vector.load %arg1[%c0_89, %c0_90, %c0_91] : memref<2x16x32xf32, #tpu.memory_space<vmem>>, vector<2x16x32xf32>
      %c0_92 = arith.constant 0 : index
      %c0_93 = arith.constant 0 : index
      %c0_94 = arith.constant 0 : index
      %214 = vector.load %arg22[%c0_92, %c0_93, %c0_94] : memref<2x16x32xf32, #tpu.memory_space<vmem>>, vector<2x16x32xf32>
      tpu.vector_store %arg22[%c0_92, %c0_93, %c0_94], %213 {strides = array<i32>} : memref<2x16x32xf32, #tpu.memory_space<vmem>>, vector<2x16x32xf32>,
    } else {
    }
    %c0 = arith.constant 0 : index
    %c0_1 = arith.constant 0 : index
    %c0_2 = arith.constant 0 : index
    %3 = vector.load %arg2[%c0, %c0_1, %c0_2] : memref<1x1x16xf32, #tpu.memory_space<vmem>>, vector<1x1x16xf32>
    %4 = vector.shape_cast %3 : vector<1x1x16xf32> to vector<1x16xf32>
    %5 = tpu.iota {dimensions = array<i32: 1>} : vector<1x16x1xi32>
    %c5_i32 = arith.constant 5 : i32
    %6 = vector.broadcast %c5_i32 : i32 to vector<1x16x1xi32>
    %7 = arith.cmpi slt, %5, %6 : vector<1x16x1xi32>
    %c0_3 = arith.constant 0 : index
    %c0_4 = arith.constant 0 : index
    %c0_5 = arith.constant 0 : index
    %8 = vector.load %arg22[%c0_3, %c0_4, %c0_5] : memref<2x16x32xf32, #tpu.memory_space<vmem>>, vector<2x16x32xf32>
    %c0_6 = arith.constant 0 : index
    %c0_7 = arith.constant 0 : index
    %c0_8 = arith.constant 0 : index
    %c0_9 = arith.constant 0 : index
    %9 = vector.load %arg3[%c0_6, %c0_7, %c0_8, %c0_9] : memref<1x2x16x32xf32, #tpu.memory_space<vmem>>, vector<1x2x16x32xf32>
    %10 = vector.shape_cast %9 : vector<1x2x16x32xf32> to vector<2x16x32xf32>
    %11 = vector.shape_cast %7 : vector<1x16x1xi1> to vector<1x16x1xi1>
    %12 = vector.broadcast %11 : vector<1x16x1xi1> to vector<2x16x32xi1>
    %13 = arith.select %12, %8, %10 : vector<2x16x32xi1>, vector<2x16x32xf32>
    %14 = vector.shape_cast %13 : vector<2x16x32xf32> to vector<32x32xf32>
    %c0_10 = arith.constant 0 : index
    %c0_11 = arith.constant 0 : index
    %c0_12 = arith.constant 0 : index
    %15 = vector.load %arg9[%c0_10, %c0_11, %c0_12] : memref<1x1x32xf32, #tpu.memory_space<vmem>>, vector<1x1x32xf32>
    %16 = vector.shape_cast %15 : vector<1x1x32xf32> to vector<1x32xf32>
    %c0_13 = arith.constant 0 : index
    %c0_14 = arith.constant 0 : index
    %c0_15 = arith.constant 0 : index
    %17 = vector.load %arg10[%c0_13, %c0_14, %c0_15] : memref<1x1x32xf32, #tpu.memory_space<vmem>>, vector<1x1x32xf32>
    %18 = vector.shape_cast %17 : vector<1x1x32xf32> to vector<1x32xf32>
    %cst = arith.constant dense<0.000000e+00> : vector<32xf32>
    %19 = vector.multi_reduction <add>, %14, %cst [1] : vector<32x32xf32> to vector<32xf32>
    %20 = vector.shape_cast %19 : vector<32xf32> to vector<32x1xf32>
    %cst_16 = arith.constant 3.200000e+01 : f32
    %21 = vector.broadcast %cst_16 : f32 to vector<32x1xf32>
    %22 = arith.divf %20, %21 : vector<32x1xf32>
    %23 = vector.broadcast %22 : vector<32x1xf32> to vector<32x32xf32>
    %24 = arith.subf %14, %23 : vector<32x32xf32>
    %25 = arith.mulf %24, %24 : vector<32x32xf32>
    %cst_17 = arith.constant dense<0.000000e+00> : vector<32xf32>
    %26 = vector.multi_reduction <add>, %25, %cst_17 [1] : vector<32x32xf32> to vector<32xf32>
    %27 = vector.shape_cast %26 : vector<32xf32> to vector<32x1xf32>
    %cst_18 = arith.constant 3.200000e+01 : f32
    %28 = vector.broadcast %cst_18 : f32 to vector<32x1xf32>
    %29 = arith.divf %27, %28 : vector<32x1xf32>
    %30 = vector.broadcast %22 : vector<32x1xf32> to vector<32x32xf32>
    %31 = arith.subf %14, %30 : vector<32x32xf32>
    %cst_19 = arith.constant 9.99999997E-7 : f32
    %32 = vector.broadcast %cst_19 : f32 to vector<32x1xf32>
    %33 = arith.addf %29, %32 : vector<32x1xf32>
    %34 = math.rsqrt %33 : vector<32x1xf32>
    %35 = vector.broadcast %34 : vector<32x1xf32> to vector<32x32xf32>
    %36 = arith.mulf %31, %35 : vector<32x32xf32>
    %37 = vector.broadcast %16 : vector<1x32xf32> to vector<32x32xf32>
    %38 = arith.mulf %36, %37 : vector<32x32xf32>
    %39 = vector.broadcast %18 : vector<1x32xf32> to vector<32x32xf32>
    %40 = arith.addf %38, %39 : vector<32x32xf32>
    %c0_20 = arith.constant 0 : index
    %c0_21 = arith.constant 0 : index
    %c0_22 = arith.constant 0 : index
    %41 = vector.load %arg11[%c0_20, %c0_21, %c0_22] : memref<1x32x96xf32, #tpu.memory_space<vmem>>, vector<1x32x96xf32>
    %42 = vector.shape_cast %41 : vector<1x32x96xf32> to vector<32x96xf32>
    %cst_23 = arith.constant dense<0.000000e+00> : vector<32x96xf32>
    %43 = tpu.matmul %40, %42, %cst_23 {dimension_numbers = #tpu.dot_dimension_numbers<[1], [0], [0], [1], [0, 0, 1, 1], [], []>} : vector<32x32xf32>, vector<32x96xf32>, vector<32x96xf32> -> vector<32x96xf32>
    %c0_24 = arith.constant 0 : index
    %c0_25 = arith.constant 0 : index
    %c0_26 = arith.constant 0 : index
    %44 = vector.load %arg12[%c0_24, %c0_25, %c0_26] : memref<1x1x96xf32, #tpu.memory_space<vmem>>, vector<1x1x96xf32>
    %45 = vector.shape_cast %44 : vector<1x1x96xf32> to vector<1x96xf32>
    %46 = vector.broadcast %45 : vector<1x96xf32> to vector<32x96xf32>
    %47 = arith.addf %43, %46 : vector<32x96xf32>
    %cst_27 = arith.constant 1.000000e+00 : f32
    %48 = vector.broadcast %cst_27 : f32 to vector<1x16xf32>
    %49 = arith.subf %4, %48 : vector<1x16xf32>
    %cst_28 = arith.constant 1.000000e+09 : f32
    %50 = vector.broadcast %cst_28 : f32 to vector<1x16xf32>
    %51 = arith.mulf %49, %50 : vector<1x16xf32>
    %52 = vector.shape_cast %51 : vector<1x16xf32> to vector<1x1x16xf32>
    %53 = vector.extract_strided_slice %47 {offsets = [0, 0], sizes = [32, 8], strides = [1, 1]} : vector<32x96xf32> to vector<32x8xf32>
    %54 = vector.shape_cast %53 : vector<32x8xf32> to vector<2x16x8xf32>
    %55 = vector.extract_strided_slice %47 {offsets = [0, 32], sizes = [32, 8], strides = [1, 1]} : vector<32x96xf32> to vector<32x8xf32>
    %56 = vector.shape_cast %55 : vector<32x8xf32> to vector<2x16x8xf32>
    %57 = vector.extract_strided_slice %47 {offsets = [0, 64], sizes = [32, 8], strides = [1, 1]} : vector<32x96xf32> to vector<32x8xf32>
    %58 = vector.shape_cast %57 : vector<32x8xf32> to vector<2x16x8xf32>
    "tpu.trace_start"() <{level = 10 : i32, message = "bqd,bkd->bqk"}> : () -> ()
    %cst_29 = arith.constant dense<0.000000e+00> : vector<2x16x16xf32>
    %59 = tpu.matmul %54, %56, %cst_29 {dimension_numbers = #tpu.dot_dimension_numbers<[2], [2], [1], [1], [0, 0, 0, 1, 1, 1], [0], [0]>} : vector<2x16x8xf32>, vector<2x16x8xf32>, vector<2x16x16xf32> -> vector<2x16x16xf32>
    "tpu.trace_stop"() : () -> ()
    %cst_30 = arith.constant 0.353553385 : f32
    %60 = vector.broadcast %cst_30 : f32 to vector<2x16x16xf32>
    %61 = arith.mulf %59, %60 : vector<2x16x16xf32>
    %62 = vector.broadcast %52 : vector<1x1x16xf32> to vector<2x16x16xf32>
    %63 = arith.addf %61, %62 : vector<2x16x16xf32>
    %cst_31 = arith.constant dense<0xFF800000> : vector<2x16xf32>
    %64 = vector.multi_reduction <maximumf>, %63, %cst_31 [2] : vector<2x16x16xf32> to vector<2x16xf32>
    %65 = vector.shape_cast %64 : vector<2x16xf32> to vector<2x16x1xf32>
    %66 = vector.broadcast %65 : vector<2x16x1xf32> to vector<2x16x16xf32>
    %67 = arith.subf %63, %66 : vector<2x16x16xf32>
    %68 = math.exp %67 : vector<2x16x16xf32>
    %cst_32 = arith.constant dense<0.000000e+00> : vector<2x16xf32>
    %69 = vector.multi_reduction <add>, %68, %cst_32 [2] : vector<2x16x16xf32> to vector<2x16xf32>
    %70 = vector.shape_cast %69 : vector<2x16xf32> to vector<2x16x1xf32>
    %71 = tpu.reciprocal %70 {approx = true} : vector<2x16x1xf32> -> vector<2x16x1xf32>
    %72 = vector.broadcast %71 : vector<2x16x1xf32> to vector<2x16x16xf32>
    %73 = arith.mulf %68, %72 : vector<2x16x16xf32>
    "tpu.trace_start"() <{level = 10 : i32, message = "bqk,bkd->bqd"}> : () -> ()
    %cst_33 = arith.constant dense<0.000000e+00> : vector<2x16x8xf32>
    %74 = tpu.matmul %73, %58, %cst_33 {dimension_numbers = #tpu.dot_dimension_numbers<[2], [1], [1], [2], [0, 0, 0, 1, 1, 2], [0], [0]>} : vector<2x16x16xf32>, vector<2x16x8xf32>, vector<2x16x8xf32> -> vector<2x16x8xf32>
    "tpu.trace_stop"() : () -> ()
    %75 = vector.shape_cast %74 : vector<2x16x8xf32> to vector<32x8xf32>
    %76 = vector.extract_strided_slice %47 {offsets = [0, 8], sizes = [32, 8], strides = [1, 1]} : vector<32x96xf32> to vector<32x8xf32>
    %77 = vector.shape_cast %76 : vector<32x8xf32> to vector<2x16x8xf32>
    %78 = vector.extract_strided_slice %47 {offsets = [0, 40], sizes = [32, 8], strides = [1, 1]} : vector<32x96xf32> to vector<32x8xf32>
    %79 = vector.shape_cast %78 : vector<32x8xf32> to vector<2x16x8xf32>
    %80 = vector.extract_strided_slice %47 {offsets = [0, 72], sizes = [32, 8], strides = [1, 1]} : vector<32x96xf32> to vector<32x8xf32>
    %81 = vector.shape_cast %80 : vector<32x8xf32> to vector<2x16x8xf32>
    "tpu.trace_start"() <{level = 10 : i32, message = "bqd,bkd->bqk"}> : () -> ()
    %cst_34 = arith.constant dense<0.000000e+00> : vector<2x16x16xf32>
    %82 = tpu.matmul %77, %79, %cst_34 {dimension_numbers = #tpu.dot_dimension_numbers<[2], [2], [1], [1], [0, 0, 0, 1, 1, 1], [0], [0]>} : vector<2x16x8xf32>, vector<2x16x8xf32>, vector<2x16x16xf32> -> vector<2x16x16xf32>
    "tpu.trace_stop"() : () -> ()
    %cst_35 = arith.constant 0.353553385 : f32
    %83 = vector.broadcast %cst_35 : f32 to vector<2x16x16xf32>
    %84 = arith.mulf %82, %83 : vector<2x16x16xf32>
    %85 = vector.broadcast %52 : vector<1x1x16xf32> to vector<2x16x16xf32>
    %86 = arith.addf %84, %85 : vector<2x16x16xf32>
    %cst_36 = arith.constant dense<0xFF800000> : vector<2x16xf32>
    %87 = vector.multi_reduction <maximumf>, %86, %cst_36 [2] : vector<2x16x16xf32> to vector<2x16xf32>
    %88 = vector.shape_cast %87 : vector<2x16xf32> to vector<2x16x1xf32>
    %89 = vector.broadcast %88 : vector<2x16x1xf32> to vector<2x16x16xf32>
    %90 = arith.subf %86, %89 : vector<2x16x16xf32>
    %91 = math.exp %90 : vector<2x16x16xf32>
    %cst_37 = arith.constant dense<0.000000e+00> : vector<2x16xf32>
    %92 = vector.multi_reduction <add>, %91, %cst_37 [2] : vector<2x16x16xf32> to vector<2x16xf32>
    %93 = vector.shape_cast %92 : vector<2x16xf32> to vector<2x16x1xf32>
    %94 = tpu.reciprocal %93 {approx = true} : vector<2x16x1xf32> -> vector<2x16x1xf32>
    %95 = vector.broadcast %94 : vector<2x16x1xf32> to vector<2x16x16xf32>
    %96 = arith.mulf %91, %95 : vector<2x16x16xf32>
    "tpu.trace_start"() <{level = 10 : i32, message = "bqk,bkd->bqd"}> : () -> ()
    %cst_38 = arith.constant dense<0.000000e+00> : vector<2x16x8xf32>
    %97 = tpu.matmul %96, %81, %cst_38 {dimension_numbers = #tpu.dot_dimension_numbers<[2], [1], [1], [2], [0, 0, 0, 1, 1, 2], [0], [0]>} : vector<2x16x16xf32>, vector<2x16x8xf32>, vector<2x16x8xf32> -> vector<2x16x8xf32>
    "tpu.trace_stop"() : () -> ()
    %98 = vector.shape_cast %97 : vector<2x16x8xf32> to vector<32x8xf32>
    %99 = vector.extract_strided_slice %47 {offsets = [0, 16], sizes = [32, 8], strides = [1, 1]} : vector<32x96xf32> to vector<32x8xf32>
    %100 = vector.shape_cast %99 : vector<32x8xf32> to vector<2x16x8xf32>
    %101 = vector.extract_strided_slice %47 {offsets = [0, 48], sizes = [32, 8], strides = [1, 1]} : vector<32x96xf32> to vector<32x8xf32>
    %102 = vector.shape_cast %101 : vector<32x8xf32> to vector<2x16x8xf32>
    %103 = vector.extract_strided_slice %47 {offsets = [0, 80], sizes = [32, 8], strides = [1, 1]} : vector<32x96xf32> to vector<32x8xf32>
    %104 = vector.shape_cast %103 : vector<32x8xf32> to vector<2x16x8xf32>
    "tpu.trace_start"() <{level = 10 : i32, message = "bqd,bkd->bqk"}> : () -> ()
    %cst_39 = arith.constant dense<0.000000e+00> : vector<2x16x16xf32>
    %105 = tpu.matmul %100, %102, %cst_39 {dimension_numbers = #tpu.dot_dimension_numbers<[2], [2], [1], [1], [0, 0, 0, 1, 1, 1], [0], [0]>} : vector<2x16x8xf32>, vector<2x16x8xf32>, vector<2x16x16xf32> -> vector<2x16x16xf32>
    "tpu.trace_stop"() : () -> ()
    %cst_40 = arith.constant 0.353553385 : f32
    %106 = vector.broadcast %cst_40 : f32 to vector<2x16x16xf32>
    %107 = arith.mulf %105, %106 : vector<2x16x16xf32>
    %108 = vector.broadcast %52 : vector<1x1x16xf32> to vector<2x16x16xf32>
    %109 = arith.addf %107, %108 : vector<2x16x16xf32>
    %cst_41 = arith.constant dense<0xFF800000> : vector<2x16xf32>
    %110 = vector.multi_reduction <maximumf>, %109, %cst_41 [2] : vector<2x16x16xf32> to vector<2x16xf32>
    %111 = vector.shape_cast %110 : vector<2x16xf32> to vector<2x16x1xf32>
    %112 = vector.broadcast %111 : vector<2x16x1xf32> to vector<2x16x16xf32>
    %113 = arith.subf %109, %112 : vector<2x16x16xf32>
    %114 = math.exp %113 : vector<2x16x16xf32>
    %cst_42 = arith.constant dense<0.000000e+00> : vector<2x16xf32>
    %115 = vector.multi_reduction <add>, %114, %cst_42 [2] : vector<2x16x16xf32> to vector<2x16xf32>
    %116 = vector.shape_cast %115 : vector<2x16xf32> to vector<2x16x1xf32>
    %117 = tpu.reciprocal %116 {approx = true} : vector<2x16x1xf32> -> vector<2x16x1xf32>
    %118 = vector.broadcast %117 : vector<2x16x1xf32> to vector<2x16x16xf32>
    %119 = arith.mulf %114, %118 : vector<2x16x16xf32>
    "tpu.trace_start"() <{level = 10 : i32, message = "bqk,bkd->bqd"}> : () -> ()
    %cst_43 = arith.constant dense<0.000000e+00> : vector<2x16x8xf32>
    %120 = tpu.matmul %119, %104, %cst_43 {dimension_numbers = #tpu.dot_dimension_numbers<[2], [1], [1], [2], [0, 0, 0, 1, 1, 2], [0], [0]>} : vector<2x16x16xf32>, vector<2x16x8xf32>, vector<2x16x8xf32> -> vector<2x16x8xf32>
    "tpu.trace_stop"() : () -> ()
    %121 = vector.shape_cast %120 : vector<2x16x8xf32> to vector<32x8xf32>
    %122 = vector.extract_strided_slice %47 {offsets = [0, 24], sizes = [32, 8], strides = [1, 1]} : vector<32x96xf32> to vector<32x8xf32>
    %123 = vector.shape_cast %122 : vector<32x8xf32> to vector<2x16x8xf32>
    %124 = vector.extract_strided_slice %47 {offsets = [0, 56], sizes = [32, 8], strides = [1, 1]} : vector<32x96xf32> to vector<32x8xf32>
    %125 = vector.shape_cast %124 : vector<32x8xf32> to vector<2x16x8xf32>
    %126 = vector.extract_strided_slice %47 {offsets = [0, 88], sizes = [32, 8], strides = [1, 1]} : vector<32x96xf32> to vector<32x8xf32>
    %127 = vector.shape_cast %126 : vector<32x8xf32> to vector<2x16x8xf32>
    "tpu.trace_start"() <{level = 10 : i32, message = "bqd,bkd->bqk"}> : () -> ()
    %cst_44 = arith.constant dense<0.000000e+00> : vector<2x16x16xf32>
    %128 = tpu.matmul %123, %125, %cst_44 {dimension_numbers = #tpu.dot_dimension_numbers<[2], [2], [1], [1], [0, 0, 0, 1, 1, 1], [0], [0]>} : vector<2x16x8xf32>, vector<2x16x8xf32>, vector<2x16x16xf32> -> vector<2x16x16xf32>
    "tpu.trace_stop"() : () -> ()
    %cst_45 = arith.constant 0.353553385 : f32
    %129 = vector.broadcast %cst_45 : f32 to vector<2x16x16xf32>
    %130 = arith.mulf %128, %129 : vector<2x16x16xf32>
    %131 = vector.broadcast %52 : vector<1x1x16xf32> to vector<2x16x16xf32>
    %132 = arith.addf %130, %131 : vector<2x16x16xf32>
    %cst_46 = arith.constant dense<0xFF800000> : vector<2x16xf32>
    %133 = vector.multi_reduction <maximumf>, %132, %cst_46 [2] : vector<2x16x16xf32> to vector<2x16xf32>
    %134 = vector.shape_cast %133 : vector<2x16xf32> to vector<2x16x1xf32>
    %135 = vector.broadcast %134 : vector<2x16x1xf32> to vector<2x16x16xf32>
    %136 = arith.subf %132, %135 : vector<2x16x16xf32>
    %137 = math.exp %136 : vector<2x16x16xf32>
    %cst_47 = arith.constant dense<0.000000e+00> : vector<2x16xf32>
    %138 = vector.multi_reduction <add>, %137, %cst_47 [2] : vector<2x16x16xf32> to vector<2x16xf32>
    %139 = vector.shape_cast %138 : vector<2x16xf32> to vector<2x16x1xf32>
    %140 = tpu.reciprocal %139 {approx = true} : vector<2x16x1xf32> -> vector<2x16x1xf32>
    %141 = vector.broadcast %140 : vector<2x16x1xf32> to vector<2x16x16xf32>
    %142 = arith.mulf %137, %141 : vector<2x16x16xf32>
    "tpu.trace_start"() <{level = 10 : i32, message = "bqk,bkd->bqd"}> : () -> ()
    %cst_48 = arith.constant dense<0.000000e+00> : vector<2x16x8xf32>
    %143 = tpu.matmul %142, %127, %cst_48 {dimension_numbers = #tpu.dot_dimension_numbers<[2], [1], [1], [2], [0, 0, 0, 1, 1, 2], [0], [0]>} : vector<2x16x16xf32>, vector<2x16x8xf32>, vector<2x16x8xf32> -> vector<2x16x8xf32>
    "tpu.trace_stop"() : () -> ()
    %144 = vector.shape_cast %143 : vector<2x16x8xf32> to vector<32x8xf32>
    %145 = tpu.concatenate %75, %98, %121, %144 in 1 : vector<32x8xf32>, vector<32x8xf32>, vector<32x8xf32>, vector<32x8xf32> -> vector<32x32xf32>
    %c0_49 = arith.constant 0 : index
    %c0_50 = arith.constant 0 : index
    %c0_51 = arith.constant 0 : index
    %146 = vector.load %arg13[%c0_49, %c0_50, %c0_51] : memref<1x32x32xf32, #tpu.memory_space<vmem>>, vector<1x32x32xf32>
    %147 = vector.shape_cast %146 : vector<1x32x32xf32> to vector<32x32xf32>
    %cst_52 = arith.constant dense<0.000000e+00> : vector<32x32xf32>
    %148 = tpu.matmul %145, %147, %cst_52 {dimension_numbers = #tpu.dot_dimension_numbers<[1], [0], [0], [1], [0, 0, 1, 1], [], []>} : vector<32x32xf32>, vector<32x32xf32>, vector<32x32xf32> -> vector<32x32xf32>
    %c0_53 = arith.constant 0 : index
    %c0_54 = arith.constant 0 : index
    %c0_55 = arith.constant 0 : index
    %149 = vector.load %arg14[%c0_53, %c0_54, %c0_55] : memref<1x1x32xf32, #tpu.memory_space<vmem>>, vector<1x1x32xf32>
    %150 = vector.shape_cast %149 : vector<1x1x32xf32> to vector<1x32xf32>
    %151 = vector.broadcast %150 : vector<1x32xf32> to vector<32x32xf32>
    %152 = arith.addf %148, %151 : vector<32x32xf32>
    %153 = arith.addf %14, %152 : vector<32x32xf32>
    %c0_56 = arith.constant 0 : index
    %c0_57 = arith.constant 0 : index
    %c0_58 = arith.constant 0 : index
    %154 = vector.load %arg15[%c0_56, %c0_57, %c0_58] : memref<1x1x32xf32, #tpu.memory_space<vmem>>, vector<1x1x32xf32>
    %155 = vector.shape_cast %154 : vector<1x1x32xf32> to vector<1x32xf32>
    %c0_59 = arith.constant 0 : index
    %c0_60 = arith.constant 0 : index
    %c0_61 = arith.constant 0 : index
    %156 = vector.load %arg16[%c0_59, %c0_60, %c0_61] : memref<1x1x32xf32, #tpu.memory_space<vmem>>, vector<1x1x32xf32>
    %157 = vector.shape_cast %156 : vector<1x1x32xf32> to vector<1x32xf32>
    %cst_62 = arith.constant dense<0.000000e+00> : vector<32xf32>
    %158 = vector.multi_reduction <add>, %153, %cst_62 [1] : vector<32x32xf32> to vector<32xf32>
    %159 = vector.shape_cast %158 : vector<32xf32> to vector<32x1xf32>
    %cst_63 = arith.constant 3.200000e+01 : f32
    %160 = vector.broadcast %cst_63 : f32 to vector<32x1xf32>
    %161 = arith.divf %159, %160 : vector<32x1xf32>
    %162 = vector.broadcast %161 : vector<32x1xf32> to vector<32x32xf32>
    %163 = arith.subf %153, %162 : vector<32x32xf32>
    %164 = arith.mulf %163, %163 : vector<32x32xf32>
    %cst_64 = arith.constant dense<0.000000e+00> : vector<32xf32>
    %165 = vector.multi_reduction <add>, %164, %cst_64 [1] : vector<32x32xf32> to vector<32xf32>
    %166 = vector.shape_cast %165 : vector<32xf32> to vector<32x1xf32>
    %cst_65 = arith.constant 3.200000e+01 : f32
    %167 = vector.broadcast %cst_65 : f32 to vector<32x1xf32>
    %168 = arith.divf %166, %167 : vector<32x1xf32>
    %169 = vector.broadcast %161 : vector<32x1xf32> to vector<32x32xf32>
    %170 = arith.subf %153, %169 : vector<32x32xf32>
    %cst_66 = arith.constant 9.99999997E-7 : f32
    %171 = vector.broadcast %cst_66 : f32 to vector<32x1xf32>
    %172 = arith.addf %168, %171 : vector<32x1xf32>
    %173 = math.rsqrt %172 : vector<32x1xf32>
    %174 = vector.broadcast %173 : vector<32x1xf32> to vector<32x32xf32>
    %175 = arith.mulf %170, %174 : vector<32x32xf32>
    %176 = vector.broadcast %155 : vector<1x32xf32> to vector<32x32xf32>
    %177 = arith.mulf %175, %176 : vector<32x32xf32>
    %178 = vector.broadcast %157 : vector<1x32xf32> to vector<32x32xf32>
    %179 = arith.addf %177, %178 : vector<32x32xf32>
    %c0_67 = arith.constant 0 : index
    %c0_68 = arith.constant 0 : index
    %c0_69 = arith.constant 0 : index
    %180 = vector.load %arg17[%c0_67, %c0_68, %c0_69] : memref<1x32x128xf32, #tpu.memory_space<vmem>>, vector<1x32x128xf32>
    %181 = vector.shape_cast %180 : vector<1x32x128xf32> to vector<32x128xf32>
    %cst_70 = arith.constant dense<0.000000e+00> : vector<32x128xf32>
    %182 = tpu.matmul %179, %181, %cst_70 {dimension_numbers = #tpu.dot_dimension_numbers<[1], [0], [0], [1], [0, 0, 1, 1], [], []>} : vector<32x32xf32>, vector<32x128xf32>, vector<32x128xf32> -> vector<32x128xf32>
    %c0_71 = arith.constant 0 : index
    %c0_72 = arith.constant 0 : index
    %c0_73 = arith.constant 0 : index
    %183 = vector.load %arg18[%c0_71, %c0_72, %c0_73] : memref<1x1x128xf32, #tpu.memory_space<vmem>>, vector<1x1x128xf32>
    %184 = vector.shape_cast %183 : vector<1x1x128xf32> to vector<1x128xf32>
    %185 = vector.broadcast %184 : vector<1x128xf32> to vector<32x128xf32>
    %186 = arith.addf %182, %185 : vector<32x128xf32>
    %187 = arith.mulf %186, %186 : vector<32x128xf32>
    %188 = arith.mulf %186, %187 : vector<32x128xf32>
    %cst_74 = arith.constant 4.471500e-02 : f32
    %189 = vector.broadcast %cst_74 : f32 to vector<32x128xf32>
    %190 = arith.mulf %189, %188 : vector<32x128xf32>
    %191 = arith.addf %186, %190 : vector<32x128xf32>
    %cst_75 = arith.constant 0.797884583 : f32
    %192 = vector.broadcast %cst_75 : f32 to vector<32x128xf32>
    %193 = arith.mulf %192, %191 : vector<32x128xf32>
    %194 = math.tanh %193 : vector<32x128xf32>
    %cst_76 = arith.constant 1.000000e+00 : f32
    %195 = vector.broadcast %cst_76 : f32 to vector<32x128xf32>
    %196 = arith.addf %195, %194 : vector<32x128xf32>
    %cst_77 = arith.constant 5.000000e-01 : f32
    %197 = vector.broadcast %cst_77 : f32 to vector<32x128xf32>
    %198 = arith.mulf %197, %196 : vector<32x128xf32>
    %199 = arith.mulf %186, %198 : vector<32x128xf32>
    %c0_78 = arith.constant 0 : index
    %c0_79 = arith.constant 0 : index
    %c0_80 = arith.constant 0 : index
    %200 = vector.load %arg19[%c0_78, %c0_79, %c0_80] : memref<1x128x32xf32, #tpu.memory_space<vmem>>, vector<1x128x32xf32>
    %201 = vector.shape_cast %200 : vector<1x128x32xf32> to vector<128x32xf32>
    %cst_81 = arith.constant dense<0.000000e+00> : vector<32x32xf32>
    %202 = tpu.matmul %199, %201, %cst_81 {dimension_numbers = #tpu.dot_dimension_numbers<[1], [0], [0], [1], [0, 0, 1, 1], [], []>} : vector<32x128xf32>, vector<128x32xf32>, vector<32x32xf32> -> vector<32x32xf32>
    %c0_82 = arith.constant 0 : index
    %c0_83 = arith.constant 0 : index
    %c0_84 = arith.constant 0 : index
    %203 = vector.load %arg20[%c0_82, %c0_83, %c0_84] : memref<1x1x32xf32, #tpu.memory_space<vmem>>, vector<1x1x32xf32>
    %204 = vector.shape_cast %203 : vector<1x1x32xf32> to vector<1x32xf32>
    %205 = vector.broadcast %204 : vector<1x32xf32> to vector<32x32xf32>
    %206 = arith.addf %202, %205 : vector<32x32xf32>
    %207 = arith.addf %153, %206 : vector<32x32xf32>
    %208 = vector.shape_cast %207 : vector<32x32xf32> to vector<2x16x32xf32>
    %c0_85 = arith.constant 0 : index
    %c0_86 = arith.constant 0 : index
    %c0_87 = arith.constant 0 : index
    %209 = vector.load %arg22[%c0_85, %c0_86, %c0_87] : memref<2x16x32xf32, #tpu.memory_space<vmem>>, vector<2x16x32xf32>
    tpu.vector_store %arg22[%c0_85, %c0_86, %c0_87], %208 {strides = array<i32>} : memref<2x16x32xf32, #tpu.memory_space<vmem>>, vector<2x16x32xf32>,
    %c4_i32 = arith.constant 4 : i32
    %210 = arith.cmpi eq, %arg0, %c4_i32 : i32
    %211 = arith.extui %210 : i1 to i32
    %c0_i32_88 = arith.constant 0 : i32
    %212 = arith.cmpi ne, %211, %c0_i32_88 : i32
    scf.if %212 {
      %213 = vector.shape_cast %208 : vector<2x16x32xf32> to vector<32x32xf32>
      %c0_89 = arith.constant 0 : index
      %c0_90 = arith.constant 0 : index
      %214 = vector.load %arg5[%c0_89, %c0_90] : memref<1x32xf32, #tpu.memory_space<vmem>>, vector<1x32xf32>
      %c0_91 = arith.constant 0 : index
      %c0_92 = arith.constant 0 : index
      %215 = vector.load %arg6[%c0_91, %c0_92] : memref<1x32xf32, #tpu.memory_space<vmem>>, vector<1x32xf32>
      %cst_93 = arith.constant dense<0.000000e+00> : vector<32xf32>
      %216 = vector.multi_reduction <add>, %213, %cst_93 [1] : vector<32x32xf32> to vector<32xf32>
      %217 = vector.shape_cast %216 : vector<32xf32> to vector<32x1xf32>
      %cst_94 = arith.constant 3.200000e+01 : f32
      %218 = vector.broadcast %cst_94 : f32 to vector<32x1xf32>
      %219 = arith.divf %217, %218 : vector<32x1xf32>
      %220 = vector.broadcast %219 : vector<32x1xf32> to vector<32x32xf32>
      %221 = arith.subf %213, %220 : vector<32x32xf32>
      %222 = arith.mulf %221, %221 : vector<32x32xf32>
      %cst_95 = arith.constant dense<0.000000e+00> : vector<32xf32>
      %223 = vector.multi_reduction <add>, %222, %cst_95 [1] : vector<32x32xf32> to vector<32xf32>
      %224 = vector.shape_cast %223 : vector<32xf32> to vector<32x1xf32>
      %cst_96 = arith.constant 3.200000e+01 : f32
      %225 = vector.broadcast %cst_96 : f32 to vector<32x1xf32>
      %226 = arith.divf %224, %225 : vector<32x1xf32>
      %227 = vector.broadcast %219 : vector<32x1xf32> to vector<32x32xf32>
      %228 = arith.subf %213, %227 : vector<32x32xf32>
      %cst_97 = arith.constant 9.99999997E-7 : f32
      %229 = vector.broadcast %cst_97 : f32 to vector<32x1xf32>
      %230 = arith.addf %226, %229 : vector<32x1xf32>
      %231 = math.rsqrt %230 : vector<32x1xf32>
      %232 = vector.broadcast %231 : vector<32x1xf32> to vector<32x32xf32>
      %233 = arith.mulf %228, %232 : vector<32x32xf32>
      %234 = vector.broadcast %214 : vector<1x32xf32> to vector<32x32xf32>
      %235 = arith.mulf %233, %234 : vector<32x32xf32>
      %236 = vector.broadcast %215 : vector<1x32xf32> to vector<32x32xf32>
      %237 = arith.addf %235, %236 : vector<32x32xf32>
      %c0_98 = arith.constant 0 : index
      %c0_99 = arith.constant 0 : index
      %238 = vector.load %arg7[%c0_98, %c0_99] : memref<32x16xf32, #tpu.memory_space<vmem>>, vector<32x16xf32>
      %cst_100 = arith.constant dense<0.000000e+00> : vector<32x16xf32>
      %239 = tpu.matmul %237, %238, %cst_100 {dimension_numbers = #tpu.dot_dimension_numbers<[1], [0], [0], [1], [0, 0, 1, 1], [], []>} : vector<32x32xf32>, vector<32x16xf32>, vector<32x16xf32> -> vector<32x16xf32>
      %c0_101 = arith.constant 0 : index
      %c0_102 = arith.constant 0 : index
      %240 = vector.load %arg8[%c0_101, %c0_102] : memref<1x16xf32, #tpu.memory_space<vmem>>, vector<1x16xf32>
      %241 = vector.broadcast %240 : vector<1x16xf32> to vector<32x16xf32>
      %242 = arith.addf %239, %241 : vector<32x16xf32>
      %243 = vector.shape_cast %242 : vector<32x16xf32> to vector<2x16x16xf32>
      %c0_103 = arith.constant 0 : index
      %c0_104 = arith.constant 0 : index
      %244 = vector.load %arg4[%c0_103, %c0_104] : memref<2x16xf32, #tpu.memory_space<vmem>>, vector<2x16xf32>
      %245 = arith.negf %244 : vector<2x16xf32>
      %246 = math.exp %245 : vector<2x16xf32>
      %cst_105 = arith.constant 1.000000e+00 : f32
      %247 = vector.broadcast %cst_105 : f32 to vector<2x16xf32>
      %248 = arith.addf %247, %246 : vector<2x16xf32>
      %249 = arith.divf %247, %248 : vector<2x16xf32>
      %cst_106 = arith.constant 2.000000e+00 : f32
      %250 = vector.broadcast %cst_106 : f32 to vector<2x16xf32>
      %251 = arith.mulf %249, %250 : vector<2x16xf32>
      %252 = vector.shape_cast %251 : vector<2x16xf32> to vector<2x1x16xf32>
      %253 = vector.broadcast %252 : vector<2x1x16xf32> to vector<2x16x16xf32>
      %254 = arith.mulf %243, %253 : vector<2x16x16xf32>
      %c0_107 = arith.constant 0 : index
      %c0_108 = arith.constant 0 : index
      %c0_109 = arith.constant 0 : index
      %255 = vector.load %arg21[%c0_107, %c0_108, %c0_109] : memref<2x16x16xf32, #tpu.memory_space<vmem>>, vector<2x16x16xf32>
      tpu.vector_store %arg21[%c0_107, %c0_108, %c0_109], %254 {strides = array<i32>} : memref<2x16x16xf32, #tpu.memory_space<vmem>>, vector<2x16x16xf32>,
    } else {
    }
    return
  }
  func.func @transform_0(%arg0: i32) -> (i32, i32, i32) {
    %c0_i32 = arith.constant 0 : i32
    %c0_i32_0 = arith.constant 0 : i32
    %c0_i32_1 = arith.constant 0 : i32
    %c0_i32_2 = arith.constant 0 : i32
    return %c0_i32, %c0_i32_0, %c0_i32_1 : i32, i32, i32
  }
  func.func @transform_1(%arg0: i32) -> (i32, i32, i32) {
    %c0_i32 = arith.constant 0 : i32
    %c0_i32_0 = arith.constant 0 : i32
    %c0_i32_1 = arith.constant 0 : i32
    return %arg0, %c0_i32, %c0_i32_0 : i32, i32, i32
  }
  func.func @transform_2(%arg0: i32) -> (i32, i32, i32, i32) {
    %c0_i32 = arith.constant 0 : i32
    %c0_i32_0 = arith.constant 0 : i32
    %c0_i32_1 = arith.constant 0 : i32
    %c0_i32_2 = arith.constant 0 : i32
    return %arg0, %c0_i32, %c0_i32_0, %c0_i32_1 : i32, i32, i32, i32
  }
  func.func @transform_3(%arg0: i32) -> (i32, i32) {
    %c0_i32 = arith.constant 0 : i32
    %c0_i32_0 = arith.constant 0 : i32
    %c0_i32_1 = arith.constant 0 : i32
    return %c0_i32, %c0_i32_0 : i32, i32
  }
  func.func @transform_4(%arg0: i32) -> (i32, i32) {
    %c0_i32 = arith.constant 0 : i32
    %c0_i32_0 = arith.constant 0 : i32
    %c0_i32_1 = arith.constant 0 : i32
    return %c0_i32, %c0_i32_0 : i32, i32
  }
  func.func @transform_5(%arg0: i32) -> (i32, i32) {
    %c0_i32 = arith.constant 0 : i32
    %c0_i32_0 = arith.constant 0 : i32
    %c0_i32_1 = arith.constant 0 : i32
    return %c0_i32, %c0_i32_0 : i32, i32
  }
  func.func @transform_6(%arg0: i32) -> (i32, i32) {
    %c0_i32 = arith.constant 0 : i32
    %c0_i32_0 = arith.constant 0 : i32
    %c0_i32_1 = arith.constant 0 : i32
    return %c0_i32, %c0_i32_0 : i32, i32
  }
  func.func @transform_7(%arg0: i32) -> (i32, i32) {
    %c0_i32 = arith.constant 0 : i32
    %c0_i32_0 = arith.constant 0 : i32
    %c0_i32_1 = arith.constant 0 : i32
    return %c0_i32, %c0_i32_0 : i32, i32
  }
  func.func @transform_8(%arg0: i32) -> (i32, i32, i32) {
    %c0_i32 = arith.constant 0 : i32
    %c0_i32_0 = arith.constant 0 : i32
    %c0_i32_1 = arith.constant 0 : i32
    return %arg0, %c0_i32, %c0_i32_0 : i32, i32, i32
  }
  func.func @transform_9(%arg0: i32) -> (i32, i32, i32) {
    %c0_i32 = arith.constant 0 : i32
    %c0_i32_0 = arith.constant 0 : i32
    %c0_i32_1 = arith.constant 0 : i32
    return %arg0, %c0_i32, %c0_i32_0 : i32, i32, i32
  }
  func.func @transform_10(%arg0: i32) -> (i32, i32, i32) {
    %c0_i32 = arith.constant 0 : i32
    %c0_i32_0 = arith.constant 0 : i32
    %c0_i32_1 = arith.constant 0 : i32
    return %arg0, %c0_i32, %c0_i32_0 : i32, i32, i32
  }
  func.func @transform_11(%arg0: i32) -> (i32, i32, i32) {
    %c0_i32 = arith.constant 0 : i32
    %c0_i32_0 = arith.constant 0 : i32
    %c0_i32_1 = arith.constant 0 : i32
    return %arg0, %c0_i32, %c0_i32_0 : i32, i32, i32
  }
  func.func @transform_12(%arg0: i32) -> (i32, i32, i32) {
    %c0_i32 = arith.constant 0 : i32
    %c0_i32_0 = arith.constant 0 : i32
    %c0_i32_1 = arith.constant 0 : i32
    return %arg0, %c0_i32, %c0_i32_0 : i32, i32, i32
  }
  func.func @transform_13(%arg0: i32) -> (i32, i32, i32) {
    %c0_i32 = arith.constant 0 : i32
    %c0_i32_0 = arith.constant 0 : i32
    %c0_i32_1 = arith.constant 0 : i32
    return %arg0, %c0_i32, %c0_i32_0 : i32, i32, i32
  }
  func.func @transform_14(%arg0: i32) -> (i32, i32, i32) {
    %c0_i32 = arith.constant 0 : i32
    %c0_i32_0 = arith.constant 0 : i32
    %c0_i32_1 = arith.constant 0 : i32
    return %arg0, %c0_i32, %c0_i32_0 : i32, i32, i32
  }
  func.func @transform_15(%arg0: i32) -> (i32, i32, i32) {
    %c0_i32 = arith.constant 0 : i32
    %c0_i32_0 = arith.constant 0 : i32
    %c0_i32_1 = arith.constant 0 : i32
    return %arg0, %c0_i32, %c0_i32_0 : i32, i32, i32
  }
  func.func @transform_16(%arg0: i32) -> (i32, i32, i32) {
    %c0_i32 = arith.constant 0 : i32
    %c0_i32_0 = arith.constant 0 : i32
    %c0_i32_1 = arith.constant 0 : i32
    return %arg0, %c0_i32, %c0_i32_0 : i32, i32, i32
  }
  func.func @transform_17(%arg0: i32) -> (i32, i32, i32) {
    %c0_i32 = arith.constant 0 : i32
    %c0_i32_0 = arith.constant 0 : i32
    %c0_i32_1 = arith.constant 0 : i32
    return %arg0, %c0_i32, %c0_i32_0 : i32, i32, i32
  }
  func.func @transform_18(%arg0: i32) -> (i32, i32, i32) {
    %c0_i32 = arith.constant 0 : i32
    %c0_i32_0 = arith.constant 0 : i32
    %c0_i32_1 = arith.constant 0 : i32
    return %arg0, %c0_i32, %c0_i32_0 : i32, i32, i32
  }
  func.func @transform_19(%arg0: i32) -> (i32, i32, i32) {
    %c0_i32 = arith.constant 0 : i32
    %c0_i32_0 = arith.constant 0 : i32
    %c0_i32_1 = arith.constant 0 : i32
    return %arg0, %c0_i32, %c0_i32_0 : i32, i32, i32
  }
  func.func @transform_20(%arg0: i32) -> (i32, i32, i32) {
    %c0_i32 = arith.constant 0 : i32
    %c0_i32_0 = arith.constant 0 : i32
    %c0_i32_1 = arith.constant 0 : i32
    %c0_i32_2 = arith.constant 0 : i32
    return %c0_i32, %c0_i32_0, %c0_i32_1 : i32, i32, i32
  }
}

</mosaic_0001>

<bundles_post_ra>
// kernel: mvp_forward.3
= control target key start
LH: loop header
LB: loop body
LE: loop exit
PB: predicated region body
PF: predicated region fallthrough
CT: control target
= control target key end

     0   :  { %s4987_s0 = inlined_call_operand.vmem [shape: f32[2,16,32], index: 0, kind: input, shape index: {}]   ;;  %s4988_s1 = inlined_call_operand.vmem [shape: f32[5,1,16], index: 1, kind: input, shape index: {}]   ;;  %s4989_s2 = inlined_call_operand.vmem [shape: f32[5,2,16,32], index: 2, kind: input, shape index: {}]   ;;  %s4990_s3 = inlined_call_operand.vmem [shape: f32[2,16], index: 3, kind: input, shape index: {}]   ;;  %s4991_s4 = inlined_call_operand.vmem [shape: f32[1,32], index: 4, kind: input, shape index: {}]   ;;  %s4992_s5 = inlined_call_operand.vmem [shape: f32[1,32], index: 5, kind: input, shape index: {}]   ;;  %s4993_s6 = inlined_call_operand.vmem [shape: f32[32,16], index: 6, kind: input, shape index: {}]   ;;  %s4994_s7 = inlined_call_operand.vmem [shape: f32[1,16], index: 7, kind: input, shape index: {}]   ;;  %s4995_s8 = inlined_call_operand.vmem [shape: f32[5,1,32], index: 8, kind: input, shape index: {}]   ;;  %s4996_s9 = inlined_call_operand.vmem [shape: f32[5,1,32], index: 9, kind: input, shape index: {}]   ;;  %s4997_s10 = inlined_call_operand.vmem [shape: f32[5,32,96], index: 10, kind: input, shape index: {}]   ;;  %s4998_s11 = inlined_call_operand.vmem [shape: f32[5,1,96], index: 11, kind: input, shape index: {}]   ;;  %s4999_s12 = inlined_call_operand.vmem [shape: f32[5,32,32], index: 12, kind: input, shape index: {}]   ;;  %s5000_s13 = inlined_call_operand.vmem [shape: f32[5,1,32], index: 13, kind: input, shape index: {}]   ;;  %s5001_s14 = inlined_call_operand.vmem [shape: f32[5,1,32], index: 14, kind: input, shape index: {}]   ;;  %s5002_s15 = inlined_call_operand.vmem [shape: f32[5,1,32], index: 15, kind: input, shape index: {}]   ;;  %s5003_s16 = inlined_call_operand.vmem [shape: f32[5,32,128], index: 16, kind: input, shape index: {}]   ;;  %s5004_s17 = inlined_call_operand.vmem [shape: f32[5,1,128], index: 17, kind: input, shape index: {}]   ;;  %s5005_s18 = inlined_call_operand.vmem [shape: f32[5,128,32], index: 18, kind: input, shape index: {}]   ;;  %s5006_s19 = inlined_call_operand.vmem [shape: f32[5,1,32], index: 19, kind: input, shape index: {}]   ;;  %s5007_s20 = inlined_call_operand.vmem [shape: f32[2,16,16], index: 20, kind: output, shape index: {}]  }
   0x1   :  { %5012 = sst [smem:[#allocation4_spill]] %s4987_s0 }
   0x2   :  { %5013 = sst [smem:[#allocation5_spill]] %s4988_s1  ;;  %s4480_s1 = smov 0  }
   0x3   :  { %5014 = sst [smem:[#allocation6_spill]] %s4989_s2 }
   0x4   :  { %5015 = sst [smem:[#allocation7_spill]] %s4990_s3 }
   0x5   :  { %5016 = sst [smem:[#allocation8_spill]] %s4991_s4 }
   0x6   :  { %5017 = sst [smem:[#allocation9_spill]] %s4992_s5 }
   0x7   :  { %5018 = sst [smem:[#allocation10_spill]] %s4993_s6 }
   0x8   :  { %5019 = sst [smem:[#allocation11_spill]] %s4994_s7 }
   0x9   :  { %5020 = sst [smem:[#allocation12_spill]] %s4996_s9 }
   0xa   :  { %5021 = sst [smem:[#allocation13_spill]] %s4997_s10 }
   0xb   :  { %5022 = sst [smem:[#allocation14_spill]] %s4999_s12 }
   0xc   :  { %5023 = sst [smem:[#allocation15_spill]] %s5007_s20 }
   0xd LB: > { %5024 = sst [smem:[#allocation3_spill]] %s4358_s1  ;;  %s4486_s22 = sadd.s32 4294967295, %s4358_s1   ;;  %s4358_s1 = sphi %s4480_s1, %s30_s1  }
   0xe   : > { %p3580_p0 = scmp.ge.s32.totalorder %s4358_s1, 1  ;;  %p669_p1 = scmp.lt.s32.totalorder %s4358_s1, 6 }
  0x10   : > { %p670_p2 = pnand %p3580_p0, %p669_p1 }
  0x11   : > { %p769_p3 = scmp.lt.s32.totalorder (!%p670_p2), %s4486_s22, 4  ;;  %s5026_s4 = sld [smem:[#allocation6_spill]] (!%p670_p2) }
  0x12   : > { %673 = sbr.rel (%p670_p2) target bundleno = 4867 (0x1303), region = 100  ;;  %s5028_s10 = sld [smem:[#allocation13_spill]] (!%p670_p2) }
  0x13   : > { %s5029_s12 = sld [smem:[#allocation14_spill]] (!%p670_p2)  ;;  %p3591_p4 = scmp.ne.s32.totalorder (!%p670_p2), %s4486_s22, 0 }
  0x19   : > { %s4492_s23 = scalar_select %p769_p3, %s4486_s22, 4 }
  0x1a   : > { %824 = sbr.rel (%p3591_p4) target bundleno = 34 (0x22), region = 104  ;;  %s5030_s20 = sld [smem:[#allocation4_spill]] (!%p3591_p4)  ;;  %vm829_vm0 = vcmask (!%p3591_p4), 261120  }
  0x1b   : > { %s3672_s26 = sshll.u32 %s4492_s23, 5  ;;  %s801_s1 = scalar_lea.vmem %s5001_s14, %s4492_s23 }
  0x1c   : > { %s4502_s29 = scalar_lea.vmem %s5026_s4, %s3672_s26  ;;  %s4515_s5 = scalar_lea.vmem %s5028_s10, %s3672_s26 }
  0x1d   : > { %s4524_s4 = scalar_lea.vmem %s5029_s12, %s3672_s26  ;;  %s804_s10 = scalar_lea.vmem %s5002_s15, %s4492_s23 }
  0x1e   : > { %s4541_s25 = scalar_lea.vmem %s5003_s16, %s3672_s26  ;;  %s812_s6 = scalar_lea.vmem %s5004_s17, %s4492_s23 }
  0x1f   : > { %s3676_s12 = sshll.u32 %s4492_s23, 7  ;;  %s820_s7 = scalar_lea.vmem %s5006_s19, %s4492_s23 }
  0x20   : > { %s4551_s21 = scalar_lea.vmem %s5005_s18, %s3676_s12  ;;  %v825_v0 = vld [vmem:[%s5030_s20] sm:$0xff] (!%p3591_p4)  ;;  %v827_v1 = vld [vmem:[%s5030_s20 + $0x10] sm:$0xff] (!%p3591_p4) }
  0x21   : > { %830 = vst.msk [vmem:[#allocation2] sm:$0xff] %vm829_vm0, %v825_v0  ;;  %832 = vst.msk [vmem:[#allocation2 + $0x10] sm:$0xff] %vm829_vm0, %v827_v1 }
  0x22 PF: > { %v835_v2 = vlaneseq  ;;  %v844_v5 = vld [vmem:[%s4502_s29] sm:$0xff]  ;;  %v846_v7 = vld [vmem:[%s4502_s29 + $0x10] sm:$0xff]  ;;  %vm858_vm1 = vcmask 261120   ;;  %v845_v10 = vld [vmem:[%s4502_s29 + $0x8] sm:$0xff]  ;;  %s5031_s28 = scalar_lea.vmem %s4995_s8, %s4492_s23  ;;  %s5032_s24 = sld [smem:[#allocation12_spill]]  ;;  %vm1048_vm3 = vcmask 64512  }
  0x23   : > { %v847_v11 = vld [vmem:[%s4502_s29 + $0x18] sm:$0xff]  ;;  %v862_v14 = vsel %vm858_vm1, %v845_v10, 0.0  ;;  %v932_v36 = vld [vmem:[%s4515_s5] sm:$0xff]  ;;  %v933_v37 = vld [vmem:[%s4515_s5 + $0x8] sm:$0xff]  ;;  %s5034_s3 = scalar_lea.vmem %s4998_s11, %s4492_s23  ;;  %s4360_s27 = smov 96   ;;  %vm1235_vm5 = vcmask 130048  }
  0x24   : > { %v4564_v4 = vshrl.u32 %v835_v2, 7  ;;  %v868_v15 = vsel %vm858_vm1, %v847_v11, 0.0  ;;  %v934_v38 = vld [vmem:[%s4515_s5 + $0x10] sm:$0xff]  ;;  %v3999_v39 = vpack.c.bf16 %v933_v37, %v932_v36  ;;  %v935_v40 = vld [vmem:[%s4515_s5 + $0x18] sm:$0xff]  ;;  %v3592_v55 = vld [vmem:[%s5031_s28] ss:$0 sm:$0xff] }
  0x25   : > { %v4003_v41 = vpack.c.bf16 %v935_v40, %v934_v38  ;;  %vm4632_vm4 = vmpackc.low %vm1048_vm3, %vm1048_vm3  ;;  %s5037_s28 = sld [smem:[#allocation5_spill]]  ;;  %s4361_s0 = smov 64   ;;  %vm2734_vm6 = vcmask 195584  }
  0x26   : > { %vm838_vm2 = vcmp.lt.s32.totalorder %v4564_v4, 5  ;;  %4000 = vmatprep.subr.bf16.mxu1 %v3999_v39  ;;  %s4364_s9 = smov 56   ;;  %s4365_s26 = smov 80  }
  0x27   : > { %4002 = vmatpush3.bf16.msra.mxu1 %v3999_v39  ;;  %s4368_s5 = smov 72   ;;  %s4369_s12 = smov 104  }
  0x28   : > { %v840_v3 = vld [vmem:[#allocation2] sm:$0xff]  ;;  %v842_v6 = vld [vmem:[#allocation2 + $0x10] sm:$0xff]  ;;  %4004 = vmatprep.subr.bf16.mxu1 %v4003_v41  ;;  %s5033_s2 = scalar_lea.vmem %s5032_s24, %s4492_s23  ;;  %s4362_s24 = smov 88  }
  0x29   : > { %v4569_v8 = vsel %vm838_vm2, %v840_v3, %v844_v5  ;;  %v4571_v9 = vsel %vm838_vm2, %v842_v6, %v846_v7  ;;  %v3593_v57 = vld [vmem:[%s5033_s2] ss:$0 sm:$0xff]  ;;  %s4363_s2 = smov 120   ;;  %p3661_p5 = scmp.ne.s32.totalorder %s4486_s22, 4 }
  0x2a   : > { %v859_v12 = vsel %vm858_vm1, %v4569_v8, 0.0  ;;  %v865_v13 = vsel %vm858_vm1, %v4571_v9, 0.0 }
  0x2b   : > { %860 = vadd.xlane.f32.xlu0 %v859_v12  ;;  %866 = vadd.xlane.f32.xlu1 %v865_v13  ;;  %s5038_s30 = scalar_lea.vmem %s5037_s28, %s4492_s23  ;;  %s4370_s28 = smov 40  }
  0x2c   : > { %4006 = vmatpush3.bf16.msra.mxu1 %v4003_v41 }
  0x2f   : > { %863 = vadd.xlane.f32.xlu0 %v862_v14  ;;  %869 = vadd.xlane.f32.xlu1 %v868_v15 }
  0xb8   : > { %v861_v16 = vpop.xlane.xlu0 %860  ;;  %v867_v17 = vpop.xlane.xlu1 %866 }
  0xb9   : > { %v872_v18 = vmul.f32 0.03125, %v861_v16  ;;  %v874_v19 = vmul.f32 0.03125, %v867_v17 }
  0xbb   : > { %v876_v20 = vsub.f32 %v4569_v8, %v872_v18  ;;  %v878_v21 = vsub.f32 %v4571_v9, %v874_v19 }
  0xbc   : > { %v864_v22 = vpop.xlane.xlu0 %863  ;;  %v870_v23 = vpop.xlane.xlu1 %869 }
  0xbd   : > { %v873_v24 = vmul.f32 0.03125, %v864_v22  ;;  %v875_v25 = vmul.f32 0.03125, %v870_v23  ;;  %v880_v26 = vmul.f32 %v876_v20, %v876_v20  ;;  %v882_v27 = vmul.f32 %v878_v21, %v878_v21 }
  0xbf   : > { %v877_v28 = vsub.f32 %v845_v10, %v873_v24  ;;  %v879_v29 = vsub.f32 %v847_v11, %v875_v25  ;;  %v884_v30 = vsel %vm858_vm1, %v880_v26, 0.0  ;;  %v890_v31 = vsel %vm858_vm1, %v882_v27, 0.0  ;;  %v3594_v11 = vld [vmem:[%s5034_s3] ss:$0 sm:$0xff]  ;;  %s4366_s3 = smov 112  }
  0xc0   : > { %885 = vadd.xlane.f32.xlu0 %v884_v30 }
  0xc1   : > { %v881_v32 = vmul.f32 %v877_v28, %v877_v28  ;;  %v883_v33 = vmul.f32 %v879_v29, %v879_v29 }
  0xc3   : > { %v887_v34 = vsel %vm858_vm1, %v881_v32, 0.0  ;;  %v893_v35 = vsel %vm858_vm1, %v883_v33, 0.0  ;;  %v4656_v33 = vsub.s32 0, %v4564_v4 }
  0xc4   : > { %891 = vadd.xlane.f32.xlu0 %v890_v31  ;;  %888 = vadd.xlane.f32.xlu1 %v887_v34  ;;  %v834_v31 = vld [vmem:[%s5038_s30] sm:$0x1]  ;;  %s4371_s30 = smov 8  }
  0xc5   : > { %v3599_v32 = vadd.f32 -1.0, %v834_v31 }
  0xc7   : > { %v1041_v34 = vmul.f32 1e+09, %v3599_v32 }
  0xc8   : > { %894 = vadd.xlane.f32.xlu1 %v893_v35 }
  0xc9   : > { %v4659_v35 = vrot.slane %v1041_v34, %v4656_v33 }
 0x14d   : > { %v886_v42 = vpop.xlane.xlu0 %885 }
 0x14e   : > { %v896_v43 = vmul.f32 0.03125, %v886_v42 }
 0x150   : > { %v900_v44 = vadd.f32 1e-06, %v896_v43 }
 0x151   : > { %v889_v45 = vpop.xlane.xlu1 %888  ;;  %v892_v46 = vpop.xlane.xlu0 %891 }
 0x152   : > { %4250 = vrsqrt.f32 %v900_v44  ;;  %v897_v47 = vmul.f32 0.03125, %v889_v45  ;;  %v898_v48 = vmul.f32 0.03125, %v892_v46 }
 0x154   : > { %v901_v49 = vadd.f32 1e-06, %v897_v47  ;;  %v902_v50 = vadd.f32 1e-06, %v898_v48 }
 0x155   : > { %v895_v51 = vpop.xlane.xlu1 %894 }
 0x156   : > { %4252 = vrsqrt.f32 %v901_v49  ;;  %v899_v52 = vmul.f32 0.03125, %v895_v51 }
 0x157   : > { %4254 = vrsqrt.f32 %v902_v50 }
 0x158   : > { %v903_v53 = vadd.f32 1e-06, %v899_v52 }
 0x15a   : > { %4256 = vrsqrt.f32 %v903_v53 }
 0x15c   : > { %v4251_v54 = vpop.eup %4250 }
 0x15d   : > { %v908_v56 = vmul.f32 %v4251_v54, %v876_v20 }
 0x15f   : > { %v918_v58 = vmul.f32 %v3592_v55, %v908_v56 }
 0x160   : > { %v4253_v59 = vpop.eup %4252 }
 0x161   : > { %v4255_v60 = vpop.eup %4254  ;;  %v928_v61 = vadd.f32 %v3593_v57, %v918_v58  ;;  %v909_v62 = vmul.f32 %v4253_v59, %v877_v28 }
 0x162   : > { %v910_v63 = vmul.f32 %v4255_v60, %v878_v21 }
 0x163   : > { %3801 = vmatprep.mubr.msk.f32.mxu1 %vm858_vm1, %v928_v61  ;;  %v919_v0 = vmul.f32 %v3592_v55, %v909_v62 }
 0x164   : > { %v4257_v1 = vpop.eup %4256  ;;  %v920_v2 = vmul.f32 %v3592_v55, %v910_v63 }
 0x165   : > { %v929_v3 = vadd.f32 %v3593_v57, %v919_v0  ;;  %v911_v5 = vmul.f32 %v4257_v1, %v879_v29 }
 0x166   : > { %v930_v6 = vadd.f32 %v3593_v57, %v920_v2 }
 0x167   : > { %3802 = vmatmul.mubr.msk.f32.vlgmr.msra.gmra.mrb[0].mxu1 %vm858_vm1, %v929_v3  ;;  %v921_v7 = vmul.f32 %v3592_v55, %v911_v5 }
 0x168   : > { %3804 = vmatprep.mubr.msk.f32.mxu1 %vm858_vm1, %v930_v6 }
 0x169   : > { %v931_v10 = vadd.f32 %v3593_v57, %v921_v7 }
 0x16b   : > { %3805 = vmatmul.mubr.msk.f32.gmra.mrb[2].mxu1 %vm858_vm1, %v931_v10 }
 0x23a   : > { %v3803_v12 = vpop.f32.mrb[0].mxu1 }
 0x23b   : > { %v4610_v13 = vadd.f32 %v3803_v12, %v3594_v11  ;;  %v1021_v14 = vpop.f32.mrb[1].mxu1 }
 0x23c   : > { %v4612_v15 = vadd.f32 %v3594_v11, %v1021_v14 }
 0x23e   : > { %v3806_v16 = vpop.f32.mrb[2].mxu1  ;;  %3811 = vmatprep.mubr.msk.f32.mxu1 %vm1048_vm3, %v4612_v15  ;;  %v4618_v17 = vpack.i.bf16 %v4610_v13, %v4612_v15 }
 0x23f   : > { %v4620_v18 = vadd.f32 %v3806_v16, %v3594_v11  ;;  %v1031_v19 = vpop.f32.mrb[3].mxu1 }
 0x240   : > { %v4622_v20 = vadd.f32 %v3594_v11, %v1031_v19  ;;  %4171 = vrot.lane.b32.xlu0 %v4618_v17, %s4360_s27 }
 0x242   : > { %v4627_v21 = vpack.i.bf16 %v4620_v18, %v4622_v20 }
 0x244   : > { %4176 = vrot.lane.b32.xlu1 %v4627_v21, %s4360_s27  ;;  %s4367_s27 = smov 48  }
 0x2b2   : > { %v4172_v22 = vpop.permute.xlu0 %4171 }
 0x2b3   : > { %v4174_v23 = vunpack.i.h.bf16 %v4172_v22  ;;  %v4173_v24 = vunpack.i.l.bf16 %v4172_v22 }
 0x2b5   : > { %v4007_v26 = vpack.c.bf16 %v4174_v23, %v4173_v24 }
 0x2b6   : > { %v4177_v27 = vpop.permute.xlu1 %4176 }
 0x2b7   : > { %v4179_v28 = vunpack.i.h.bf16 %v4177_v27  ;;  %v4178_v29 = vunpack.i.l.bf16 %v4177_v27  ;;  %4009 = vmatprep.subr.msk.bf16.mxu1 %vm4632_vm4, %v4007_v26 }
 0x2b8   : > { %4012 = vmatpush3.bf16.xpose.msk.msra.mxu1 %vm4632_vm4, %v4007_v26 }
 0x2b9   : > { %v4013_v30 = vpack.c.bf16 %v4179_v28, %v4178_v29 }
 0x2bb   : > { %4015 = vmatprep.subr.msk.bf16.mxu1 %vm4632_vm4, %v4013_v30 }
 0x2bf   : > { %3812 = vmatmul.mubr.msk.f32.vlgmr.msra.gmra.mrb[4].mxu1 %vm1048_vm3, %v4610_v13 }
 0x2c0   : > { %4018 = vmatpush3.bf16.xpose.msk.msra.mxu1 %vm4632_vm4, %v4013_v30  ;;  %3818 = vmatprep.mubr.msk.f32.mxu1 %vm1048_vm3, %v4622_v20 }
 0x2c7   : > { %3819 = vmatmul.mubr.msk.f32.vlgmr.msra.gmra.mrb[6].mxu1 %vm1048_vm3, %v4620_v18 }
 0x392   : > { %v3813_v36 = vpop.f32.mrb[4].mxu1 }
 0x393   : > { %v1222_v37 = vmul.f32 0.35355338, %v3813_v36  ;;  %v1123_v38 = vpop.f32.mrb[5].mxu1 }
 0x394   : > { %v1221_v39 = vmul.f32 0.35355338, %v1123_v38 }
 0x395   : > { %v1232_v40 = vadd.f32 %v4659_v35, %v1222_v37 }
 0x396   : > { %v1231_v41 = vadd.f32 %v4659_v35, %v1221_v39 }
 0x397   : > { %v1239_v42 = vsel %vm1235_vm5, %v1232_v40, -inf }
 0x398   : > { %1240 = vmax.xlane.f32.xlu0 %v1239_v42  ;;  %v1236_v43 = vsel %vm1235_vm5, %v1231_v41, -inf }
 0x399   : > { %1237 = vmax.xlane.f32.xlu1 %v1236_v43 }
 0x39a   : > { %v3820_v44 = vpop.f32.mrb[6].mxu1 }
 0x39b   : > { %v1224_v45 = vmul.f32 0.35355338, %v3820_v44  ;;  %v1212_v46 = vpop.f32.mrb[7].mxu1 }
 0x39c   : > { %v1223_v47 = vmul.f32 0.35355338, %v1212_v46 }
 0x39d   : > { %v1234_v48 = vadd.f32 %v4659_v35, %v1224_v45 }
 0x39e   : > { %v1233_v49 = vadd.f32 %v4659_v35, %v1223_v47 }
 0x39f   : > { %v1245_v50 = vsel %vm1235_vm5, %v1234_v48, -inf }
 0x3a0   : > { %1246 = vmax.xlane.f32.xlu1 %v1245_v50  ;;  %v1242_v51 = vsel %vm1235_vm5, %v1233_v49, -inf }
 0x3a1   : > { %1243 = vmax.xlane.f32.xlu0 %v1242_v51 }
 0x425   : > { %v1241_v52 = vpop.xlane.xlu0 %1240 }
 0x426   : > { %v1249_v53 = vsub.f32 %v1232_v40, %v1241_v52  ;;  %v1238_v54 = vpop.xlane.xlu1 %1237 }
 0x427   : > { %v1248_v55 = vsub.f32 %v1231_v41, %v1238_v54 }
 0x428   : > { %v1254_v56 = vmul.f32 1.442695, %v1249_v53 }
 0x429   : > { %v1252_v57 = vmul.f32 1.442695, %v1248_v55 }
 0x42a   : > { %4258 = vpow2.f32 %v1254_v56 }
 0x42b   : > { %4260 = vpow2.f32 %v1252_v57 }
 0x42d   : > { %v1247_v0 = vpop.xlane.xlu1 %1246 }
 0x42e   : > { %v1244_v62 = vpop.xlane.xlu0 %1243  ;;  %v1251_v2 = vsub.f32 %v1234_v48, %v1247_v0 }
 0x42f   : > { %v1250_v63 = vsub.f32 %v1233_v49, %v1244_v62 }
 0x430   : > { %v1258_v3 = vmul.f32 1.442695, %v1251_v2 }
 0x431   : > { %v1256_v1 = vmul.f32 1.442695, %v1250_v63 }
 0x433   : > { %4262 = vpow2.f32 %v1256_v1 }
 0x434   : > { %v4259_v58 = vpop.eup %4258  ;;  %4264 = vpow2.f32 %v1258_v3 }
 0x435   : > { %v4261_v59 = vpop.eup %4260  ;;  %v1263_v60 = vsel %vm1235_vm5, %v4259_v58, 0.0 }
 0x436   : > { %1264 = vadd.xlane.f32.xlu1 %v1263_v60  ;;  %v1260_v61 = vsel %vm1235_vm5, %v4261_v59, 0.0 }
 0x437   : > { %1261 = vadd.xlane.f32.xlu0 %v1260_v61 }
 0x43d   : > { %v4263_v5 = vpop.eup %4262 }
 0x43e   : > { %v1266_v6 = vsel %vm1235_vm5, %v4263_v5, 0.0  ;;  %v4265_v7 = vpop.eup %4264 }
 0x43f   : > { %v1269_v10 = vsel %vm1235_vm5, %v4265_v7, 0.0 }
 0x447   : > { %4186 = vrot.lane.b32.xlu1 %v4627_v21, %s4361_s0 }
 0x44b   : > { %4191 = vrot.lane.b32.xlu1 %v4618_v17, %s4362_s24 }
 0x44d   : > { %4181 = vrot.lane.b32.xlu0 %v4618_v17, %s4361_s0  ;;  %s4372_s0 = smov 16  }
 0x44f   : > { %4196 = vrot.lane.b32.xlu1 %v4627_v21, %s4362_s24  ;;  %s4373_s24 = smov 24  }
 0x46c   : > { %1267 = vadd.xlane.f32.xlu0 %v1266_v6 }
 0x473   : > { %1270 = vadd.xlane.f32.xlu1 %v1269_v10 }
 0x482   : > { %1454 = vrot.lane.b32.xlu0 %v4612_v15, %s4363_s2 }
 0x484   : > { %1456 = vrot.lane.b32.xlu1 %v4610_v13, %s4363_s2 }
 0x486   : > { %1545 = vrot.lane.b32.xlu0 %v4622_v20, %s4363_s2 }
 0x488   : > { %1547 = vrot.lane.b32.xlu1 %v4620_v18, %s4363_s2  ;;  %s5041_s2 = sld [smem:[#allocation8_spill]] (!%p3661_p5) }
 0x4c3   : > { %v1265_v11 = vpop.xlane.xlu1 %1264 }
 0x4c4   : > { %4266 = vrcp.f32 %v1265_v11  ;;  %v1262_v12 = vpop.xlane.xlu0 %1261 }
 0x4c5   : > { %4268 = vrcp.f32 %v1262_v12 }
 0x4c7   : > { %v4187_v14 = vpop.permute.xlu1 %4186 }
 0x4c8   : > { %v4182_v16 = vpop.permute.xlu0 %4181  ;;  %v4189_v19 = vunpack.i.h.bf16 %v4187_v14  ;;  %v4188_v22 = vunpack.i.l.bf16 %v4187_v14 }
 0x4c9   : > { %v4184_v23 = vunpack.i.h.bf16 %v4182_v16  ;;  %v4183_v24 = vunpack.i.l.bf16 %v4182_v16 }
 0x4ca   : > { %v4023_v30 = vpack.c.bf16 %v4189_v19, %v4188_v22 }
 0x4cb   : > { %v4019_v26 = vpack.c.bf16 %v4184_v23, %v4183_v24  ;;  %v4192_v27 = vpop.permute.xlu1 %4191 }
 0x4cc   : > { %v4194_v28 = vunpack.i.h.bf16 %v4192_v27  ;;  %v4193_v29 = vunpack.i.l.bf16 %v4192_v27 }
 0x4cd   : > { %4020 = vmatprep.subr.bf16.mxu1 %v4019_v26 }
 0x4ce   : > { %v4267_v31 = vpop.eup %4266  ;;  %4022 = vmatpush3.bf16.msra.mxu1 %v4019_v26  ;;  %v4027_v32 = vpack.c.bf16 %v4194_v28, %v4193_v29 }
 0x4cf   : > { %v4269_v34 = vpop.eup %4268  ;;  %v4197_v36 = vpop.permute.xlu1 %4196  ;;  %4024 = vmatprep.subr.bf16.mxu1 %v4023_v30  ;;  %v1277_v40 = vmul.f32 %v4267_v31, %v4259_v58 }
 0x4d0   : > { %v4199_v37 = vunpack.i.h.bf16 %v4197_v36  ;;  %v4198_v38 = vunpack.i.l.bf16 %v4197_v36  ;;  %4029 = vmatprep.subr.msk.bf16.mxu0 %vm4632_vm4, %v4027_v32  ;;  %v1276_v39 = vmul.f32 %v4269_v34, %v4261_v59 }
 0x4d1   : > { %4032 = vmatpush3.bf16.xpose.msk.msra.mxu0 %vm4632_vm4, %v4027_v32 }
 0x4d2   : > { %v4033_v41 = vpack.c.bf16 %v4199_v37, %v4198_v38  ;;  %3825 = vmatprep.mubr.msk.f32.mxu1 %vm1235_vm5, %v1276_v39 }
 0x4d3   : > { %3826 = vmatmul.mubr.msk.f32.vlgmr.msra.gmra.mrb[8].mxu1 %vm1235_vm5, %v1277_v40 }
 0x4d4   : > { %4026 = vmatpush3.bf16.msra.mxu1 %v4023_v30 }
 0x4d5   : > { %4035 = vmatprep.subr.msk.bf16.mxu1 %vm4632_vm4, %v4033_v41 }
 0x4f9   : > { %v1268_v42 = vpop.xlane.xlu0 %1267 }
 0x4fa   : > { %4270 = vrcp.f32 %v1268_v42 }
 0x4fd   : > { %v1455_v43 = vpop.permute.xlu0 %1454 }
 0x4fe   : > { %3839 = vmatprep.mubr.msk.f32.mxu0 %vm1048_vm3, %v1455_v43 }
 0x500   : > { %v1271_v44 = vpop.xlane.xlu1 %1270 }
 0x501   : > { %4272 = vrcp.f32 %v1271_v44  ;;  %v1546_v50 = vpop.permute.xlu0 %1545 }
 0x504   : > { %v4271_v45 = vpop.eup %4270  ;;  %v1457_v46 = vpop.permute.xlu1 %1456 }
 0x505   : > { %3840 = vmatmul.mubr.msk.f32.vlgmr.msra.gmra.mrb[0].mxu0 %vm1048_vm3, %v1457_v46  ;;  %v1278_v47 = vmul.f32 %v4271_v45, %v4263_v5 }
 0x507   : > { %3832 = vmatprep.mubr.msk.f32.mxu1 %vm1235_vm5, %v1278_v47 }
 0x508   : > { %v1548_v51 = vpop.permute.xlu1 %1547 }
 0x50b   : > { %v4273_v48 = vpop.eup %4272 }
 0x50c   : > { %v1279_v49 = vmul.f32 %v4273_v48, %v4265_v7 }
 0x50e   : > { %3833 = vmatmul.mubr.msk.f32.vlgmr.msra.gmra.mrb[10].mxu1 %vm1235_vm5, %v1279_v49 }
 0x50f   : > { %4038 = vmatpush3.bf16.xpose.msk.msra.mxu1 %vm4632_vm4, %v4033_v41  ;;  %3846 = vmatprep.mubr.msk.f32.mxu1 %vm1048_vm3, %v1546_v50 }
 0x516   : > { %3847 = vmatmul.mubr.msk.f32.vlgmr.msra.gmra.mrb[12].mxu1 %vm1048_vm3, %v1548_v51 }
 0x5a6   : > { %v4697_v52 = vpop.f32.mrb[8].mxu1 }
 0x5a7   : > { %v4699_v53 = vpop.f32.mrb[9].mxu1 }
 0x5d8   : > { %v3841_v54 = vpop.f32.mrb[0].mxu0 }
 0x5d9   : > { %v1637_v55 = vmul.f32 0.35355338, %v3841_v54  ;;  %v1536_v56 = vpop.f32.mrb[1].mxu0 }
 0x5da   : > { %v1636_v57 = vmul.f32 0.35355338, %v1536_v56 }
 0x5db   : > { %v1641_v58 = vadd.f32 %v1637_v55, %v4659_v35 }
 0x5dc   : > { %v1640_v59 = vadd.f32 %v1636_v57, %v4659_v35 }
 0x5dd   : > { %v1647_v60 = vsel %vm1235_vm5, %v1641_v58, -inf }
 0x5de   : > { %1648 = vmax.xlane.f32.xlu1 %v1647_v60  ;;  %v1644_v61 = vsel %vm1235_vm5, %v1640_v59, -inf }
 0x5df   : > { %1645 = vmax.xlane.f32.xlu0 %v1644_v61 }
 0x5e1   : > { %v4705_v62 = vpop.f32.mrb[10].mxu1 }
 0x5e2   : > { %v4707_v63 = vpop.f32.mrb[11].mxu1 }
 0x5e9   : > { %v3848_v0 = vpop.f32.mrb[12].mxu1 }
 0x5ea   : > { %v1627_v1 = vpop.f32.mrb[13].mxu1  ;;  %v1639_v2 = vmul.f32 0.35355338, %v3848_v0 }
 0x5eb   : > { %v1638_v3 = vmul.f32 0.35355338, %v1627_v1 }
 0x5ec   : > { %v1643_v7 = vadd.f32 %v1639_v2, %v4659_v35 }
 0x5ed   : > { %v1642_v5 = vadd.f32 %v1638_v3, %v4659_v35 }
 0x5ee   : > { %v1653_v10 = vsel %vm1235_vm5, %v1643_v7, -inf }
 0x5ef   : > { %v1650_v6 = vsel %vm1235_vm5, %v1642_v5, -inf }
 0x5f0   : > { %1651 = vmax.xlane.f32.xlu0 %v1650_v6 }
 0x5f4   : > { %1654 = vmax.xlane.f32.xlu0 %v1653_v10 }
 0x66b   : > { %v1649_v11 = vpop.xlane.xlu1 %1648 }
 0x66c   : > { %v1657_v12 = vsub.f32 %v1641_v58, %v1649_v11  ;;  %v1646_v14 = vpop.xlane.xlu0 %1645 }
 0x66d   : > { %v1656_v16 = vsub.f32 %v1640_v59, %v1646_v14 }
 0x66e   : > { %v1662_v19 = vmul.f32 1.442695, %v1657_v12 }
 0x66f   : > { %v1660_v22 = vmul.f32 1.442695, %v1656_v16 }
 0x670   : > { %4274 = vpow2.f32 %v1662_v19 }
 0x671   : > { %4276 = vpow2.f32 %v1660_v22 }
 0x67a   : > { %v4275_v23 = vpop.eup %4274 }
 0x67b   : > { %v4277_v24 = vpop.eup %4276  ;;  %v1671_v26 = vsel %vm1235_vm5, %v4275_v23, 0.0 }
 0x67c   : > { %1672 = vadd.xlane.f32.xlu1 %v1671_v26  ;;  %v1668_v27 = vsel %vm1235_vm5, %v4277_v24, 0.0 }
 0x67d   : > { %1669 = vadd.xlane.f32.xlu0 %v1668_v27  ;;  %v1652_v28 = vpop.xlane.xlu0 %1651 }
 0x67e   : > { %v1658_v29 = vsub.f32 %v1642_v5, %v1652_v28 }
 0x680   : > { %v1664_v30 = vmul.f32 1.442695, %v1658_v29 }
 0x681   : > { %v1655_v31 = vpop.xlane.xlu0 %1654 }
 0x682   : > { %v1659_v32 = vsub.f32 %v1643_v7, %v1655_v31  ;;  %4278 = vpow2.f32 %v1664_v30 }
 0x684   : > { %v1666_v34 = vmul.f32 1.442695, %v1659_v32 }
 0x686   : > { %4280 = vpow2.f32 %v1666_v34 }
 0x68c   : > { %v4279_v36 = vpop.eup %4278 }
 0x68d   : > { %4206 = vrot.lane.b32.xlu1 %v4627_v21, %s4364_s9  ;;  %v1674_v37 = vsel %vm1235_vm5, %v4279_v36, 0.0 }
 0x690   : > { %v4281_v38 = vpop.eup %4280 }
 0x691   : > { %4211 = vrot.lane.b32.xlu1 %v4618_v17, %s4365_s26  ;;  %v1677_v39 = vsel %vm1235_vm5, %v4281_v38, 0.0 }
 0x693   : > { %4201 = vrot.lane.b32.xlu0 %v4618_v17, %s4364_s9  ;;  %s5039_s9 = scalar_lea.vmem %s5000_s13, %s4492_s23 }
 0x695   : > { %4216 = vrot.lane.b32.xlu1 %v4627_v21, %s4365_s26  ;;  %s5042_s26 = sld [smem:[#allocation9_spill]] (!%p3661_p5) }
 0x6b2   : > { %1675 = vadd.xlane.f32.xlu0 %v1674_v37 }
 0x6b9   : > { %1678 = vadd.xlane.f32.xlu1 %v1677_v39 }
 0x6c8   : > { %1862 = vrot.lane.b32.xlu0 %v4612_v15, %s4366_s3 }
 0x6ca   : > { %1864 = vrot.lane.b32.xlu1 %v4610_v13, %s4366_s3 }
 0x6cc   : > { %1953 = vrot.lane.b32.xlu0 %v4622_v20, %s4366_s3 }
 0x6ce   : > { %1955 = vrot.lane.b32.xlu1 %v4620_v18, %s4366_s3 }
 0x709   : > { %v1673_v40 = vpop.xlane.xlu1 %1672 }
 0x70a   : > { %4282 = vrcp.f32 %v1673_v40  ;;  %v1670_v41 = vpop.xlane.xlu0 %1669 }
 0x70b   : > { %4284 = vrcp.f32 %v1670_v41 }
 0x70d   : > { %v4207_v42 = vpop.permute.xlu1 %4206 }
 0x70e   : > { %v4209_v43 = vunpack.i.h.bf16 %v4207_v42  ;;  %v4208_v44 = vunpack.i.l.bf16 %v4207_v42  ;;  %v4202_v45 = vpop.permute.xlu0 %4201 }
 0x70f   : > { %v4204_v46 = vunpack.i.h.bf16 %v4202_v45  ;;  %v4203_v47 = vunpack.i.l.bf16 %v4202_v45 }
 0x710   : > { %v4043_v48 = vpack.c.bf16 %v4209_v43, %v4208_v44 }
 0x711   : > { %v4039_v49 = vpack.c.bf16 %v4204_v46, %v4203_v47  ;;  %v4212_v50 = vpop.permute.xlu1 %4211 }
 0x712   : > { %v4214_v51 = vunpack.i.h.bf16 %v4212_v50  ;;  %v4213_v54 = vunpack.i.l.bf16 %v4212_v50  ;;  %4044 = vmatprep.subr.bf16.mxu1 %v4043_v48 }
 0x713   : > { %4040 = vmatprep.subr.bf16.mxu0 %v4039_v49  ;;  %4046 = vmatpush3.bf16.msra.mxu1 %v4043_v48 }
 0x714   : > { %v4283_v55 = vpop.eup %4282  ;;  %v4047_v56 = vpack.c.bf16 %v4214_v51, %v4213_v54  ;;  %4042 = vmatpush3.bf16.msra.mxu0 %v4039_v49 }
 0x715   : > { %v4285_v57 = vpop.eup %4284  ;;  %v4217_v58 = vpop.permute.xlu1 %4216  ;;  %v1685_v0 = vmul.f32 %v4283_v55, %v4275_v23 }
 0x716   : > { %v4219_v59 = vunpack.i.h.bf16 %v4217_v58  ;;  %v4218_v60 = vunpack.i.l.bf16 %v4217_v58  ;;  %4049 = vmatprep.subr.msk.bf16.mxu0 %vm4632_vm4, %v4047_v56  ;;  %v1684_v61 = vmul.f32 %v4285_v57, %v4277_v24 }
 0x718   : > { %v4053_v1 = vpack.c.bf16 %v4219_v59, %v4218_v60  ;;  %3853 = vmatprep.mubr.msk.f32.mxu0 %vm1235_vm5, %v1684_v61 }
 0x719   : > { %3854 = vmatmul.mubr.msk.f32.vlgmr.msra.gmra.mrb[2].mxu0 %vm1235_vm5, %v1685_v0 }
 0x71a   : > { %4055 = vmatprep.subr.msk.bf16.mxu1 %vm4632_vm4, %v4053_v1 }
 0x71d   : > { %4052 = vmatpush3.bf16.xpose.msk.msra.mxu0 %vm4632_vm4, %v4047_v56 }
 0x73f   : > { %v1676_v2 = vpop.xlane.xlu0 %1675 }
 0x740   : > { %4286 = vrcp.f32 %v1676_v2 }
 0x743   : > { %v1863_v3 = vpop.permute.xlu0 %1862 }
 0x744   : > { %3867 = vmatprep.mubr.msk.f32.mxu0 %vm1048_vm3, %v1863_v3 }
 0x746   : > { %v1679_v5 = vpop.xlane.xlu1 %1678 }
 0x747   : > { %4288 = vrcp.f32 %v1679_v5  ;;  %v1954_v14 = vpop.permute.xlu0 %1953 }
 0x74a   : > { %v4287_v6 = vpop.eup %4286  ;;  %v1865_v7 = vpop.permute.xlu1 %1864 }
 0x74b   : > { %3868 = vmatmul.mubr.msk.f32.vlgmr.msra.gmra.mrb[4].mxu0 %vm1048_vm3, %v1865_v7  ;;  %v1686_v10 = vmul.f32 %v4287_v6, %v4279_v36 }
 0x74d   : > { %3860 = vmatprep.mubr.msk.f32.mxu1 %vm1235_vm5, %v1686_v10 }
 0x74e   : > { %v1956_v16 = vpop.permute.xlu1 %1955 }
 0x751   : > { %v4289_v11 = vpop.eup %4288 }
 0x752   : > { %v1687_v12 = vmul.f32 %v4289_v11, %v4281_v38 }
 0x754   : > { %3861 = vmatmul.mubr.msk.f32.vlgmr.msra.gmra.mrb[14].mxu1 %vm1235_vm5, %v1687_v12 }
 0x755   : > { %4058 = vmatpush3.bf16.xpose.msk.msra.mxu1 %vm4632_vm4, %v4053_v1  ;;  %3874 = vmatprep.mubr.msk.f32.mxu1 %vm1048_vm3, %v1954_v14 }
 0x75c   : > { %3875 = vmatmul.mubr.msk.f32.vlgmr.msra.gmra.mrb[16].mxu1 %vm1048_vm3, %v1956_v16 }
 0x7ec   : > { %v4741_v19 = vpop.f32.mrb[2].mxu0 }
 0x7ed   : > { %v4743_v22 = vpop.f32.mrb[3].mxu0 }
 0x81e   : > { %v3869_v23 = vpop.f32.mrb[4].mxu0 }
 0x81f   : > { %v2045_v24 = vmul.f32 0.35355338, %v3869_v23  ;;  %v1944_v26 = vpop.f32.mrb[5].mxu0 }
 0x820   : > { %v2044_v27 = vmul.f32 0.35355338, %v1944_v26 }
 0x821   : > { %v2049_v28 = vadd.f32 %v2045_v24, %v4659_v35 }
 0x822   : > { %v2048_v29 = vadd.f32 %v2044_v27, %v4659_v35 }
 0x823   : > { %v2055_v30 = vsel %vm1235_vm5, %v2049_v28, -inf }
 0x824   : > { %2056 = vmax.xlane.f32.xlu1 %v2055_v30  ;;  %v2052_v31 = vsel %vm1235_vm5, %v2048_v29, -inf }
 0x825   : > { %2053 = vmax.xlane.f32.xlu0 %v2052_v31 }
 0x827   : > { %v4749_v32 = vpop.f32.mrb[14].mxu1 }
 0x828   : > { %v4751_v34 = vpop.f32.mrb[15].mxu1 }
 0x82f   : > { %v3876_v36 = vpop.f32.mrb[16].mxu1 }
 0x830   : > { %v2035_v37 = vpop.f32.mrb[17].mxu1  ;;  %v2047_v38 = vmul.f32 0.35355338, %v3876_v36 }
 0x831   : > { %v2046_v39 = vmul.f32 0.35355338, %v2035_v37 }
 0x832   : > { %v2051_v42 = vadd.f32 %v2047_v38, %v4659_v35 }
 0x833   : > { %v2050_v40 = vadd.f32 %v2046_v39, %v4659_v35 }
 0x834   : > { %v2061_v43 = vsel %vm1235_vm5, %v2051_v42, -inf }
 0x835   : > { %v2058_v41 = vsel %vm1235_vm5, %v2050_v40, -inf }
 0x836   : > { %2059 = vmax.xlane.f32.xlu0 %v2058_v41 }
 0x83a   : > { %2062 = vmax.xlane.f32.xlu0 %v2061_v43 }
 0x8b1   : > { %v2057_v44 = vpop.xlane.xlu1 %2056 }
 0x8b2   : > { %v2065_v45 = vsub.f32 %v2049_v28, %v2057_v44  ;;  %v2054_v46 = vpop.xlane.xlu0 %2053 }
 0x8b3   : > { %v2064_v47 = vsub.f32 %v2048_v29, %v2054_v46 }
 0x8b4   : > { %v2070_v48 = vmul.f32 1.442695, %v2065_v45 }
 0x8b5   : > { %v2068_v49 = vmul.f32 1.442695, %v2064_v47 }
 0x8b6   : > { %4290 = vpow2.f32 %v2070_v48 }
 0x8b7   : > { %4292 = vpow2.f32 %v2068_v49 }
 0x8c0   : > { %v4291_v50 = vpop.eup %4290 }
 0x8c1   : > { %v4293_v51 = vpop.eup %4292  ;;  %v2079_v54 = vsel %vm1235_vm5, %v4291_v50, 0.0 }
 0x8c2   : > { %2080 = vadd.xlane.f32.xlu1 %v2079_v54  ;;  %v2076_v55 = vsel %vm1235_vm5, %v4293_v51, 0.0 }
 0x8c3   : > { %2077 = vadd.xlane.f32.xlu0 %v2076_v55  ;;  %v2060_v56 = vpop.xlane.xlu0 %2059 }
 0x8c4   : > { %v2066_v57 = vsub.f32 %v2050_v40, %v2060_v56 }
 0x8c6   : > { %v2072_v58 = vmul.f32 1.442695, %v2066_v57 }
 0x8c7   : > { %v2063_v59 = vpop.xlane.xlu0 %2062 }
 0x8c8   : > { %v2067_v60 = vsub.f32 %v2051_v42, %v2063_v59  ;;  %4294 = vpow2.f32 %v2072_v58 }
 0x8ca   : > { %v2074_v61 = vmul.f32 1.442695, %v2067_v60 }
 0x8cc   : > { %4296 = vpow2.f32 %v2074_v61 }
 0x8d2   : > { %v4295_v0 = vpop.eup %4294 }
 0x8d3   : > { %4226 = vrot.lane.b32.xlu1 %v4627_v21, %s4367_s27  ;;  %v2082_v1 = vsel %vm1235_vm5, %v4295_v0, 0.0 }
 0x8d6   : > { %v4297_v2 = vpop.eup %4296 }
 0x8d7   : > { %4231 = vrot.lane.b32.xlu1 %v4618_v17, %s4368_s5  ;;  %v2085_v3 = vsel %vm1235_vm5, %v4297_v2, 0.0 }
 0x8d9   : > { %4221 = vrot.lane.b32.xlu0 %v4618_v17, %s4367_s27  ;;  %s5045_s27 = sld [smem:[#allocation15_spill]] (!%p3661_p5) }
 0x8db   : > { %4236 = vrot.lane.b32.xlu1 %v4627_v21, %s4368_s5 }
 0x8f8   : > { %2083 = vadd.xlane.f32.xlu0 %v2082_v1 }
 0x8ff   : > { %2086 = vadd.xlane.f32.xlu1 %v2085_v3 }
 0x90e   : > { %2270 = vrot.lane.b32.xlu0 %v4612_v15, %s4369_s12 }
 0x910   : > { %2272 = vrot.lane.b32.xlu1 %v4610_v13, %s4369_s12 }
 0x912   : > { %2361 = vrot.lane.b32.xlu0 %v4622_v20, %s4369_s12 }
 0x914   : > { %2363 = vrot.lane.b32.xlu1 %v4620_v18, %s4369_s12 }
 0x94f   : > { %v2081_v5 = vpop.xlane.xlu1 %2080 }
 0x950   : > { %4298 = vrcp.f32 %v2081_v5  ;;  %v2078_v6 = vpop.xlane.xlu0 %2077 }
 0x951   : > { %4300 = vrcp.f32 %v2078_v6 }
 0x953   : > { %v4227_v7 = vpop.permute.xlu1 %4226 }
 0x954   : > { %v4229_v10 = vunpack.i.h.bf16 %v4227_v7  ;;  %v4228_v11 = vunpack.i.l.bf16 %v4227_v7  ;;  %v4222_v12 = vpop.permute.xlu0 %4221 }
 0x955   : > { %v4224_v14 = vunpack.i.h.bf16 %v4222_v12  ;;  %v4223_v16 = vunpack.i.l.bf16 %v4222_v12 }
 0x956   : > { %v4063_v23 = vpack.c.bf16 %v4229_v10, %v4228_v11 }
 0x957   : > { %v4059_v24 = vpack.c.bf16 %v4224_v14, %v4223_v16  ;;  %v4232_v26 = vpop.permute.xlu1 %4231 }
 0x958   : > { %v4234_v15 = vunpack.i.h.bf16 %v4232_v26  ;;  %v4233_v27 = vunpack.i.l.bf16 %v4232_v26  ;;  %4064 = vmatprep.subr.bf16.mxu1 %v4063_v23 }
 0x959   : > { %4060 = vmatprep.subr.bf16.mxu0 %v4059_v24  ;;  %4066 = vmatpush3.bf16.msra.mxu1 %v4063_v23 }
 0x95a   : > { %v4299_v13 = vpop.eup %4298  ;;  %v4067_v18 = vpack.c.bf16 %v4234_v15, %v4233_v27  ;;  %4062 = vmatpush3.bf16.msra.mxu0 %v4059_v24 }
 0x95b   : > { %v4301_v20 = vpop.eup %4300  ;;  %v4237_v28 = vpop.permute.xlu1 %4236  ;;  %v2093_v36 = vmul.f32 %v4299_v13, %v4291_v50 }
 0x95c   : > { %v4239_v29 = vunpack.i.h.bf16 %v4237_v28  ;;  %v4238_v30 = vunpack.i.l.bf16 %v4237_v28  ;;  %4069 = vmatprep.subr.msk.bf16.mxu0 %vm4632_vm4, %v4067_v18  ;;  %v2092_v31 = vmul.f32 %v4301_v20, %v4293_v51 }
 0x95e   : > { %v4073_v37 = vpack.c.bf16 %v4239_v29, %v4238_v30  ;;  %3881 = vmatprep.mubr.msk.f32.mxu0 %vm1235_vm5, %v2092_v31 }
 0x95f   : > { %3882 = vmatmul.mubr.msk.f32.vlgmr.msra.gmra.mrb[6].mxu0 %vm1235_vm5, %v2093_v36 }
 0x960   : > { %4075 = vmatprep.subr.msk.bf16.mxu1 %vm4632_vm4, %v4073_v37 }
 0x963   : > { %4072 = vmatpush3.bf16.xpose.msk.msra.mxu0 %vm4632_vm4, %v4067_v18 }
 0x985   : > { %v2084_v38 = vpop.xlane.xlu0 %2083 }
 0x986   : > { %4302 = vrcp.f32 %v2084_v38 }
 0x989   : > { %v2271_v39 = vpop.permute.xlu0 %2270 }
 0x98a   : > { %3895 = vmatprep.mubr.msk.f32.mxu0 %vm1048_vm3, %v2271_v39 }
 0x98c   : > { %v2087_v40 = vpop.xlane.xlu1 %2086 }
 0x98d   : > { %4304 = vrcp.f32 %v2087_v40  ;;  %v2362_v46 = vpop.permute.xlu0 %2361 }
 0x990   : > { %v4303_v41 = vpop.eup %4302  ;;  %v2273_v42 = vpop.permute.xlu1 %2272 }
 0x991   : > { %3896 = vmatmul.mubr.msk.f32.vlgmr.msra.gmra.mrb[8].mxu0 %vm1048_vm3, %v2273_v42  ;;  %v2094_v43 = vmul.f32 %v4303_v41, %v4295_v0 }
 0x993   : > { %3888 = vmatprep.mubr.msk.f32.mxu1 %vm1235_vm5, %v2094_v43 }
 0x994   : > { %v2364_v47 = vpop.permute.xlu1 %2363 }
 0x997   : > { %v4305_v44 = vpop.eup %4304 }
 0x998   : > { %v2095_v45 = vmul.f32 %v4305_v44, %v4297_v2 }
 0x99a   : > { %3889 = vmatmul.mubr.msk.f32.vlgmr.msra.gmra.mrb[18].mxu1 %vm1235_vm5, %v2095_v45 }
 0x99b   : > { %4078 = vmatpush3.bf16.xpose.msk.msra.mxu1 %vm4632_vm4, %v4073_v37  ;;  %3902 = vmatprep.mubr.msk.f32.mxu1 %vm1048_vm3, %v2362_v46 }
 0x9a2   : > { %3903 = vmatmul.mubr.msk.f32.vlgmr.msra.gmra.mrb[20].mxu1 %vm1048_vm3, %v2364_v47 }
 0xa32   : > { %v3883_v48 = vpop.f32.mrb[6].mxu0 }
 0xa33   : > { %v2174_v49 = vpop.f32.mrb[7].mxu0 }
 0xa64   : > { %v3897_v50 = vpop.f32.mrb[8].mxu0 }
 0xa65   : > { %v2453_v51 = vmul.f32 0.35355338, %v3897_v50  ;;  %v2352_v54 = vpop.f32.mrb[9].mxu0 }
 0xa66   : > { %v2452_v55 = vmul.f32 0.35355338, %v2352_v54 }
 0xa67   : > { %v2457_v56 = vadd.f32 %v2453_v51, %v4659_v35 }
 0xa68   : > { %v2456_v57 = vadd.f32 %v2452_v55, %v4659_v35 }
 0xa69   : > { %v2463_v58 = vsel %vm1235_vm5, %v2457_v56, -inf }
 0xa6a   : > { %2464 = vmax.xlane.f32.xlu1 %v2463_v58  ;;  %v2460_v25 = vsel %vm1235_vm5, %v2456_v57, -inf  ;;  %v2741_v58 = vld [vmem:[%s4524_s4 + $0x10] sm:$0xff] }
 0xa6b   : > { %2461 = vmax.xlane.f32.xlu0 %v2460_v25 }
 0xa6d   : > { %v4789_v59 = vpop.f32.mrb[18].mxu1 }
 0xa6e   : > { %v4791_v60 = vpop.f32.mrb[19].mxu1 }
 0xa75   : > { %v3904_v61 = vpop.f32.mrb[20].mxu1 }
 0xa76   : > { %v2443_v0 = vpop.f32.mrb[21].mxu1  ;;  %v2455_v1 = vmul.f32 0.35355338, %v3904_v61  ;;  %v2742_v61 = vld [vmem:[%s4524_s4 + $0x18] sm:$0xff] }
 0xa77   : > { %v2454_v2 = vmul.f32 0.35355338, %v2443_v0  ;;  %v4091_v0 = vpack.c.bf16 %v2742_v61, %v2741_v58 }
 0xa78   : > { %v2459_v6 = vadd.f32 %v2455_v1, %v4659_v35 }
 0xa79   : > { %v2458_v3 = vadd.f32 %v2454_v2, %v4659_v35 }
 0xa7a   : > { %v2469_v7 = vsel %vm1235_vm5, %v2459_v6, -inf }
 0xa7b   : > { %v2466_v5 = vsel %vm1235_vm5, %v2458_v3, -inf }
 0xa7c   : > { %2467 = vmax.xlane.f32.xlu0 %v2466_v5 }
 0xa80   : > { %2470 = vmax.xlane.f32.xlu0 %v2469_v7 }
 0xaf7   : > { %v2465_v10 = vpop.xlane.xlu1 %2464 }
 0xaf8   : > { %v2473_v11 = vsub.f32 %v2457_v56, %v2465_v10  ;;  %v2462_v12 = vpop.xlane.xlu0 %2461  ;;  %v2739_v56 = vld [vmem:[%s4524_s4] sm:$0xff] }
 0xaf9   : > { %v2472_v14 = vsub.f32 %v2456_v57, %v2462_v12  ;;  %v2740_v57 = vld [vmem:[%s4524_s4 + $0x8] sm:$0xff] }
 0xafa   : > { %v2478_v16 = vmul.f32 1.442695, %v2473_v11  ;;  %v4087_v25 = vpack.c.bf16 %v2740_v57, %v2739_v56 }
 0xafb   : > { %v2476_v23 = vmul.f32 1.442695, %v2472_v14 }
 0xafc   : > { %4306 = vpow2.f32 %v2478_v16 }
 0xafd   : > { %4308 = vpow2.f32 %v2476_v23 }
 0xb06   : > { %v4307_v24 = vpop.eup %4306 }
 0xb07   : > { %v4309_v26 = vpop.eup %4308  ;;  %v2487_v15 = vsel %vm1235_vm5, %v4307_v24, 0.0 }
 0xb08   : > { %2488 = vadd.xlane.f32.xlu1 %v2487_v15  ;;  %v2484_v27 = vsel %vm1235_vm5, %v4309_v26, 0.0 }
 0xb09   : > { %v2468_v35 = vpop.xlane.xlu0 %2467  ;;  %2485 = vadd.xlane.f32.xlu0 %v2484_v27 }
 0xb0a   : > { %v2474_v13 = vsub.f32 %v2458_v3, %v2468_v35 }
 0xb0c   : > { %v2480_v18 = vmul.f32 1.442695, %v2474_v13 }
 0xb0d   : > { %v2471_v20 = vpop.xlane.xlu0 %2470 }
 0xb0e   : > { %4310 = vpow2.f32 %v2480_v18  ;;  %v2475_v28 = vsub.f32 %v2459_v6, %v2471_v20 }
 0xb10   : > { %v2482_v29 = vmul.f32 1.442695, %v2475_v28 }
 0xb12   : > { %4312 = vpow2.f32 %v2482_v29 }
 0xb18   : > { %v4311_v30 = vpop.eup %4310 }
 0xb19   : > { %v2490_v31 = vsel %vm1235_vm5, %v4311_v30, 0.0 }
 0xb1a   : > { %2491 = vadd.xlane.f32.xlu0 %v2490_v31 }
 0xb1c   : > { %v4313_v36 = vpop.eup %4312 }
 0xb1d   : > { %v2493_v37 = vsel %vm1235_vm5, %v4313_v36, 0.0 }
 0xb1e   : > { %2494 = vadd.xlane.f32.xlu1 %v2493_v37  ;;  %v4338_v37 = vld [vmem:[%s4502_s29 + $0x8] sm:$0xff] }
 0xb2f   : > { %4246 = vrot.lane.b32.xlu1 %v4627_v21, %s4370_s28 }
 0xb30   : > { %4241 = vrot.lane.b32.xlu0 %v4618_v17, %s4370_s28 }
 0xb33   : > { %2682 = vrot.lane.b32.xlu1 %v4743_v22, %s4371_s30 }
 0xb34   : > { %2698 = vrot.lane.b32.xlu0 %v2174_v49, %s4372_s0 }
 0xb37   : > { %2684 = vrot.lane.b32.xlu1 %v4741_v19, %s4371_s30 }
 0xb3b   : > { %2700 = vrot.lane.b32.xlu1 %v3883_v48, %s4372_s0 }
 0xb95   : > { %v2489_v40 = vpop.xlane.xlu1 %2488 }
 0xb96   : > { %v2486_v38 = vpop.xlane.xlu0 %2485 }
 0xb97   : > { %4314 = vrcp.f32 %v2486_v38 }
 0xb98   : > { %4316 = vrcp.f32 %v2489_v40 }
 0xba1   : > { %v4315_v39 = vpop.eup %4314 }
 0xba2   : > { %v2500_v41 = vmul.f32 %v4315_v39, %v4309_v26  ;;  %v4317_v45 = vpop.eup %4316 }
 0xba3   : > { %v2501_v49 = vmul.f32 %v4317_v45, %v4307_v24 }
 0xba4   : > { %3909 = vmatprep.mubr.msk.f32.mxu0 %vm1235_vm5, %v2500_v41 }
 0xba7   : > { %v2492_v17 = vpop.xlane.xlu0 %2491 }
 0xba8   : > { %4318 = vrcp.f32 %v2492_v17 }
 0xbab   : > { %v2495_v21 = vpop.xlane.xlu1 %2494  ;;  %v4242_v22 = vpop.permute.xlu0 %4241 }
 0xbac   : > { %4320 = vrcp.f32 %v2495_v21  ;;  %v4244_v42 = vunpack.i.h.bf16 %v4242_v22  ;;  %v4243_v43 = vunpack.i.l.bf16 %v4242_v22 }
 0xbae   : > { %v4079_v44 = vpack.c.bf16 %v4244_v42, %v4243_v43 }
 0xbaf   : > { %v4247_v19 = vpop.permute.xlu1 %4246  ;;  %v2699_v11 = vpop.permute.xlu0 %2698 }
 0xbb0   : > { %v4249_v46 = vunpack.i.h.bf16 %v4247_v19  ;;  %v4248_v47 = vunpack.i.l.bf16 %v4247_v19  ;;  %4080 = vmatprep.subr.bf16.mxu0 %v4079_v44 }
 0xbb1   : > { %4082 = vmatpush3.bf16.msra.mxu0 %v4079_v44  ;;  %v4339_v44 = vld [vmem:[%s4502_s29 + $0x18] sm:$0xff] }
 0xbb2   : > { %v4319_v48 = vpop.eup %4318  ;;  %v4083_v50 = vpack.c.bf16 %v4249_v46, %v4248_v47  ;;  %4088 = vmatprep.subr.bf16.mxu0 %v4087_v25 }
 0xbb3   : > { %v2502_v51 = vmul.f32 %v4319_v48, %v4311_v30  ;;  %v2683_v6 = vpop.permute.xlu1 %2682 }
 0xbb4   : > { %3910 = vmatmul.mubr.msk.f32.vlgmr.msra.gmra.mrb[10].mxu0 %vm1235_vm5, %v2501_v49  ;;  %4084 = vmatprep.subr.bf16.mxu1 %v4083_v50  ;;  %v2726_v12 = vsel %vm1048_vm3, %v4699_v53, %v2683_v6 }
 0xbb5   : > { %4086 = vmatpush3.bf16.msra.mxu1 %v4083_v50  ;;  %3916 = vmatprep.mubr.msk.f32.mxu1 %vm1235_vm5, %v2502_v51  ;;  %v2730_v14 = vsel %vm1235_vm5, %v2726_v12, %v2699_v11  ;;  %v2927_v12 = vld [vmem:[%s4541_s25 + $0x10] sm:$0xff] }
 0xbb6   : > { %v4321_v54 = vpop.eup %4320  ;;  %4090 = vmatpush3.bf16.msra.mxu0 %v4087_v25 }
 0xbb7   : > { %v2503_v55 = vmul.f32 %v4321_v54, %v4313_v36  ;;  %4092 = vmatprep.subr.bf16.mxu0 %v4091_v0  ;;  %v2685_v7 = vpop.permute.xlu1 %2684 }
 0xbb9   : > { %3917 = vmatmul.mubr.msk.f32.vlgmr.msra.gmra.mrb[22].mxu1 %vm1235_vm5, %v2503_v55 }
 0xbba   : > { %4094 = vmatpush3.bf16.msra.mxu0 %v4091_v0 }
 0xbbb   : > { %v2701_v10 = vpop.permute.xlu1 %2700 }
 0xc87   : > { %v3911_v1 = vpop.f32.mrb[10].mxu0 }
 0xc88   : > { %2716 = vrot.lane.b32.xlu1 %v3911_v1, %s4373_s24  ;;  %v2582_v2 = vpop.f32.mrb[11].mxu0 }
 0xc89   : > { %2714 = vrot.lane.b32.xlu0 %v2582_v2, %s4373_s24 }
 0xc8c   : > { %v3918_v3 = vpop.f32.mrb[22].mxu1  ;;  %2688 = vrot.lane.b32.xlu1 %v4749_v32, %s4371_s30 }
 0xc8d   : > { %v2669_v5 = vpop.f32.mrb[23].mxu1  ;;  %2686 = vrot.lane.b32.xlu0 %v4751_v34, %s4371_s30  ;;  %v2727_v34 = vsel %vm1048_vm3, %v4697_v52, %v2685_v7  ;;  %v2925_v7 = vld [vmem:[%s4541_s25] sm:$0xff] }
 0xc8e   : > { %v2731_v16 = vsel %vm1235_vm5, %v2727_v34, %v2701_v10  ;;  %v2926_v10 = vld [vmem:[%s4541_s25 + $0x8] sm:$0xff] }
 0xc8f   : > { %v4095_v11 = vpack.c.bf16 %v2926_v10, %v2925_v7  ;;  %v3084_v7 = vld [vmem:[%s4551_s21 + $0x78] sm:$0xff] }
 0xc90   : > { %2704 = vrot.lane.b32.xlu1 %v4789_v59, %s4372_s0 }
 0xc91   : > { %2702 = vrot.lane.b32.xlu0 %v4791_v60, %s4372_s0  ;;  %4096 = vmatprep.subr.bf16.mxu1 %v4095_v11 }
 0xc92   : > { %4098 = vmatpush3.bf16.msra.mxu1 %v4095_v11  ;;  %v3655_v11 = vld [vmem:[%s812_s6] ss:$0 sm:$0xff] }
 0xc94   : > { %2720 = vrot.lane.b32.xlu1 %v3918_v3, %s4373_s24 }
 0xc95   : > { %2718 = vrot.lane.b32.xlu0 %v2669_v5, %s4373_s24 }
 0xcfa   : > { %v2717_v32 = vpop.permute.xlu1 %2716 }
 0xcfb   : > { %v2715_v59 = vpop.permute.xlu0 %2714  ;;  %v2736_v23 = vsel %vm2734_vm6, %v2731_v16, %v2717_v32  ;;  %v2928_v32 = vld [vmem:[%s4541_s25 + $0x18] sm:$0xff] }
 0xcfc   : > { %v2735_v60 = vsel %vm2734_vm6, %v2730_v14, %v2715_v59  ;;  %v4099_v34 = vpack.c.bf16 %v2928_v32, %v2927_v12 }
 0xcfd   : > { %3927 = vmatprep.mubr.msk.f32.mxu0 %vm858_vm1, %v2735_v60 }
 0xcfe   : > { %v2689_v24 = vpop.permute.xlu1 %2688  ;;  %3928 = vmatmul.mubr.msk.f32.vlgmr.msra.gmra.mrb[12].mxu0 %vm858_vm1, %v2736_v23  ;;  %4100 = vmatprep.subr.bf16.mxu1 %v4099_v34 }
 0xcff   : > { %v2687_v53 = vpop.permute.xlu0 %2686  ;;  %v2729_v35 = vsel %vm1048_vm3, %v4705_v62, %v2689_v24  ;;  %4102 = vmatpush3.bf16.msra.mxu1 %v4099_v34 }
 0xd00   : > { %v2728_v52 = vsel %vm1048_vm3, %v4707_v63, %v2687_v53  ;;  %v3648_v63 = vld [vmem:[%s5039_s9] ss:$0 sm:$0xff] }
 0xd02   : > { %v2705_v26 = vpop.permute.xlu1 %2704 }
 0xd03   : > { %v2703_v15 = vpop.permute.xlu0 %2702  ;;  %v2733_v20 = vsel %vm1235_vm5, %v2729_v35, %v2705_v26 }
 0xd04   : > { %v2732_v13 = vsel %vm1235_vm5, %v2728_v52, %v2703_v15  ;;  %v3653_v52 = vld [vmem:[%s801_s1] ss:$0 sm:$0xff] }
 0xd06   : > { %v2721_v27 = vpop.permute.xlu1 %2720 }
 0xd07   : > { %v2719_v18 = vpop.permute.xlu0 %2718  ;;  %v2738_v29 = vsel %vm2734_vm6, %v2733_v20, %v2721_v27 }
 0xd08   : > { %v2737_v28 = vsel %vm2734_vm6, %v2732_v13, %v2719_v18 }
 0xd09   : > { %3930 = vmatprep.mubr.msk.f32.mxu0 %vm858_vm1, %v2737_v28 }
 0xd0a   : > { %3931 = vmatmul.mubr.msk.f32.gmra.mrb[14].mxu0 %vm858_vm1, %v2738_v29  ;;  %v3654_v29 = vld [vmem:[%s804_s10] ss:$0 sm:$0xff]  ;;  %s5043_s10 = sld [smem:[#allocation7_spill]] (!%p3661_p5) }
 0xdd1   : > { %v3929_v30 = vpop.f32.mrb[12].mxu0 }
 0xdd2   : > { %v2834_v62 = vadd.f32 %v3929_v30, %v3648_v63  ;;  %v2828_v31 = vpop.f32.mrb[13].mxu0 }
 0xdd3   : > { %v2829_v36 = vadd.f32 %v3648_v63, %v2828_v31 }
 0xdd4   : > { %v4851_v38 = vadd.f32 %v4338_v37, %v2834_v62 }
 0xdd5   : > { %v4854_v39 = vadd.f32 %v2829_v36, %v4569_v8 }
 0xdd6   : > { %v2856_v40 = vsel %vm858_vm1, %v4851_v38, 0.0 }
 0xdd7   : > { %2857 = vadd.xlane.f32.xlu1 %v2856_v40  ;;  %v2853_v41 = vsel %vm858_vm1, %v4854_v39, 0.0 }
 0xdd8   : > { %2854 = vadd.xlane.f32.xlu0 %v2853_v41 }
 0xddd   : > { %v3932_v17 = vpop.f32.mrb[14].mxu0 }
 0xdde   : > { %v2838_v21 = vpop.f32.mrb[15].mxu0  ;;  %v2844_v22 = vadd.f32 %v3932_v17, %v3648_v63 }
 0xddf   : > { %v2839_v42 = vadd.f32 %v3648_v63, %v2838_v21 }
 0xde0   : > { %v4864_v45 = vadd.f32 %v4339_v44, %v2844_v22 }
 0xde1   : > { %v4861_v43 = vadd.f32 %v2839_v42, %v4571_v9 }
 0xde2   : > { %v2862_v19 = vsel %vm858_vm1, %v4864_v45, 0.0 }
 0xde3   : > { %v2859_v8 = vsel %vm858_vm1, %v4861_v43, 0.0 }
 0xde4   : > { %2860 = vadd.xlane.f32.xlu0 %v2859_v8  ;;  %v3069_v8 = vld [vmem:[%s4551_s21] sm:$0xff] }
 0xde8   : > { %2863 = vadd.xlane.f32.xlu0 %v2862_v19  ;;  %v3070_v19 = vld [vmem:[%s4551_s21 + $0x8] sm:$0xff] }
 0xe64   : > { %v2858_v46 = vpop.xlane.xlu1 %2857 }
 0xe65   : > { %v2866_v47 = vmul.f32 0.03125, %v2858_v46  ;;  %v2855_v48 = vpop.xlane.xlu0 %2854  ;;  %v4103_v46 = vpack.c.bf16 %v3070_v19, %v3069_v8 }
 0xe66   : > { %v2865_v49 = vmul.f32 0.03125, %v2855_v48  ;;  %v3072_v48 = vld [vmem:[%s4551_s21 + $0x18] sm:$0xff] }
 0xe67   : > { %v2870_v50 = vsub.f32 %v4851_v38, %v2866_v47  ;;  %4104 = vmatprep.subr.bf16.mxu0 %v4103_v46  ;;  %v3071_v47 = vld [vmem:[%s4551_s21 + $0x10] sm:$0xff] }
 0xe68   : > { %v2869_v9 = vsub.f32 %v4854_v39, %v2865_v49  ;;  %4106 = vmatpush3.bf16.msra.mxu0 %v4103_v46  ;;  %v4107_v49 = vpack.c.bf16 %v3072_v48, %v3071_v47 }
 0xe69   : > { %v2874_v51 = vmul.f32 %v2870_v50, %v2870_v50 }
 0xe6a   : > { %v2873_v54 = vmul.f32 %v2869_v9, %v2869_v9  ;;  %4108 = vmatprep.subr.bf16.mxu0 %v4107_v49 }
 0xe6b   : > { %v2880_v55 = vsel %vm858_vm1, %v2874_v51, 0.0 }
 0xe6c   : > { %2881 = vadd.xlane.f32.xlu1 %v2880_v55  ;;  %v2877_v56 = vsel %vm858_vm1, %v2873_v54, 0.0  ;;  %4110 = vmatpush3.bf16.msra.mxu0 %v4107_v49  ;;  %v3075_v54 = vld [vmem:[%s4551_s21 + $0x30] sm:$0xff]  ;;  %v3076_v55 = vld [vmem:[%s4551_s21 + $0x38] sm:$0xff] }
 0xe6d   : > { %2878 = vadd.xlane.f32.xlu0 %v2877_v56  ;;  %v4115_v56 = vpack.c.bf16 %v3076_v55, %v3075_v54 }
 0xe71   : > { %v2861_v57 = vpop.xlane.xlu0 %2860 }
 0xe72   : > { %v2867_v58 = vmul.f32 0.03125, %v2861_v57  ;;  %v3077_v57 = vld [vmem:[%s4551_s21 + $0x40] sm:$0xff] }
 0xe74   : > { %v2871_v25 = vsub.f32 %v4861_v43, %v2867_v58  ;;  %v3078_v58 = vld [vmem:[%s4551_s21 + $0x48] sm:$0xff] }
 0xe75   : > { %v2864_v61 = vpop.xlane.xlu0 %2863 }
 0xe76   : > { %v2868_v0 = vmul.f32 0.03125, %v2864_v61  ;;  %v2875_v1 = vmul.f32 %v2871_v25, %v2871_v25  ;;  %v3079_v61 = vld [vmem:[%s4551_s21 + $0x50] sm:$0xff] }
 0xe78   : > { %v2872_v2 = vsub.f32 %v4864_v45, %v2868_v0  ;;  %v2883_v3 = vsel %vm858_vm1, %v2875_v1, 0.0  ;;  %v3080_v0 = vld [vmem:[%s4551_s21 + $0x58] sm:$0xff] }
 0xe79   : > { %2884 = vadd.xlane.f32.xlu0 %v2883_v3  ;;  %v4123_v1 = vpack.c.bf16 %v3080_v0, %v3079_v61  ;;  %v3082_v3 = vld [vmem:[%s4551_s21 + $0x68] sm:$0xff] }
 0xe7a   : > { %v2876_v5 = vmul.f32 %v2872_v2, %v2872_v2 }
 0xe7c   : > { %v2886_v6 = vsel %vm858_vm1, %v2876_v5, 0.0 }
 0xe7d   : > { %2887 = vadd.xlane.f32.xlu1 %v2886_v6  ;;  %v3083_v6 = vld [vmem:[%s4551_s21 + $0x70] sm:$0xff] }
 0xe7e   : > { %v4131_v10 = vpack.c.bf16 %v3084_v7, %v3083_v6 }
 0xef9   : > { %v2882_v14 = vpop.xlane.xlu1 %2881 }
 0xefa   : > { %v2890_v59 = vmul.f32 0.03125, %v2882_v14  ;;  %v2879_v16 = vpop.xlane.xlu0 %2878 }
 0xefb   : > { %v2889_v60 = vmul.f32 0.03125, %v2879_v16 }
 0xefc   : > { %v2894_v23 = vadd.f32 1e-06, %v2890_v59 }
 0xefd   : > { %v2893_v24 = vadd.f32 1e-06, %v2889_v60 }
 0xefe   : > { %4322 = vrsqrt.f32 %v2894_v23 }
 0xeff   : > { %4324 = vrsqrt.f32 %v2893_v24 }
 0xf06   : > { %v2885_v53 = vpop.xlane.xlu0 %2884 }
 0xf07   : > { %v2891_v26 = vmul.f32 0.03125, %v2885_v53 }
 0xf08   : > { %v4323_v15 = vpop.eup %4322 }
 0xf09   : > { %v4325_v27 = vpop.eup %4324  ;;  %v2902_v35 = vmul.f32 %v4323_v15, %v2870_v50  ;;  %v2895_v13 = vadd.f32 1e-06, %v2891_v26  ;;  %v3073_v50 = vld [vmem:[%s4551_s21 + $0x20] sm:$0xff] }
 0xf0a   : > { %v2888_v18 = vpop.xlane.xlu1 %2887  ;;  %v2901_v20 = vmul.f32 %v4325_v27, %v2869_v9  ;;  %v3074_v9 = vld [vmem:[%s4551_s21 + $0x28] sm:$0xff] }
 0xf0b   : > { %4326 = vrsqrt.f32 %v2895_v13  ;;  %v2892_v28 = vmul.f32 0.03125, %v2888_v18  ;;  %v2912_v63 = vmul.f32 %v3653_v52, %v2902_v35  ;;  %v4111_v51 = vpack.c.bf16 %v3074_v9, %v3073_v50 }
 0xf0c   : > { %v2911_v30 = vmul.f32 %v3653_v52, %v2901_v20 }
 0xf0d   : > { %v2896_v62 = vadd.f32 1e-06, %v2892_v28  ;;  %v2922_v36 = vadd.f32 %v3654_v29, %v2912_v63  ;;  %4112 = vmatprep.subr.bf16.mxu0 %v4111_v51 }
 0xf0e   : > { %v2921_v31 = vadd.f32 %v3654_v29, %v2911_v30  ;;  %4114 = vmatpush3.bf16.msra.mxu0 %v4111_v51 }
 0xf0f   : > { %4328 = vrsqrt.f32 %v2896_v62  ;;  %4116 = vmatprep.subr.bf16.mxu0 %v4115_v56 }
 0xf10   : > { %3941 = vmatprep.mubr.msk.f32.mxu1 %vm858_vm1, %v2921_v31 }
 0xf11   : > { %3942 = vmatmul.mubr.msk.f32.vlgmr.msra.gmra.mrb[24].mxu1 %vm858_vm1, %v2922_v36 }
 0xf12   : > { %4118 = vmatpush3.bf16.msra.mxu0 %v4115_v56  ;;  %v3660_v56 = vld [vmem:[%s820_s7] ss:$0 sm:$0xff]  ;;  %s5040_s7 = sld [smem:[#allocation10_spill]] (!%p3661_p5) }
 0xf15   : > { %v4327_v37 = vpop.eup %4326 }
 0xf16   : > { %v2903_v40 = vmul.f32 %v4327_v37, %v2871_v25  ;;  %v4119_v25 = vpack.c.bf16 %v3078_v58, %v3077_v57 }
 0xf18   : > { %v2913_v41 = vmul.f32 %v3653_v52, %v2903_v40  ;;  %4120 = vmatprep.subr.bf16.mxu0 %v4119_v25 }
 0xf19   : > { %v4329_v17 = vpop.eup %4328  ;;  %4122 = vmatpush3.bf16.msra.mxu0 %v4119_v25 }
 0xf1a   : > { %v2923_v21 = vadd.f32 %v3654_v29, %v2913_v41  ;;  %v2904_v22 = vmul.f32 %v4329_v17, %v2872_v2  ;;  %4124 = vmatprep.subr.bf16.mxu0 %v4123_v1  ;;  %v3081_v2 = vld [vmem:[%s4551_s21 + $0x60] sm:$0xff]  ;;  %s5044_s21 = sld [smem:[#allocation11_spill]] (!%p3661_p5) }
 0xf1b   : > { %v4127_v5 = vpack.c.bf16 %v3082_v3, %v3081_v2 }
 0xf1c   : > { %3944 = vmatprep.mubr.msk.f32.mxu1 %vm858_vm1, %v2923_v21  ;;  %v2914_v42 = vmul.f32 %v3653_v52, %v2904_v22 }
 0xf1d   : > { %4126 = vmatpush3.bf16.msra.mxu0 %v4123_v1 }
 0xf1e   : > { %v2924_v44 = vadd.f32 %v3654_v29, %v2914_v42  ;;  %4128 = vmatprep.subr.bf16.mxu0 %v4127_v5 }
 0xf20   : > { %3945 = vmatmul.mubr.msk.f32.gmra.mrb[26].mxu1 %vm858_vm1, %v2924_v44 }
 0xf21   : > { %4130 = vmatpush3.bf16.msra.mxu0 %v4127_v5 }
 0xf22   : > { %4132 = vmatprep.subr.bf16.mxu0 %v4131_v10 }
 0xf25   : > { %4134 = vmatpush3.bf16.msra.mxu0 %v4131_v10 }
 0xfe4   : > { %v3943_v12 = vpop.f32.mrb[24].mxu1 }
 0xfe5   : > { %v3020_v32 = vadd.f32 %v3943_v12, %v3655_v11  ;;  %v3014_v34 = vpop.f32.mrb[25].mxu1 }
 0xfe6   : > { %v3015_v14 = vadd.f32 %v3655_v11, %v3014_v34 }
 0xfe7   : > { %v3034_v59 = vmul.f32 %v3020_v32, %v3020_v32 }
 0xfe8   : > { %v3033_v16 = vmul.f32 %v3015_v14, %v3015_v14 }
 0xfe9   : > { %v3038_v60 = vmul.f32 %v3034_v59, %v3020_v32 }
 0xfea   : > { %v3037_v23 = vmul.f32 %v3033_v16, %v3015_v14 }
 0xfeb   : > { %v3042_v24 = vmul.f32 0.044715, %v3038_v60 }
 0xfec   : > { %v3041_v53 = vmul.f32 0.044715, %v3037_v23 }
 0xfed   : > { %v3046_v26 = vadd.f32 %v3042_v24, %v3020_v32 }
 0xfee   : > { %v3045_v15 = vadd.f32 %v3041_v53, %v3015_v14 }
 0xfef   : > { %v3050_v52 = vmul.f32 0.7978846, %v3046_v26 }
 0xff0   : > { %v3049_v27 = vmul.f32 0.7978846, %v3045_v15 }
 0xff1   : > { %4330 = vtanh.f32 %v3050_v52 }
 0xff2   : > { %4332 = vtanh.f32 %v3049_v27 }
 0xff3   : > { %v3946_v35 = vpop.f32.mrb[26].mxu1 }
 0xff4   : > { %v3030_v13 = vadd.f32 %v3946_v35, %v3655_v11  ;;  %v3024_v18 = vpop.f32.mrb[27].mxu1 }
 0xff5   : > { %v3025_v20 = vadd.f32 %v3655_v11, %v3024_v18 }
 0xff6   : > { %v3036_v28 = vmul.f32 %v3030_v13, %v3030_v13 }
 0xff7   : > { %v3035_v29 = vmul.f32 %v3025_v20, %v3025_v20 }
 0xff8   : > { %v3040_v63 = vmul.f32 %v3036_v28, %v3030_v13 }
 0xff9   : > { %v3039_v30 = vmul.f32 %v3035_v29, %v3025_v20  ;;  %v3263_v29 = vld [vmem:[%s5040_s7] sm:$0xff] (!%p3661_p5) }
 0xffa   : > { %v3044_v62 = vmul.f32 0.044715, %v3040_v63  ;;  %v3264_v63 = vld [vmem:[%s5040_s7 + $0x8] sm:$0xff] (!%p3661_p5) }
 0xffb   : > { %v4331_v31 = vpop.eup %4330  ;;  %v3043_v36 = vmul.f32 0.044715, %v3039_v30  ;;  %v3265_v30 = vld [vmem:[%s5040_s7 + $0x10] sm:$0xff] (!%p3661_p5) }
 0xffc   : > { %v4333_v37 = vpop.eup %4332  ;;  %v3058_v40 = vadd.f32 1.0, %v4331_v31  ;;  %v3048_v41 = vadd.f32 %v3044_v62, %v3030_v13  ;;  %v4135_v62 = vpack.c.bf16 (!%p3661_p5), %v3264_v63, %v3263_v29  ;;  %v3266_v31 = vld [vmem:[%s5040_s7 + $0x18] sm:$0xff] (!%p3661_p5) }
 0xffd   : > { %v3047_v17 = vadd.f32 %v3043_v36, %v3025_v20  ;;  %v3057_v21 = vadd.f32 1.0, %v4333_v37  ;;  %v4139_v36 = vpack.c.bf16 (!%p3661_p5), %v3266_v31, %v3265_v30 }
 0xffe   : > { %v3062_v22 = vmul.f32 0.5, %v3058_v40  ;;  %v3052_v42 = vmul.f32 0.7978846, %v3048_v41  ;;  %4136 = vmatprep.subr.bf16.mxu0 (!%p3661_p5), %v4135_v62  ;;  %4143 = vmatprep.subr.bf16.mxu1 (!%p3661_p5), %v4135_v62 }
 0xfff   : > { %v3051_v44 = vmul.f32 0.7978846, %v3047_v17  ;;  %v3061_v8 = vmul.f32 0.5, %v3057_v21  ;;  %4145 = vmatpush3.bf16.msra.mxu1 (!%p3661_p5), %v4135_v62 }
0x1000   : > { %4334 = vtanh.f32 %v3052_v42  ;;  %v3066_v46 = vmul.f32 %v3062_v22, %v3020_v32  ;;  %4144 = vmatprep.subr.bf16.mxu1 (!%p3661_p5), %v4139_v36 }
0x1001   : > { %v3065_v19 = vmul.f32 %v3061_v8, %v3015_v14  ;;  %4336 = vtanh.f32 %v3051_v44 }
0x1003   : > { %3979 = vmatprep.mubr.f32.mxu0 %v3065_v19  ;;  %4146 = vmatpush3.bf16.msra.mxu1 (!%p3661_p5), %v4139_v36 }
0x1004   : > { %3980 = vmatmul.mubr.f32.vlgmr.msra.gmra.mrb[16].mxu0 %v3066_v46 }
0x1005   : > { %4138 = vmatpush3.bf16.msra.mxu0 (!%p3661_p5), %v4135_v62 }
0x1006   : > { %4140 = vmatprep.subr.bf16.mxu0 (!%p3661_p5), %v4139_v36 }
0x1009   : > { %4142 = vmatpush3.bf16.msra.mxu0 (!%p3661_p5), %v4139_v36 }
0x100a   : > { %v4335_v47 = vpop.eup %4334 }
0x100b   : > { %v4337_v48 = vpop.eup %4336  ;;  %v3060_v49 = vadd.f32 1.0, %v4335_v47 }
0x100c   : > { %v3059_v50 = vadd.f32 1.0, %v4337_v48 }
0x100d   : > { %v3064_v9 = vmul.f32 0.5, %v3060_v49  ;;  %v3662_v49 = vld [vmem:[%s5041_s2] ss:$0 sm:$0xff] (!%p3661_p5) }
0x100e   : > { %v3063_v51 = vmul.f32 0.5, %v3059_v50 }
0x100f   : > { %v3068_v55 = vmul.f32 %v3064_v9, %v3030_v13  ;;  %v3663_v9 = vld [vmem:[%s5042_s26] ss:$0 sm:$0xff] (!%p3661_p5) }
0x1010   : > { %v3067_v54 = vmul.f32 %v3063_v51, %v3025_v20 }
0x1012   : > { %3982 = vmatprep.mubr.f32.mxu0 %v3067_v54 }
0x1013   : > { %3983 = vmatmul.mubr.f32.gmra.mrb[18].mxu0 %v3068_v55 }
0x10d7   : > { %v3981_v57 = vpop.f32.mrb[16].mxu0 }
0x10d8   : > { %v3164_v58 = vadd.f32 %v3981_v57, %v3660_v56  ;;  %v3158_v25 = vpop.f32.mrb[17].mxu0 }
0x10d9   : > { %v3159_v61 = vadd.f32 %v3660_v56, %v3158_v25 }
0x10da   : > { %v3178_v0 = vadd.f32 %v3164_v58, %v4851_v38 }
0x10db   : > { %v3177_v1 = vadd.f32 %v3159_v61, %v4854_v39 }
0x10dc   : > { %v3194_v38 = vsel (!%p3661_p5), %vm858_vm1, %v3178_v0, 0.0 }
0x10dd   : > { %3181 = vst.msk [vmem:[#allocation2] sm:$0xff] %vm858_vm1, %v3177_v1  ;;  %v3191_v11 = vsel (!%p3661_p5), %vm858_vm1, %v3177_v1, 0.0  ;;  %3195 = vadd.xlane.f32.xlu1 (!%p3661_p5), %v3194_v38 }
0x10de   : > { %3192 = vadd.xlane.f32.xlu0 (!%p3661_p5), %v3191_v11 }
0x10e6   : > { %v3984_v2 = vpop.f32.mrb[18].mxu0  ;;  %3188 = sbr.rel (%p3661_p5) target bundleno = 4867 (0x1303), region = 108 }
0x10e7   : > { %v3174_v3 = vadd.f32 %v3984_v2, %v3660_v56  ;;  %v3168_v5 = vpop.f32.mrb[19].mxu0 }
0x10e8   : > { %v3169_v6 = vadd.f32 %v3660_v56, %v3168_v5 }
0x10e9   : > { %v3180_v7 = vadd.f32 %v3174_v3, %v4864_v45 }
0x10ea   : > { %v3179_v10 = vadd.f32 %v3169_v6, %v4861_v43 }
0x10eb   : > { %v3200_v12 = vsel (!%p3661_p5), %vm858_vm1, %v3180_v7, 0.0 }
0x10ec   : > { %3183 = vst.msk [vmem:[#allocation2 + $0x10] sm:$0xff] %vm858_vm1, %v3179_v10  ;;  %v3197_v39 = vsel (!%p3661_p5), %vm858_vm1, %v3179_v10, 0.0  ;;  %3201 = vadd.xlane.f32.xlu1 (!%p3661_p5), %v3200_v12 }
0x10ed   : > { %3198 = vadd.xlane.f32.xlu0 %v3197_v39  ;;  %v4374_v39 = vmov 1966171168  }
0x10ee   : > { %v3381_v12 = vunpack.c.l.s4 %v4374_v39 }
0x116a   : > { %v3196_v32 = vpop.xlane.xlu1 %3195 }
0x116b   : > { %v3193_v45 = vpop.xlane.xlu0 %3192  ;;  %v3204_v34 = vmul.f32 0.03125, %v3196_v32 }
0x116c   : > { %v3203_v43 = vmul.f32 0.03125, %v3193_v45  ;;  %v3382_v45 = vunpack.c.0.s8 %v3381_v12 }
0x116d   : > { %v3208_v59 = vsub.f32 %v3178_v0, %v3204_v34 }
0x116e   : > { %v3207_v14 = vsub.f32 %v3177_v1, %v3203_v43  ;;  %v3385_v34 = vsub.s32 %v3382_v45, %v4564_v4 }
0x116f   : > { %v3212_v26 = vmul.f32 %v3208_v59, %v3208_v59 }
0x1170   : > { %v3211_v53 = vmul.f32 %v3207_v14, %v3207_v14 }
0x1171   : > { %v3218_v35 = vsel %vm858_vm1, %v3212_v26, 0.0 }
0x1172   : > { %v3215_v27 = vsel %vm858_vm1, %v3211_v53, 0.0 }
0x1173   : > { %3216 = vadd.xlane.f32.xlu0 %v3215_v27 }
0x1177   : > { %3219 = vadd.xlane.f32.xlu0 %v3218_v35 }
0x1179   : > { %v3202_v60 = vpop.xlane.xlu1 %3201 }
0x117a   : > { %v3199_v16 = vpop.xlane.xlu0 %3198  ;;  %v3206_v24 = vmul.f32 0.03125, %v3202_v60  ;;  %v3664_v60 = vld [vmem:[%s5044_s21] ss:$0 sm:$0xff] }
0x117b   : > { %v3205_v23 = vmul.f32 0.03125, %v3199_v16 }
0x117c   : > { %v3210_v52 = vsub.f32 %v3180_v7, %v3206_v24  ;;  %v3371_v7 = vld [vmem:[%s5043_s10] sm:$0x3] }
0x117d   : > { %v3209_v15 = vsub.f32 %v3179_v10, %v3205_v23  ;;  %v3669_v10 = vmul.f32 -1.442695, %v3371_v7 }
0x117e   : > { %v3214_v18 = vmul.f32 %v3210_v52, %v3210_v52 }
0x117f   : > { %v3213_v13 = vmul.f32 %v3209_v15, %v3209_v15 }
0x1180   : > { %v3224_v28 = vsel %vm858_vm1, %v3214_v18, 0.0 }
0x1181   : > { %v3221_v20 = vsel %vm858_vm1, %v3213_v13, 0.0 }
0x1182   : > { %3222 = vadd.xlane.f32.xlu1 %v3221_v20 }
0x1186   : > { %3225 = vadd.xlane.f32.xlu1 %v3224_v28 }
0x1200   : > { %v3217_v37 = vpop.xlane.xlu0 %3216 }
0x1201   : > { %v3227_v40 = vmul.f32 0.03125, %v3217_v37 }
0x1203   : > { %v3231_v41 = vadd.f32 1e-06, %v3227_v40 }
0x1204   : > { %v3220_v21 = vpop.xlane.xlu0 %3219 }
0x1205   : > { %4340 = vrsqrt.f32 %v3231_v41  ;;  %v3228_v42 = vmul.f32 0.03125, %v3220_v21 }
0x1207   : > { %v3232_v8 = vadd.f32 1e-06, %v3228_v42 }
0x120f   : > { %v3223_v17 = vpop.xlane.xlu1 %3222  ;;  %v4341_v48 = vpop.eup %4340 }
0x1210   : > { %v3229_v22 = vmul.f32 0.03125, %v3223_v17  ;;  %v3239_v50 = vmul.f32 %v4341_v48, %v3207_v14 }
0x1212   : > { %v3233_v44 = vadd.f32 1e-06, %v3229_v22  ;;  %v3249_v51 = vmul.f32 %v3662_v49, %v3239_v50 }
0x1213   : > { %v3226_v19 = vpop.xlane.xlu1 %3225 }
0x1214   : > { %4342 = vrsqrt.f32 %v3233_v44  ;;  %v3230_v46 = vmul.f32 0.03125, %v3226_v19  ;;  %v3259_v56 = vadd.f32 %v3663_v9, %v3249_v51 }
0x1215   : > { %4344 = vrsqrt.f32 %v3232_v8 }
0x1216   : > { %v3234_v47 = vadd.f32 1e-06, %v3230_v46  ;;  %3993 = vmatprep.mubr.msk.f32.mxu0 %vm858_vm1, %v3259_v56 }
0x1218   : > { %4346 = vrsqrt.f32 %v3234_v47 }
0x1219   : > { %4348 = vpow2.f32 %v3669_v10 }
0x121e   : > { %v4343_v54 = vpop.eup %4342 }
0x121f   : > { %v4345_v55 = vpop.eup %4344  ;;  %v3241_v57 = vmul.f32 %v4343_v54, %v3209_v15 }
0x1220   : > { %v3240_v58 = vmul.f32 %v4345_v55, %v3208_v59 }
0x1221   : > { %v3251_v25 = vmul.f32 %v3662_v49, %v3241_v57 }
0x1222   : > { %v4347_v61 = vpop.eup %4346  ;;  %v3250_v0 = vmul.f32 %v3662_v49, %v3240_v58 }
0x1223   : > { %v3261_v1 = vadd.f32 %v3663_v9, %v3251_v25  ;;  %v3242_v2 = vmul.f32 %v4347_v61, %v3210_v52  ;;  %v4349_v11 = vpop.eup %4348 }
0x1224   : > { %v3260_v3 = vadd.f32 %v3663_v9, %v3250_v0  ;;  %v3375_v38 = vadd.f32 1.0, %v4349_v11 }
0x1225   : > { %3996 = vmatprep.mubr.msk.f32.mxu1 %vm858_vm1, %v3261_v1  ;;  %v3252_v5 = vmul.f32 %v3662_v49, %v3242_v2 }
0x1226   : > { %3994 = vmatmul.mubr.msk.f32.vlgmr.msra.gmra.mrb[0].mxu0 %vm858_vm1, %v3260_v3  ;;  %4350 = vrcp.f32 %v3375_v38 }
0x1227   : > { %v3262_v6 = vadd.f32 %v3663_v9, %v3252_v5 }
0x1229   : > { %3997 = vmatmul.mubr.msk.f32.vlgmr.msra.gmra.mrb[0].mxu1 %vm858_vm1, %v3262_v6 }
0x1230   : > { %v4351_v32 = vpop.eup %4350 }
0x1231   : > { %v3378_v43 = vmul.f32 2.0, %v4351_v32 }
0x1233   : > { %v3386_v14 = vrot.slane %v3378_v43, %v3385_v34 }
0x1235   : > { %v3387_v59 = vcombine.high %v3386_v14, %v3386_v14  ;;  %v3394_v16 = vrot.slane %v3386_v14, %v3385_v34 }
0x1237   : > { %v3401_v23 = vrot.slane %v3387_v59, %v3385_v34  ;;  %v3405_v24 = vrot.slane %v3394_v16, %v4656_v33 }
0x1239   : > { %v3409_v27 = vrot.slane %v3401_v23, %v4656_v33 }
0x12f9   : > { %v3995_v53 = vpop.f32.mrb[0].mxu0 }
0x12fa   : > { %v3358_v26 = vadd.f32 %v3995_v53, %v3664_v60  ;;  %v3352_v15 = vpop.f32.mrb[1].mxu0 }
0x12fb   : > { %v3353_v52 = vadd.f32 %v3664_v60, %v3352_v15 }
0x12fc   : > { %v3413_v35 = vmul.f32 %v3405_v24, %v3358_v26  ;;  %v3998_v13 = vpop.f32.mrb[0].mxu1 }
0x12fd   : > { %v3412_v18 = vmul.f32 %v3405_v24, %v3353_v52  ;;  %v3368_v4 = vadd.f32 %v3998_v13, %v3664_v60  ;;  %v3362_v20 = vpop.f32.mrb[1].mxu1 }
0x12fe   : > { %3417 = vst.msk [vmem:[%s5045_s27 + $0x8] sm:$0xff] %vm1235_vm5, %v3413_v35  ;;  %v3363_v28 = vadd.f32 %v3664_v60, %v3362_v20 }
0x12ff   : > { %3416 = vst.msk [vmem:[%s5045_s27] sm:$0xff] %vm1235_vm5, %v3412_v18  ;;  %v3415_v29 = vmul.f32 %v3409_v27, %v3368_v4 }
0x1300   : > { %v3414_v63 = vmul.f32 %v3409_v27, %v3363_v28 }
0x1301   : > { %3419 = vst.msk [vmem:[%s5045_s27 + $0x18] sm:$0xff] %vm1235_vm5, %v3415_v29 }
0x1302   : > { %3418 = vst.msk [vmem:[%s5045_s27 + $0x10] sm:$0xff] %vm1235_vm5, %v3414_v63 }
0x1303 PF: > { %s5046_s4 = sld [smem:[#allocation3_spill]] }
0x1309   : > { %s30_s1 = sadd.s32 1, %s5046_s4  }
0x130a   : > { %p27_p6 = scmp.ge.s32.totalorder %s30_s1, 7  }
0x130c   :  { %29 = sbr.rel (!%p27_p6) target bundleno = 13 (0xd), region = 173 }

// kernel: mvp_forward.2
= control target key start
LH: loop header
LB: loop body
LE: loop exit
PB: predicated region body
PF: predicated region fallthrough
CT: control target
= control target key end

     0   :  { %s4252_s18 = smov 0   ;;  %s4722_s0 = inlined_call_operand.vmem [shape: f32[2,16,32], index: 0, kind: input, shape index: {}]   ;;  %s4723_s1 = inlined_call_operand.vmem [shape: f32[5,1,16], index: 1, kind: input, shape index: {}]   ;;  %s4724_s2 = inlined_call_operand.vmem [shape: f32[4,32], index: 2, kind: input, shape index: {}]   ;;  %s4725_s3 = inlined_call_operand.vmem [shape: f32[5,1,32], index: 3, kind: input, shape index: {}]   ;;  %s4726_s4 = inlined_call_operand.vmem [shape: f32[5,1,32], index: 4, kind: input, shape index: {}]   ;;  %s4727_s5 = inlined_call_operand.vmem [shape: f32[5,32,96], index: 5, kind: input, shape index: {}]   ;;  %s4728_s6 = inlined_call_operand.vmem [shape: f32[5,1,96], index: 6, kind: input, shape index: {}]   ;;  %s4729_s7 = inlined_call_operand.vmem [shape: f32[5,32,32], index: 7, kind: input, shape index: {}]   ;;  %s4730_s8 = inlined_call_operand.vmem [shape: f32[5,1,32], index: 8, kind: input, shape index: {}]   ;;  %s4731_s9 = inlined_call_operand.vmem [shape: f32[5,1,32], index: 9, kind: input, shape index: {}]   ;;  %s4732_s10 = inlined_call_operand.vmem [shape: f32[5,1,32], index: 10, kind: input, shape index: {}]   ;;  %s4733_s11 = inlined_call_operand.vmem [shape: f32[5,32,128], index: 11, kind: input, shape index: {}]   ;;  %s4734_s12 = inlined_call_operand.vmem [shape: f32[5,1,128], index: 12, kind: input, shape index: {}]   ;;  %s4735_s13 = inlined_call_operand.vmem [shape: f32[5,128,32], index: 13, kind: input, shape index: {}]   ;;  %s4736_s14 = inlined_call_operand.vmem [shape: f32[5,1,32], index: 14, kind: input, shape index: {}]   ;;  %s4737_s15 = inlined_call_operand.vmem [shape: f32[2,16,4], index: 15, kind: output, shape index: {}]  }
   0x1   :  { %4740 = sst [smem:[#allocation4_spill]] %s4723_s1 }
   0x2   :  { %4741 = sst [smem:[#allocation5_spill]] %s4724_s2 }
   0x3   :  { %4742 = sst [smem:[#allocation6_spill]] %s4726_s4 }
   0x4   :  { %4743 = sst [smem:[#allocation7_spill]] %s4727_s5 }
   0x5   :  { %4744 = sst [smem:[#allocation8_spill]] %s4729_s7 }
   0x6   :  { %4745 = sst [smem:[#allocation9_spill]] %s4737_s15 }
   0x7 LB: > { %4746 = sst [smem:[#allocation3_spill]] %s4155_s18  ;;  %s4258_s19 = sadd.s32 4294967295, %s4155_s18   ;;  %s4155_s18 = sphi %s4252_s18, %s25_s18  }
   0x8   : > { %p3397_p0 = scmp.ge.s32.totalorder %s4155_s18, 1  ;;  %p534_p1 = scmp.lt.s32.totalorder %s4155_s18, 6 }
   0xa   : > { %p535_p2 = pnand %p3397_p0, %p534_p1 }
   0xb   : > { %p619_p3 = scmp.lt.s32.totalorder (!%p535_p2), %s4258_s19, 4  ;;  %s4749_s5 = sld [smem:[#allocation7_spill]] (!%p535_p2) }
   0xc   : > { %538 = sbr.rel (%p535_p2) target bundleno = 4620 (0x120c), region = 80  ;;  %s4750_s7 = sld [smem:[#allocation8_spill]] (!%p535_p2) }
   0xd   : > { %p3406_p4 = scmp.ne.s32.totalorder (!%p535_p2), %s4258_s19, 0 }
  0x13   : > { %s4264_s20 = scalar_select %p619_p3, %s4258_s19, 4 }
  0x14   : > { %669 = sbr.rel (%p3406_p4) target bundleno = 27 (0x1b), region = 84  ;;  %v670_v0 = vld [vmem:[%s4722_s0] sm:$0xff] (!%p3406_p4)  ;;  %vm674_vm0 = vcmask (!%p3406_p4), 261120   ;;  %v672_v1 = vld [vmem:[%s4722_s0 + $0x10] sm:$0xff] (!%p3406_p4) }
  0x15   : > { %s3484_s30 = sshll.u32 %s4264_s20, 5  ;;  %s657_s15 = scalar_lea.vmem %s4734_s12, %s4264_s20  ;;  %675 = vst.msk [vmem:[#allocation2] sm:$0xff] (!%p3406_p4), %vm674_vm0, %v670_v0  ;;  %677 = vst.msk [vmem:[#allocation2 + $0x10] sm:$0xff] (!%p3406_p4), %vm674_vm0, %v672_v1 }
  0x16   : > { %s4282_s21 = scalar_lea.vmem %s4749_s5, %s3484_s30  ;;  %s4291_s1 = scalar_lea.vmem %s4750_s7, %s3484_s30 }
  0x17   : > { %s649_s5 = scalar_lea.vmem %s4732_s10, %s4264_s20  ;;  %s4308_s22 = scalar_lea.vmem %s4733_s11, %s3484_s30 }
  0x18   : > { %s3487_s7 = sshll.u32 %s4264_s20, 7  ;;  %s665_s27 = scalar_lea.vmem %s4736_s14, %s4264_s20 }
  0x19   : > { %s4322_s26 = scalar_lea.vmem %s4735_s13, %s3487_s7 }
  0x1b PF: > { %v680_v2 = vlaneseq  ;;  %vm699_vm1 = vcmask 261120   ;;  %v4157_v10 = vmov 0.0   ;;  %v773_v31 = vld [vmem:[%s4282_s21] sm:$0xff]  ;;  %v774_v32 = vld [vmem:[%s4282_s21 + $0x8] sm:$0xff]  ;;  %v775_v33 = vld [vmem:[%s4282_s21 + $0x10] sm:$0xff]  ;;  %s4751_s18 = scalar_lea.vmem %s4725_s3, %s4264_s20  ;;  %s4752_s24 = sld [smem:[#allocation6_spill]] }
  0x1c   : > { %v685_v4 = vld [vmem:[#allocation2] sm:$0xff]  ;;  %v687_v5 = vld [vmem:[#allocation2 + $0x10] sm:$0xff]  ;;  %v3801_v34 = vpack.c.bf16 %v774_v32, %v773_v31  ;;  %v776_v35 = vld [vmem:[%s4282_s21 + $0x18] sm:$0xff]  ;;  %s4754_s4 = scalar_lea.vmem %s4728_s6, %s4264_s20  ;;  %vm889_vm3 = vcmask 64512   ;;  %s4158_s30 = smov 96   ;;  %vm1076_vm5 = vcmask 130048  }
  0x1d   : > { %v4331_v3 = vshrl.u32 %v680_v2, 7  ;;  %v3805_v36 = vpack.c.bf16 %v776_v35, %v775_v33  ;;  %v3407_v50 = vld [vmem:[%s4751_s18] ss:$0 sm:$0xff]  ;;  %vm4393_vm4 = vmpackc.low %vm889_vm3, %vm889_vm3  ;;  %s4757_s7 = sld [smem:[#allocation4_spill]]  ;;  %s4159_s18 = smov 64   ;;  %vm2575_vm6 = vcmask 195584  }
  0x1e   : > { %3802 = vmatprep.subr.bf16.mxu1 %v3801_v34  ;;  %s4160_s2 = smov 88   ;;  %s4161_s23 = smov 120  }
  0x1f   : > { %vm683_vm2 = vcmp.lt.s32.totalorder %v4331_v3, 5  ;;  %3804 = vmatpush3.bf16.msra.mxu1 %v3801_v34  ;;  %s4164_s29 = smov 112   ;;  %s4165_s28 = smov 48  }
  0x20   : > { %v4334_v6 = vsel %vm683_vm2, %v685_v4, 0.0  ;;  %v4336_v7 = vsel %vm683_vm2, %v687_v5, 0.0  ;;  %3806 = vmatprep.subr.bf16.mxu1 %v3805_v36  ;;  %v3409_v4 = vld [vmem:[%s4754_s4] ss:$0 sm:$0xff]  ;;  %s4166_s4 = smov 72   ;;  %s4168_s16 = smov 40  }
  0x21   : > { %v700_v8 = vsel %vm699_vm1, %v4334_v6, 0.0  ;;  %v706_v9 = vsel %vm699_vm1, %v4336_v7, 0.0  ;;  %s4753_s25 = scalar_lea.vmem %s4752_s24, %s4264_s20  ;;  %s4162_s24 = smov 56  }
  0x22   : > { %701 = vadd.xlane.f32.xlu0 %v700_v8  ;;  %707 = vadd.xlane.f32.xlu1 %v706_v9  ;;  %v3408_v52 = vld [vmem:[%s4753_s25] ss:$0 sm:$0xff]  ;;  %s4163_s25 = smov 80   ;;  %s4169_s17 = smov 8  }
  0x23   : > { %3808 = vmatpush3.bf16.msra.mxu1 %v3805_v36  ;;  %s4758_s21 = scalar_lea.vmem %s4757_s7, %s4264_s20  ;;  %s4170_s7 = smov 16  }
  0x24   : > { %p3476_p5 = scmp.ne.s32.totalorder %s4258_s19, 4 }
  0x25   : > { %vm3080_vm7 = vcmask (!%p3476_p5), 257024   ;;  %vm3244_vm2 = vcmask (!%p3476_p5), 31744  }
  0x26   : > { %704 = vadd.xlane.f32.xlu0 %v4157_v10  ;;  %710 = vadd.xlane.f32.xlu1 %v4157_v10 }
  0xaf   : > { %v702_v11 = vpop.xlane.xlu0 %701  ;;  %v708_v12 = vpop.xlane.xlu1 %707 }
  0xb0   : > { %v713_v13 = vmul.f32 0.03125, %v702_v11  ;;  %v715_v14 = vmul.f32 0.03125, %v708_v12 }
  0xb2   : > { %v717_v15 = vsub.f32 %v4334_v6, %v713_v13  ;;  %v719_v16 = vsub.f32 %v4336_v7, %v715_v14 }
  0xb3   : > { %v705_v17 = vpop.xlane.xlu0 %704  ;;  %v711_v18 = vpop.xlane.xlu1 %710 }
  0xb4   : > { %v714_v19 = vmul.f32 0.03125, %v705_v17  ;;  %v716_v20 = vmul.f32 0.03125, %v711_v18  ;;  %v721_v21 = vmul.f32 %v717_v15, %v717_v15  ;;  %v723_v22 = vmul.f32 %v719_v16, %v719_v16 }
  0xb6   : > { %v718_v23 = vsub.f32 0.0, %v714_v19  ;;  %v720_v24 = vsub.f32 0.0, %v716_v20  ;;  %v725_v25 = vsel %vm699_vm1, %v721_v21, 0.0  ;;  %v731_v26 = vsel %vm699_vm1, %v723_v22, 0.0 }
  0xb7   : > { %726 = vadd.xlane.f32.xlu0 %v725_v25 }
  0xb8   : > { %v722_v27 = vmul.f32 %v718_v23, %v718_v23  ;;  %v724_v28 = vmul.f32 %v720_v24, %v720_v24 }
  0xba   : > { %v728_v29 = vsel %vm699_vm1, %v722_v27, 0.0  ;;  %v734_v30 = vsel %vm699_vm1, %v724_v28, 0.0  ;;  %v1069_v28 = vsub.s32 0, %v4331_v3 }
  0xbb   : > { %732 = vadd.xlane.f32.xlu0 %v731_v26  ;;  %729 = vadd.xlane.f32.xlu1 %v728_v29  ;;  %v679_v26 = vld [vmem:[%s4758_s21] sm:$0x1]  ;;  %s4171_s21 = smov 24  }
  0xbc   : > { %v3414_v27 = vadd.f32 -1.0, %v679_v26 }
  0xbe   : > { %v882_v29 = vmul.f32 1e+09, %v3414_v27 }
  0xbf   : > { %735 = vadd.xlane.f32.xlu1 %v734_v30 }
  0xc0   : > { %v4419_v30 = vrot.slane %v882_v29, %v1069_v28 }
 0x144   : > { %v727_v37 = vpop.xlane.xlu0 %726 }
 0x145   : > { %v737_v38 = vmul.f32 0.03125, %v727_v37 }
 0x147   : > { %v741_v39 = vadd.f32 1e-06, %v737_v38 }
 0x148   : > { %v730_v40 = vpop.xlane.xlu1 %729  ;;  %v733_v41 = vpop.xlane.xlu0 %732 }
 0x149   : > { %4043 = vrsqrt.f32 %v741_v39  ;;  %v738_v42 = vmul.f32 0.03125, %v730_v40  ;;  %v739_v43 = vmul.f32 0.03125, %v733_v41 }
 0x14b   : > { %v742_v44 = vadd.f32 1e-06, %v738_v42  ;;  %v743_v45 = vadd.f32 1e-06, %v739_v43 }
 0x14c   : > { %v736_v46 = vpop.xlane.xlu1 %735 }
 0x14d   : > { %4045 = vrsqrt.f32 %v742_v44  ;;  %v740_v47 = vmul.f32 0.03125, %v736_v46 }
 0x14e   : > { %4047 = vrsqrt.f32 %v743_v45 }
 0x14f   : > { %v744_v48 = vadd.f32 1e-06, %v740_v47 }
 0x151   : > { %4049 = vrsqrt.f32 %v744_v48 }
 0x153   : > { %v4044_v49 = vpop.eup %4043 }
 0x154   : > { %v749_v51 = vmul.f32 %v4044_v49, %v717_v15 }
 0x156   : > { %v759_v53 = vmul.f32 %v3407_v50, %v749_v51 }
 0x157   : > { %v4046_v54 = vpop.eup %4045 }
 0x158   : > { %v4048_v55 = vpop.eup %4047  ;;  %v769_v56 = vadd.f32 %v3408_v52, %v759_v53  ;;  %v750_v57 = vmul.f32 %v4046_v54, %v718_v23 }
 0x159   : > { %v751_v58 = vmul.f32 %v4048_v55, %v719_v16 }
 0x15a   : > { %3609 = vmatprep.mubr.msk.f32.mxu1 %vm699_vm1, %v769_v56  ;;  %v760_v59 = vmul.f32 %v3407_v50, %v750_v57 }
 0x15b   : > { %v4050_v60 = vpop.eup %4049  ;;  %v761_v61 = vmul.f32 %v3407_v50, %v751_v58 }
 0x15c   : > { %v770_v62 = vadd.f32 %v3408_v52, %v760_v59  ;;  %v752_v63 = vmul.f32 %v4050_v60, %v720_v24 }
 0x15d   : > { %v771_v0 = vadd.f32 %v3408_v52, %v761_v61 }
 0x15e   : > { %3610 = vmatmul.mubr.msk.f32.vlgmr.msra.gmra.mrb[0].mxu1 %vm699_vm1, %v770_v62  ;;  %v762_v1 = vmul.f32 %v3407_v50, %v752_v63 }
 0x15f   : > { %3612 = vmatprep.mubr.msk.f32.mxu1 %vm699_vm1, %v771_v0 }
 0x160   : > { %v772_v2 = vadd.f32 %v3408_v52, %v762_v1 }
 0x162   : > { %3613 = vmatmul.mubr.msk.f32.gmra.mrb[2].mxu1 %vm699_vm1, %v772_v2 }
 0x231   : > { %v3611_v5 = vpop.f32.mrb[0].mxu1 }
 0x232   : > { %v4371_v8 = vadd.f32 %v3611_v5, %v3409_v4  ;;  %v862_v9 = vpop.f32.mrb[1].mxu1 }
 0x233   : > { %v4373_v10 = vadd.f32 %v3409_v4, %v862_v9 }
 0x235   : > { %v3614_v11 = vpop.f32.mrb[2].mxu1  ;;  %3619 = vmatprep.mubr.msk.f32.mxu1 %vm889_vm3, %v4373_v10  ;;  %v4379_v12 = vpack.i.bf16 %v4371_v8, %v4373_v10 }
 0x236   : > { %v4381_v13 = vadd.f32 %v3614_v11, %v3409_v4  ;;  %v872_v14 = vpop.f32.mrb[3].mxu1 }
 0x237   : > { %v4383_v15 = vadd.f32 %v3409_v4, %v872_v14  ;;  %3964 = vrot.lane.b32.xlu0 %v4379_v12, %s4158_s30 }
 0x239   : > { %v4388_v16 = vpack.i.bf16 %v4381_v13, %v4383_v15 }
 0x23b   : > { %3969 = vrot.lane.b32.xlu1 %v4388_v16, %s4158_s30  ;;  %s4167_s30 = smov 104  }
 0x2a9   : > { %v3965_v17 = vpop.permute.xlu0 %3964 }
 0x2aa   : > { %v3967_v18 = vunpack.i.h.bf16 %v3965_v17  ;;  %v3966_v19 = vunpack.i.l.bf16 %v3965_v17 }
 0x2ac   : > { %v3809_v21 = vpack.c.bf16 %v3967_v18, %v3966_v19 }
 0x2ad   : > { %v3970_v22 = vpop.permute.xlu1 %3969 }
 0x2ae   : > { %v3972_v23 = vunpack.i.h.bf16 %v3970_v22  ;;  %v3971_v24 = vunpack.i.l.bf16 %v3970_v22  ;;  %3811 = vmatprep.subr.msk.bf16.mxu1 %vm4393_vm4, %v3809_v21 }
 0x2af   : > { %3814 = vmatpush3.bf16.xpose.msk.msra.mxu1 %vm4393_vm4, %v3809_v21 }
 0x2b0   : > { %v3815_v25 = vpack.c.bf16 %v3972_v23, %v3971_v24 }
 0x2b2   : > { %3817 = vmatprep.subr.msk.bf16.mxu1 %vm4393_vm4, %v3815_v25 }
 0x2b6   : > { %3620 = vmatmul.mubr.msk.f32.vlgmr.msra.gmra.mrb[4].mxu1 %vm889_vm3, %v4371_v8 }
 0x2b7   : > { %3820 = vmatpush3.bf16.xpose.msk.msra.mxu1 %vm4393_vm4, %v3815_v25  ;;  %3626 = vmatprep.mubr.msk.f32.mxu1 %vm889_vm3, %v4383_v15 }
 0x2be   : > { %3627 = vmatmul.mubr.msk.f32.vlgmr.msra.gmra.mrb[6].mxu1 %vm889_vm3, %v4381_v13 }
 0x389   : > { %v3621_v31 = vpop.f32.mrb[4].mxu1 }
 0x38a   : > { %v1063_v32 = vmul.f32 0.35355338, %v3621_v31  ;;  %v964_v33 = vpop.f32.mrb[5].mxu1 }
 0x38b   : > { %v1062_v34 = vmul.f32 0.35355338, %v964_v33 }
 0x38c   : > { %v1073_v35 = vadd.f32 %v4419_v30, %v1063_v32 }
 0x38d   : > { %v1072_v36 = vadd.f32 %v4419_v30, %v1062_v34 }
 0x38e   : > { %v1080_v37 = vsel %vm1076_vm5, %v1073_v35, -inf }
 0x38f   : > { %1081 = vmax.xlane.f32.xlu0 %v1080_v37  ;;  %v1077_v38 = vsel %vm1076_vm5, %v1072_v36, -inf }
 0x390   : > { %1078 = vmax.xlane.f32.xlu1 %v1077_v38 }
 0x391   : > { %v3628_v39 = vpop.f32.mrb[6].mxu1 }
 0x392   : > { %v1065_v40 = vmul.f32 0.35355338, %v3628_v39  ;;  %v1053_v41 = vpop.f32.mrb[7].mxu1 }
 0x393   : > { %v1064_v42 = vmul.f32 0.35355338, %v1053_v41 }
 0x394   : > { %v1075_v43 = vadd.f32 %v4419_v30, %v1065_v40 }
 0x395   : > { %v1074_v44 = vadd.f32 %v4419_v30, %v1064_v42 }
 0x396   : > { %v1086_v45 = vsel %vm1076_vm5, %v1075_v43, -inf }
 0x397   : > { %1087 = vmax.xlane.f32.xlu1 %v1086_v45  ;;  %v1083_v46 = vsel %vm1076_vm5, %v1074_v44, -inf }
 0x398   : > { %1084 = vmax.xlane.f32.xlu0 %v1083_v46 }
 0x41c   : > { %v1082_v47 = vpop.xlane.xlu0 %1081 }
 0x41d   : > { %v1090_v48 = vsub.f32 %v1073_v35, %v1082_v47  ;;  %v1079_v49 = vpop.xlane.xlu1 %1078 }
 0x41e   : > { %v1089_v50 = vsub.f32 %v1072_v36, %v1079_v49 }
 0x41f   : > { %v1095_v51 = vmul.f32 1.442695, %v1090_v48 }
 0x420   : > { %v1093_v52 = vmul.f32 1.442695, %v1089_v50 }
 0x421   : > { %4051 = vpow2.f32 %v1095_v51 }
 0x422   : > { %4053 = vpow2.f32 %v1093_v52 }
 0x424   : > { %v1088_v59 = vpop.xlane.xlu1 %1087 }
 0x425   : > { %v1085_v57 = vpop.xlane.xlu0 %1084  ;;  %v1092_v61 = vsub.f32 %v1075_v43, %v1088_v59 }
 0x426   : > { %v1091_v58 = vsub.f32 %v1074_v44, %v1085_v57 }
 0x427   : > { %v1099_v62 = vmul.f32 1.442695, %v1092_v61 }
 0x428   : > { %v1097_v60 = vmul.f32 1.442695, %v1091_v58 }
 0x42a   : > { %4055 = vpow2.f32 %v1097_v60 }
 0x42b   : > { %v4052_v53 = vpop.eup %4051  ;;  %4057 = vpow2.f32 %v1099_v62 }
 0x42c   : > { %v4054_v54 = vpop.eup %4053  ;;  %v1104_v55 = vsel %vm1076_vm5, %v4052_v53, 0.0 }
 0x42d   : > { %1105 = vadd.xlane.f32.xlu1 %v1104_v55  ;;  %v1101_v56 = vsel %vm1076_vm5, %v4054_v54, 0.0 }
 0x42e   : > { %1102 = vadd.xlane.f32.xlu0 %v1101_v56 }
 0x434   : > { %v4056_v63 = vpop.eup %4055 }
 0x435   : > { %v1107_v0 = vsel %vm1076_vm5, %v4056_v63, 0.0  ;;  %v4058_v1 = vpop.eup %4057 }
 0x436   : > { %v1110_v2 = vsel %vm1076_vm5, %v4058_v1, 0.0 }
 0x43e   : > { %3979 = vrot.lane.b32.xlu1 %v4388_v16, %s4159_s18 }
 0x442   : > { %3984 = vrot.lane.b32.xlu1 %v4379_v12, %s4160_s2 }
 0x444   : > { %3974 = vrot.lane.b32.xlu0 %v4379_v12, %s4159_s18 }
 0x446   : > { %3989 = vrot.lane.b32.xlu1 %v4388_v16, %s4160_s2  ;;  %s4759_s2 = scalar_lea.vmem %s4730_s8, %s4264_s20 }
 0x463   : > { %1108 = vadd.xlane.f32.xlu0 %v1107_v0 }
 0x46a   : > { %1111 = vadd.xlane.f32.xlu1 %v1110_v2 }
 0x479   : > { %1295 = vrot.lane.b32.xlu0 %v4373_v10, %s4161_s23 }
 0x47b   : > { %1297 = vrot.lane.b32.xlu1 %v4371_v8, %s4161_s23 }
 0x47d   : > { %1386 = vrot.lane.b32.xlu0 %v4383_v15, %s4161_s23 }
 0x47f   : > { %1388 = vrot.lane.b32.xlu1 %v4381_v13, %s4161_s23 }
 0x4ba   : > { %v1106_v4 = vpop.xlane.xlu1 %1105 }
 0x4bb   : > { %4059 = vrcp.f32 %v1106_v4  ;;  %v1103_v5 = vpop.xlane.xlu0 %1102 }
 0x4bc   : > { %4061 = vrcp.f32 %v1103_v5 }
 0x4be   : > { %v3980_v9 = vpop.permute.xlu1 %3979 }
 0x4bf   : > { %v3975_v11 = vpop.permute.xlu0 %3974  ;;  %v3982_v14 = vunpack.i.h.bf16 %v3980_v9  ;;  %v3981_v17 = vunpack.i.l.bf16 %v3980_v9 }
 0x4c0   : > { %v3977_v18 = vunpack.i.h.bf16 %v3975_v11  ;;  %v3976_v19 = vunpack.i.l.bf16 %v3975_v11 }
 0x4c1   : > { %v3825_v25 = vpack.c.bf16 %v3982_v14, %v3981_v17 }
 0x4c2   : > { %v3821_v21 = vpack.c.bf16 %v3977_v18, %v3976_v19  ;;  %v3985_v22 = vpop.permute.xlu1 %3984 }
 0x4c3   : > { %v3987_v23 = vunpack.i.h.bf16 %v3985_v22  ;;  %v3986_v24 = vunpack.i.l.bf16 %v3985_v22 }
 0x4c4   : > { %3822 = vmatprep.subr.bf16.mxu1 %v3821_v21 }
 0x4c5   : > { %v4060_v26 = vpop.eup %4059  ;;  %3824 = vmatpush3.bf16.msra.mxu1 %v3821_v21  ;;  %v3829_v27 = vpack.c.bf16 %v3987_v23, %v3986_v24 }
 0x4c6   : > { %v4062_v29 = vpop.eup %4061  ;;  %v3990_v31 = vpop.permute.xlu1 %3989  ;;  %3826 = vmatprep.subr.bf16.mxu1 %v3825_v25  ;;  %v1118_v35 = vmul.f32 %v4060_v26, %v4052_v53 }
 0x4c7   : > { %v3992_v32 = vunpack.i.h.bf16 %v3990_v31  ;;  %v3991_v33 = vunpack.i.l.bf16 %v3990_v31  ;;  %3831 = vmatprep.subr.msk.bf16.mxu0 %vm4393_vm4, %v3829_v27  ;;  %v1117_v34 = vmul.f32 %v4062_v29, %v4054_v54 }
 0x4c8   : > { %3834 = vmatpush3.bf16.xpose.msk.msra.mxu0 %vm4393_vm4, %v3829_v27 }
 0x4c9   : > { %v3835_v36 = vpack.c.bf16 %v3992_v32, %v3991_v33  ;;  %3633 = vmatprep.mubr.msk.f32.mxu1 %vm1076_vm5, %v1117_v34 }
 0x4ca   : > { %3634 = vmatmul.mubr.msk.f32.vlgmr.msra.gmra.mrb[8].mxu1 %vm1076_vm5, %v1118_v35 }
 0x4cb   : > { %3828 = vmatpush3.bf16.msra.mxu1 %v3825_v25 }
 0x4cc   : > { %3837 = vmatprep.subr.msk.bf16.mxu1 %vm4393_vm4, %v3835_v36 }
 0x4f0   : > { %v1109_v37 = vpop.xlane.xlu0 %1108 }
 0x4f1   : > { %4063 = vrcp.f32 %v1109_v37 }
 0x4f4   : > { %v1296_v38 = vpop.permute.xlu0 %1295 }
 0x4f5   : > { %3647 = vmatprep.mubr.msk.f32.mxu0 %vm889_vm3, %v1296_v38 }
 0x4f7   : > { %v1112_v39 = vpop.xlane.xlu1 %1111 }
 0x4f8   : > { %4065 = vrcp.f32 %v1112_v39  ;;  %v1387_v45 = vpop.permute.xlu0 %1386 }
 0x4fb   : > { %v4064_v40 = vpop.eup %4063  ;;  %v1298_v41 = vpop.permute.xlu1 %1297 }
 0x4fc   : > { %3648 = vmatmul.mubr.msk.f32.vlgmr.msra.gmra.mrb[0].mxu0 %vm889_vm3, %v1298_v41  ;;  %v1119_v42 = vmul.f32 %v4064_v40, %v4056_v63 }
 0x4fe   : > { %3640 = vmatprep.mubr.msk.f32.mxu1 %vm1076_vm5, %v1119_v42 }
 0x4ff   : > { %v1389_v46 = vpop.permute.xlu1 %1388 }
 0x502   : > { %v4066_v43 = vpop.eup %4065 }
 0x503   : > { %v1120_v44 = vmul.f32 %v4066_v43, %v4058_v1 }
 0x505   : > { %3641 = vmatmul.mubr.msk.f32.vlgmr.msra.gmra.mrb[10].mxu1 %vm1076_vm5, %v1120_v44 }
 0x506   : > { %3840 = vmatpush3.bf16.xpose.msk.msra.mxu1 %vm4393_vm4, %v3835_v36  ;;  %3654 = vmatprep.mubr.msk.f32.mxu1 %vm889_vm3, %v1387_v45 }
 0x50d   : > { %3655 = vmatmul.mubr.msk.f32.vlgmr.msra.gmra.mrb[12].mxu1 %vm889_vm3, %v1389_v46 }
 0x59d   : > { %v4457_v47 = vpop.f32.mrb[8].mxu1 }
 0x59e   : > { %v4459_v48 = vpop.f32.mrb[9].mxu1 }
 0x5cf   : > { %v3649_v49 = vpop.f32.mrb[0].mxu0 }
 0x5d0   : > { %v1478_v50 = vmul.f32 0.35355338, %v3649_v49  ;;  %v1377_v51 = vpop.f32.mrb[1].mxu0 }
 0x5d1   : > { %v1477_v52 = vmul.f32 0.35355338, %v1377_v51 }
 0x5d2   : > { %v1482_v53 = vadd.f32 %v1478_v50, %v4419_v30 }
 0x5d3   : > { %v1481_v54 = vadd.f32 %v1477_v52, %v4419_v30 }
 0x5d4   : > { %v1488_v55 = vsel %vm1076_vm5, %v1482_v53, -inf }
 0x5d5   : > { %1489 = vmax.xlane.f32.xlu1 %v1488_v55  ;;  %v1485_v56 = vsel %vm1076_vm5, %v1481_v54, -inf }
 0x5d6   : > { %1486 = vmax.xlane.f32.xlu0 %v1485_v56 }
 0x5d8   : > { %v4465_v57 = vpop.f32.mrb[10].mxu1 }
 0x5d9   : > { %v4467_v58 = vpop.f32.mrb[11].mxu1 }
 0x5e0   : > { %v3656_v59 = vpop.f32.mrb[12].mxu1 }
 0x5e1   : > { %v1468_v60 = vpop.f32.mrb[13].mxu1  ;;  %v1480_v61 = vmul.f32 0.35355338, %v3656_v59 }
 0x5e2   : > { %v1479_v62 = vmul.f32 0.35355338, %v1468_v60 }
 0x5e3   : > { %v1484_v1 = vadd.f32 %v1480_v61, %v4419_v30 }
 0x5e4   : > { %v1483_v63 = vadd.f32 %v1479_v62, %v4419_v30 }
 0x5e5   : > { %v1494_v2 = vsel %vm1076_vm5, %v1484_v1, -inf }
 0x5e6   : > { %v1491_v0 = vsel %vm1076_vm5, %v1483_v63, -inf }
 0x5e7   : > { %1492 = vmax.xlane.f32.xlu0 %v1491_v0 }
 0x5eb   : > { %1495 = vmax.xlane.f32.xlu0 %v1494_v2 }
 0x662   : > { %v1490_v4 = vpop.xlane.xlu1 %1489 }
 0x663   : > { %v1498_v5 = vsub.f32 %v1482_v53, %v1490_v4  ;;  %v1487_v9 = vpop.xlane.xlu0 %1486 }
 0x664   : > { %v1497_v11 = vsub.f32 %v1481_v54, %v1487_v9 }
 0x665   : > { %v1503_v14 = vmul.f32 1.442695, %v1498_v5 }
 0x666   : > { %v1501_v17 = vmul.f32 1.442695, %v1497_v11 }
 0x667   : > { %4067 = vpow2.f32 %v1503_v14 }
 0x668   : > { %4069 = vpow2.f32 %v1501_v17 }
 0x671   : > { %v4068_v18 = vpop.eup %4067 }
 0x672   : > { %v4070_v19 = vpop.eup %4069  ;;  %v1512_v21 = vsel %vm1076_vm5, %v4068_v18, 0.0 }
 0x673   : > { %1513 = vadd.xlane.f32.xlu1 %v1512_v21  ;;  %v1509_v22 = vsel %vm1076_vm5, %v4070_v19, 0.0 }
 0x674   : > { %1510 = vadd.xlane.f32.xlu0 %v1509_v22  ;;  %v1493_v23 = vpop.xlane.xlu0 %1492 }
 0x675   : > { %v1499_v24 = vsub.f32 %v1483_v63, %v1493_v23 }
 0x677   : > { %v1505_v25 = vmul.f32 1.442695, %v1499_v24 }
 0x678   : > { %v1496_v26 = vpop.xlane.xlu0 %1495 }
 0x679   : > { %v1500_v27 = vsub.f32 %v1484_v1, %v1496_v26  ;;  %4071 = vpow2.f32 %v1505_v25 }
 0x67b   : > { %v1507_v29 = vmul.f32 1.442695, %v1500_v27 }
 0x67d   : > { %4073 = vpow2.f32 %v1507_v29 }
 0x683   : > { %v4072_v31 = vpop.eup %4071 }
 0x684   : > { %3999 = vrot.lane.b32.xlu1 %v4388_v16, %s4162_s24  ;;  %v1515_v32 = vsel %vm1076_vm5, %v4072_v31, 0.0 }
 0x687   : > { %v4074_v33 = vpop.eup %4073 }
 0x688   : > { %4004 = vrot.lane.b32.xlu1 %v4379_v12, %s4163_s25  ;;  %v1518_v34 = vsel %vm1076_vm5, %v4074_v33, 0.0 }
 0x68a   : > { %3994 = vrot.lane.b32.xlu0 %v4379_v12, %s4162_s24 }
 0x68c   : > { %4009 = vrot.lane.b32.xlu1 %v4388_v16, %s4163_s25 }
 0x6a9   : > { %1516 = vadd.xlane.f32.xlu0 %v1515_v32 }
 0x6b0   : > { %1519 = vadd.xlane.f32.xlu1 %v1518_v34 }
 0x6bf   : > { %1703 = vrot.lane.b32.xlu0 %v4373_v10, %s4164_s29 }
 0x6c1   : > { %1705 = vrot.lane.b32.xlu1 %v4371_v8, %s4164_s29 }
 0x6c3   : > { %1794 = vrot.lane.b32.xlu0 %v4383_v15, %s4164_s29 }
 0x6c5   : > { %1796 = vrot.lane.b32.xlu1 %v4381_v13, %s4164_s29 }
 0x700   : > { %v1514_v35 = vpop.xlane.xlu1 %1513 }
 0x701   : > { %4075 = vrcp.f32 %v1514_v35  ;;  %v1511_v36 = vpop.xlane.xlu0 %1510 }
 0x702   : > { %4077 = vrcp.f32 %v1511_v36 }
 0x704   : > { %v4000_v37 = vpop.permute.xlu1 %3999 }
 0x705   : > { %v4002_v38 = vunpack.i.h.bf16 %v4000_v37  ;;  %v4001_v39 = vunpack.i.l.bf16 %v4000_v37  ;;  %v3995_v40 = vpop.permute.xlu0 %3994 }
 0x706   : > { %v3997_v41 = vunpack.i.h.bf16 %v3995_v40  ;;  %v3996_v42 = vunpack.i.l.bf16 %v3995_v40 }
 0x707   : > { %v3845_v43 = vpack.c.bf16 %v4002_v38, %v4001_v39 }
 0x708   : > { %v3841_v44 = vpack.c.bf16 %v3997_v41, %v3996_v42  ;;  %v4005_v45 = vpop.permute.xlu1 %4004 }
 0x709   : > { %v4007_v46 = vunpack.i.h.bf16 %v4005_v45  ;;  %v4006_v49 = vunpack.i.l.bf16 %v4005_v45  ;;  %3846 = vmatprep.subr.bf16.mxu1 %v3845_v43 }
 0x70a   : > { %3842 = vmatprep.subr.bf16.mxu0 %v3841_v44  ;;  %3848 = vmatpush3.bf16.msra.mxu1 %v3845_v43 }
 0x70b   : > { %v4076_v50 = vpop.eup %4075  ;;  %v3849_v51 = vpack.c.bf16 %v4007_v46, %v4006_v49  ;;  %3844 = vmatpush3.bf16.msra.mxu0 %v3841_v44 }
 0x70c   : > { %v4078_v52 = vpop.eup %4077  ;;  %v4010_v53 = vpop.permute.xlu1 %4009  ;;  %v1526_v59 = vmul.f32 %v4076_v50, %v4068_v18 }
 0x70d   : > { %v4012_v54 = vunpack.i.h.bf16 %v4010_v53  ;;  %v4011_v55 = vunpack.i.l.bf16 %v4010_v53  ;;  %3851 = vmatprep.subr.msk.bf16.mxu0 %vm4393_vm4, %v3849_v51  ;;  %v1525_v56 = vmul.f32 %v4078_v52, %v4070_v19 }
 0x70f   : > { %v3855_v60 = vpack.c.bf16 %v4012_v54, %v4011_v55  ;;  %3661 = vmatprep.mubr.msk.f32.mxu0 %vm1076_vm5, %v1525_v56 }
 0x710   : > { %3662 = vmatmul.mubr.msk.f32.vlgmr.msra.gmra.mrb[2].mxu0 %vm1076_vm5, %v1526_v59 }
 0x711   : > { %3857 = vmatprep.subr.msk.bf16.mxu1 %vm4393_vm4, %v3855_v60 }
 0x714   : > { %3854 = vmatpush3.bf16.xpose.msk.msra.mxu0 %vm4393_vm4, %v3849_v51 }
 0x736   : > { %v1517_v61 = vpop.xlane.xlu0 %1516 }
 0x737   : > { %4079 = vrcp.f32 %v1517_v61 }
 0x73a   : > { %v1704_v62 = vpop.permute.xlu0 %1703 }
 0x73b   : > { %3675 = vmatprep.mubr.msk.f32.mxu0 %vm889_vm3, %v1704_v62 }
 0x73d   : > { %v1520_v63 = vpop.xlane.xlu1 %1519 }
 0x73e   : > { %4081 = vrcp.f32 %v1520_v63  ;;  %v1795_v9 = vpop.permute.xlu0 %1794 }
 0x741   : > { %v4080_v0 = vpop.eup %4079  ;;  %v1706_v1 = vpop.permute.xlu1 %1705 }
 0x742   : > { %3676 = vmatmul.mubr.msk.f32.vlgmr.msra.gmra.mrb[4].mxu0 %vm889_vm3, %v1706_v1  ;;  %v1527_v2 = vmul.f32 %v4080_v0, %v4072_v31 }
 0x744   : > { %3668 = vmatprep.mubr.msk.f32.mxu1 %vm1076_vm5, %v1527_v2 }
 0x745   : > { %v1797_v11 = vpop.permute.xlu1 %1796 }
 0x748   : > { %v4082_v4 = vpop.eup %4081 }
 0x749   : > { %v1528_v5 = vmul.f32 %v4082_v4, %v4074_v33 }
 0x74b   : > { %3669 = vmatmul.mubr.msk.f32.vlgmr.msra.gmra.mrb[14].mxu1 %vm1076_vm5, %v1528_v5 }
 0x74c   : > { %3860 = vmatpush3.bf16.xpose.msk.msra.mxu1 %vm4393_vm4, %v3855_v60  ;;  %3682 = vmatprep.mubr.msk.f32.mxu1 %vm889_vm3, %v1795_v9 }
 0x753   : > { %3683 = vmatmul.mubr.msk.f32.vlgmr.msra.gmra.mrb[16].mxu1 %vm889_vm3, %v1797_v11 }
 0x7e3   : > { %v4501_v14 = vpop.f32.mrb[2].mxu0 }
 0x7e4   : > { %v4503_v17 = vpop.f32.mrb[3].mxu0 }
 0x815   : > { %v3677_v18 = vpop.f32.mrb[4].mxu0 }
 0x816   : > { %v1886_v19 = vmul.f32 0.35355338, %v3677_v18  ;;  %v1785_v21 = vpop.f32.mrb[5].mxu0 }
 0x817   : > { %v1885_v22 = vmul.f32 0.35355338, %v1785_v21 }
 0x818   : > { %v1890_v23 = vadd.f32 %v1886_v19, %v4419_v30 }
 0x819   : > { %v1889_v24 = vadd.f32 %v1885_v22, %v4419_v30 }
 0x81a   : > { %v1896_v25 = vsel %vm1076_vm5, %v1890_v23, -inf }
 0x81b   : > { %1897 = vmax.xlane.f32.xlu1 %v1896_v25  ;;  %v1893_v26 = vsel %vm1076_vm5, %v1889_v24, -inf }
 0x81c   : > { %1894 = vmax.xlane.f32.xlu0 %v1893_v26 }
 0x81e   : > { %v4509_v27 = vpop.f32.mrb[14].mxu1 }
 0x81f   : > { %v4511_v29 = vpop.f32.mrb[15].mxu1 }
 0x826   : > { %v3684_v31 = vpop.f32.mrb[16].mxu1 }
 0x827   : > { %v1876_v32 = vpop.f32.mrb[17].mxu1  ;;  %v1888_v33 = vmul.f32 0.35355338, %v3684_v31 }
 0x828   : > { %v1887_v34 = vmul.f32 0.35355338, %v1876_v32 }
 0x829   : > { %v1892_v37 = vadd.f32 %v1888_v33, %v4419_v30 }
 0x82a   : > { %v1891_v35 = vadd.f32 %v1887_v34, %v4419_v30 }
 0x82b   : > { %v1902_v38 = vsel %vm1076_vm5, %v1892_v37, -inf }
 0x82c   : > { %v1899_v36 = vsel %vm1076_vm5, %v1891_v35, -inf }
 0x82d   : > { %1900 = vmax.xlane.f32.xlu0 %v1899_v36 }
 0x831   : > { %1903 = vmax.xlane.f32.xlu0 %v1902_v38 }
 0x8a8   : > { %v1898_v39 = vpop.xlane.xlu1 %1897 }
 0x8a9   : > { %v1906_v40 = vsub.f32 %v1890_v23, %v1898_v39  ;;  %v1895_v41 = vpop.xlane.xlu0 %1894 }
 0x8aa   : > { %v1905_v42 = vsub.f32 %v1889_v24, %v1895_v41 }
 0x8ab   : > { %v1911_v43 = vmul.f32 1.442695, %v1906_v40 }
 0x8ac   : > { %v1909_v44 = vmul.f32 1.442695, %v1905_v42 }
 0x8ad   : > { %4083 = vpow2.f32 %v1911_v43 }
 0x8ae   : > { %4085 = vpow2.f32 %v1909_v44 }
 0x8b7   : > { %v4084_v45 = vpop.eup %4083 }
 0x8b8   : > { %v4086_v46 = vpop.eup %4085  ;;  %v1920_v49 = vsel %vm1076_vm5, %v4084_v45, 0.0 }
 0x8b9   : > { %1921 = vadd.xlane.f32.xlu1 %v1920_v49  ;;  %v1917_v50 = vsel %vm1076_vm5, %v4086_v46, 0.0 }
 0x8ba   : > { %1918 = vadd.xlane.f32.xlu0 %v1917_v50  ;;  %v1901_v51 = vpop.xlane.xlu0 %1900 }
 0x8bb   : > { %v1907_v52 = vsub.f32 %v1891_v35, %v1901_v51 }
 0x8bd   : > { %v1913_v53 = vmul.f32 1.442695, %v1907_v52 }
 0x8be   : > { %v1904_v54 = vpop.xlane.xlu0 %1903 }
 0x8bf   : > { %v1908_v55 = vsub.f32 %v1892_v37, %v1904_v54  ;;  %4087 = vpow2.f32 %v1913_v53 }
 0x8c1   : > { %v1915_v56 = vmul.f32 1.442695, %v1908_v55 }
 0x8c3   : > { %4089 = vpow2.f32 %v1915_v56 }
 0x8c9   : > { %v4088_v59 = vpop.eup %4087 }
 0x8ca   : > { %4019 = vrot.lane.b32.xlu1 %v4388_v16, %s4165_s28  ;;  %v1923_v60 = vsel %vm1076_vm5, %v4088_v59, 0.0 }
 0x8cd   : > { %v4090_v61 = vpop.eup %4089 }
 0x8ce   : > { %4024 = vrot.lane.b32.xlu1 %v4379_v12, %s4166_s4  ;;  %v1926_v62 = vsel %vm1076_vm5, %v4090_v61, 0.0 }
 0x8d0   : > { %4014 = vrot.lane.b32.xlu0 %v4379_v12, %s4165_s28 }
 0x8d2   : > { %4029 = vrot.lane.b32.xlu1 %v4388_v16, %s4166_s4  ;;  %s4761_s4 = sld [smem:[#allocation5_spill]] (!%p3476_p5) }
 0x8ef   : > { %1924 = vadd.xlane.f32.xlu0 %v1923_v60 }
 0x8f6   : > { %1927 = vadd.xlane.f32.xlu1 %v1926_v62 }
 0x905   : > { %2111 = vrot.lane.b32.xlu0 %v4373_v10, %s4167_s30 }
 0x907   : > { %2113 = vrot.lane.b32.xlu1 %v4371_v8, %s4167_s30 }
 0x909   : > { %2202 = vrot.lane.b32.xlu0 %v4383_v15, %s4167_s30 }
 0x90b   : > { %2204 = vrot.lane.b32.xlu1 %v4381_v13, %s4167_s30 }
 0x946   : > { %v1922_v63 = vpop.xlane.xlu1 %1921 }
 0x947   : > { %4091 = vrcp.f32 %v1922_v63  ;;  %v1919_v0 = vpop.xlane.xlu0 %1918 }
 0x948   : > { %4093 = vrcp.f32 %v1919_v0 }
 0x94a   : > { %v4020_v1 = vpop.permute.xlu1 %4019 }
 0x94b   : > { %v4022_v2 = vunpack.i.h.bf16 %v4020_v1  ;;  %v4021_v4 = vunpack.i.l.bf16 %v4020_v1  ;;  %v4015_v5 = vpop.permute.xlu0 %4014 }
 0x94c   : > { %v4017_v9 = vunpack.i.h.bf16 %v4015_v5  ;;  %v4016_v11 = vunpack.i.l.bf16 %v4015_v5 }
 0x94d   : > { %v3865_v18 = vpack.c.bf16 %v4022_v2, %v4021_v4 }
 0x94e   : > { %v3861_v19 = vpack.c.bf16 %v4017_v9, %v4016_v11  ;;  %v4025_v21 = vpop.permute.xlu1 %4024 }
 0x94f   : > { %v4027_v10 = vunpack.i.h.bf16 %v4025_v21  ;;  %v4026_v22 = vunpack.i.l.bf16 %v4025_v21  ;;  %3866 = vmatprep.subr.bf16.mxu1 %v3865_v18 }
 0x950   : > { %3862 = vmatprep.subr.bf16.mxu0 %v3861_v19  ;;  %3868 = vmatpush3.bf16.msra.mxu1 %v3865_v18 }
 0x951   : > { %v4092_v8 = vpop.eup %4091  ;;  %v3869_v13 = vpack.c.bf16 %v4027_v10, %v4026_v22  ;;  %3864 = vmatpush3.bf16.msra.mxu0 %v3861_v19 }
 0x952   : > { %v4094_v15 = vpop.eup %4093  ;;  %v4030_v23 = vpop.permute.xlu1 %4029  ;;  %v1934_v31 = vmul.f32 %v4092_v8, %v4084_v45 }
 0x953   : > { %v4032_v24 = vunpack.i.h.bf16 %v4030_v23  ;;  %v4031_v25 = vunpack.i.l.bf16 %v4030_v23  ;;  %3871 = vmatprep.subr.msk.bf16.mxu0 %vm4393_vm4, %v3869_v13  ;;  %v1933_v26 = vmul.f32 %v4094_v15, %v4086_v46 }
 0x955   : > { %v3875_v32 = vpack.c.bf16 %v4032_v24, %v4031_v25  ;;  %3689 = vmatprep.mubr.msk.f32.mxu0 %vm1076_vm5, %v1933_v26 }
 0x956   : > { %3690 = vmatmul.mubr.msk.f32.vlgmr.msra.gmra.mrb[6].mxu0 %vm1076_vm5, %v1934_v31 }
 0x957   : > { %3877 = vmatprep.subr.msk.bf16.mxu1 %vm4393_vm4, %v3875_v32 }
 0x95a   : > { %3874 = vmatpush3.bf16.xpose.msk.msra.mxu0 %vm4393_vm4, %v3869_v13 }
 0x97c   : > { %v1925_v33 = vpop.xlane.xlu0 %1924 }
 0x97d   : > { %4095 = vrcp.f32 %v1925_v33 }
 0x980   : > { %v2112_v34 = vpop.permute.xlu0 %2111 }
 0x981   : > { %3703 = vmatprep.mubr.msk.f32.mxu0 %vm889_vm3, %v2112_v34 }
 0x983   : > { %v1928_v35 = vpop.xlane.xlu1 %1927 }
 0x984   : > { %4097 = vrcp.f32 %v1928_v35  ;;  %v2203_v41 = vpop.permute.xlu0 %2202 }
 0x987   : > { %v4096_v36 = vpop.eup %4095  ;;  %v2114_v37 = vpop.permute.xlu1 %2113 }
 0x988   : > { %3704 = vmatmul.mubr.msk.f32.vlgmr.msra.gmra.mrb[8].mxu0 %vm889_vm3, %v2114_v37  ;;  %v1935_v38 = vmul.f32 %v4096_v36, %v4088_v59 }
 0x98a   : > { %3696 = vmatprep.mubr.msk.f32.mxu1 %vm1076_vm5, %v1935_v38 }
 0x98b   : > { %v2205_v42 = vpop.permute.xlu1 %2204 }
 0x98e   : > { %v4098_v39 = vpop.eup %4097 }
 0x98f   : > { %v1936_v40 = vmul.f32 %v4098_v39, %v4090_v61 }
 0x991   : > { %3697 = vmatmul.mubr.msk.f32.vlgmr.msra.gmra.mrb[18].mxu1 %vm1076_vm5, %v1936_v40 }
 0x992   : > { %3880 = vmatpush3.bf16.xpose.msk.msra.mxu1 %vm4393_vm4, %v3875_v32  ;;  %3710 = vmatprep.mubr.msk.f32.mxu1 %vm889_vm3, %v2203_v41 }
 0x999   : > { %3711 = vmatmul.mubr.msk.f32.vlgmr.msra.gmra.mrb[20].mxu1 %vm889_vm3, %v2205_v42 }
 0xa29   : > { %v3691_v43 = vpop.f32.mrb[6].mxu0 }
 0xa2a   : > { %v2015_v44 = vpop.f32.mrb[7].mxu0 }
 0xa5b   : > { %v3705_v45 = vpop.f32.mrb[8].mxu0 }
 0xa5c   : > { %v2294_v46 = vmul.f32 0.35355338, %v3705_v45  ;;  %v2193_v49 = vpop.f32.mrb[9].mxu0 }
 0xa5d   : > { %v2293_v50 = vmul.f32 0.35355338, %v2193_v49 }
 0xa5e   : > { %v2298_v51 = vadd.f32 %v2294_v46, %v4419_v30 }
 0xa5f   : > { %v2297_v52 = vadd.f32 %v2293_v50, %v4419_v30 }
 0xa60   : > { %v2304_v53 = vsel %vm1076_vm5, %v2298_v51, -inf }
 0xa61   : > { %2305 = vmax.xlane.f32.xlu1 %v2304_v53  ;;  %v2301_v20 = vsel %vm1076_vm5, %v2297_v52, -inf  ;;  %v2582_v53 = vld [vmem:[%s4291_s1 + $0x10] sm:$0xff] }
 0xa62   : > { %2302 = vmax.xlane.f32.xlu0 %v2301_v20 }
 0xa64   : > { %v4549_v54 = vpop.f32.mrb[18].mxu1 }
 0xa65   : > { %v4551_v55 = vpop.f32.mrb[19].mxu1 }
 0xa6c   : > { %v3712_v56 = vpop.f32.mrb[20].mxu1 }
 0xa6d   : > { %v2284_v59 = vpop.f32.mrb[21].mxu1  ;;  %v2296_v60 = vmul.f32 0.35355338, %v3712_v56  ;;  %v2583_v56 = vld [vmem:[%s4291_s1 + $0x18] sm:$0xff] }
 0xa6e   : > { %v2295_v61 = vmul.f32 0.35355338, %v2284_v59  ;;  %v3893_v59 = vpack.c.bf16 %v2583_v56, %v2582_v53 }
 0xa6f   : > { %v2300_v0 = vadd.f32 %v2296_v60, %v4419_v30 }
 0xa70   : > { %v2299_v62 = vadd.f32 %v2295_v61, %v4419_v30 }
 0xa71   : > { %v2310_v1 = vsel %vm1076_vm5, %v2300_v0, -inf }
 0xa72   : > { %v2307_v63 = vsel %vm1076_vm5, %v2299_v62, -inf }
 0xa73   : > { %2308 = vmax.xlane.f32.xlu0 %v2307_v63 }
 0xa77   : > { %2311 = vmax.xlane.f32.xlu0 %v2310_v1 }
 0xaee   : > { %v2306_v2 = vpop.xlane.xlu1 %2305 }
 0xaef   : > { %v2314_v4 = vsub.f32 %v2298_v51, %v2306_v2  ;;  %v2303_v5 = vpop.xlane.xlu0 %2302  ;;  %v2580_v51 = vld [vmem:[%s4291_s1] sm:$0xff] }
 0xaf0   : > { %v2313_v9 = vsub.f32 %v2297_v52, %v2303_v5  ;;  %v2581_v52 = vld [vmem:[%s4291_s1 + $0x8] sm:$0xff] }
 0xaf1   : > { %v2319_v11 = vmul.f32 1.442695, %v2314_v4  ;;  %v3889_v20 = vpack.c.bf16 %v2581_v52, %v2580_v51 }
 0xaf2   : > { %v2317_v18 = vmul.f32 1.442695, %v2313_v9 }
 0xaf3   : > { %4099 = vpow2.f32 %v2319_v11 }
 0xaf4   : > { %4101 = vpow2.f32 %v2317_v18 }
 0xafd   : > { %v4100_v19 = vpop.eup %4099 }
 0xafe   : > { %v4102_v21 = vpop.eup %4101  ;;  %v2328_v10 = vsel %vm1076_vm5, %v4100_v19, 0.0 }
 0xaff   : > { %2329 = vadd.xlane.f32.xlu1 %v2328_v10  ;;  %v2325_v22 = vsel %vm1076_vm5, %v4102_v21, 0.0 }
 0xb00   : > { %v2309_v30 = vpop.xlane.xlu0 %2308  ;;  %2326 = vadd.xlane.f32.xlu0 %v2325_v22 }
 0xb01   : > { %v2315_v8 = vsub.f32 %v2299_v62, %v2309_v30 }
 0xb03   : > { %v2321_v13 = vmul.f32 1.442695, %v2315_v8 }
 0xb04   : > { %v2312_v15 = vpop.xlane.xlu0 %2311 }
 0xb05   : > { %4103 = vpow2.f32 %v2321_v13  ;;  %v2316_v23 = vsub.f32 %v2300_v0, %v2312_v15 }
 0xb07   : > { %v2323_v24 = vmul.f32 1.442695, %v2316_v23 }
 0xb09   : > { %4105 = vpow2.f32 %v2323_v24 }
 0xb0f   : > { %v4104_v25 = vpop.eup %4103 }
 0xb10   : > { %v2331_v26 = vsel %vm1076_vm5, %v4104_v25, 0.0 }
 0xb11   : > { %2332 = vadd.xlane.f32.xlu0 %v2331_v26 }
 0xb13   : > { %v4106_v31 = vpop.eup %4105 }
 0xb14   : > { %v2334_v32 = vsel %vm1076_vm5, %v4106_v31, 0.0 }
 0xb15   : > { %2335 = vadd.xlane.f32.xlu1 %v2334_v32 }
 0xb26   : > { %4039 = vrot.lane.b32.xlu1 %v4388_v16, %s4168_s16 }
 0xb27   : > { %4034 = vrot.lane.b32.xlu0 %v4379_v12, %s4168_s16  ;;  %s4762_s16 = sld [smem:[#allocation9_spill]] (!%p3476_p5) }
 0xb2a   : > { %2523 = vrot.lane.b32.xlu1 %v4503_v17, %s4169_s17 }
 0xb2b   : > { %2539 = vrot.lane.b32.xlu0 %v2015_v44, %s4170_s7 }
 0xb2e   : > { %2525 = vrot.lane.b32.xlu1 %v4501_v14, %s4169_s17 }
 0xb32   : > { %2541 = vrot.lane.b32.xlu1 %v3691_v43, %s4170_s7 }
 0xb8c   : > { %v2330_v35 = vpop.xlane.xlu1 %2329 }
 0xb8d   : > { %v2327_v33 = vpop.xlane.xlu0 %2326 }
 0xb8e   : > { %4107 = vrcp.f32 %v2327_v33 }
 0xb8f   : > { %4109 = vrcp.f32 %v2330_v35 }
 0xb98   : > { %v4108_v34 = vpop.eup %4107 }
 0xb99   : > { %v2341_v36 = vmul.f32 %v4108_v34, %v4102_v21  ;;  %v4110_v40 = vpop.eup %4109 }
 0xb9a   : > { %v2342_v44 = vmul.f32 %v4110_v40, %v4100_v19 }
 0xb9b   : > { %3717 = vmatprep.mubr.msk.f32.mxu0 %vm1076_vm5, %v2341_v36 }
 0xb9e   : > { %v2333_v12 = vpop.xlane.xlu0 %2332 }
 0xb9f   : > { %4111 = vrcp.f32 %v2333_v12 }
 0xba2   : > { %v2336_v16 = vpop.xlane.xlu1 %2335  ;;  %v4035_v17 = vpop.permute.xlu0 %4034 }
 0xba3   : > { %4113 = vrcp.f32 %v2336_v16  ;;  %v4037_v37 = vunpack.i.h.bf16 %v4035_v17  ;;  %v4036_v38 = vunpack.i.l.bf16 %v4035_v17 }
 0xba5   : > { %v3881_v39 = vpack.c.bf16 %v4037_v37, %v4036_v38 }
 0xba6   : > { %v4040_v14 = vpop.permute.xlu1 %4039  ;;  %v2540_v4 = vpop.permute.xlu0 %2539 }
 0xba7   : > { %v4042_v41 = vunpack.i.h.bf16 %v4040_v14  ;;  %v4041_v42 = vunpack.i.l.bf16 %v4040_v14  ;;  %3882 = vmatprep.subr.bf16.mxu0 %v3881_v39 }
 0xba8   : > { %3884 = vmatpush3.bf16.msra.mxu0 %v3881_v39 }
 0xba9   : > { %v4112_v43 = vpop.eup %4111  ;;  %v3885_v45 = vpack.c.bf16 %v4042_v41, %v4041_v42  ;;  %3890 = vmatprep.subr.bf16.mxu0 %v3889_v20 }
 0xbaa   : > { %v2343_v46 = vmul.f32 %v4112_v43, %v4104_v25  ;;  %v2524_v0 = vpop.permute.xlu1 %2523 }
 0xbab   : > { %3718 = vmatmul.mubr.msk.f32.vlgmr.msra.gmra.mrb[10].mxu0 %vm1076_vm5, %v2342_v44  ;;  %3886 = vmatprep.subr.bf16.mxu1 %v3885_v45  ;;  %v2567_v5 = vsel %vm889_vm3, %v4459_v48, %v2524_v0  ;;  %v2768_v0 = vld [vmem:[%s4308_s22 + $0x10] sm:$0xff] }
 0xbac   : > { %3888 = vmatpush3.bf16.msra.mxu1 %v3885_v45  ;;  %3724 = vmatprep.mubr.msk.f32.mxu1 %vm1076_vm5, %v2343_v46  ;;  %v2571_v9 = vsel %vm1076_vm5, %v2567_v5, %v2540_v4 }
 0xbad   : > { %v4114_v49 = vpop.eup %4113  ;;  %3892 = vmatpush3.bf16.msra.mxu0 %v3889_v20 }
 0xbae   : > { %v2344_v50 = vmul.f32 %v4114_v49, %v4106_v31  ;;  %3894 = vmatprep.subr.bf16.mxu0 %v3893_v59  ;;  %v2526_v1 = vpop.permute.xlu1 %2525 }
 0xbb0   : > { %3725 = vmatmul.mubr.msk.f32.vlgmr.msra.gmra.mrb[22].mxu1 %vm1076_vm5, %v2344_v50 }
 0xbb1   : > { %3896 = vmatpush3.bf16.msra.mxu0 %v3893_v59 }
 0xbb2   : > { %v2542_v2 = vpop.permute.xlu1 %2541 }
 0xc7e   : > { %v3719_v60 = vpop.f32.mrb[10].mxu0 }
 0xc7f   : > { %2557 = vrot.lane.b32.xlu1 %v3719_v60, %s4171_s21  ;;  %v2423_v61 = vpop.f32.mrb[11].mxu0 }
 0xc80   : > { %2555 = vrot.lane.b32.xlu0 %v2423_v61, %s4171_s21  ;;  %v2766_v61 = vld [vmem:[%s4308_s22] sm:$0xff] }
 0xc83   : > { %v3726_v62 = vpop.f32.mrb[22].mxu1  ;;  %2529 = vrot.lane.b32.xlu1 %v4509_v27, %s4169_s17 }
 0xc84   : > { %v2510_v63 = vpop.f32.mrb[23].mxu1  ;;  %2527 = vrot.lane.b32.xlu0 %v4511_v29, %s4169_s17  ;;  %v2568_v29 = vsel %vm889_vm3, %v4457_v47, %v2526_v1  ;;  %v2769_v1 = vld [vmem:[%s4308_s22 + $0x18] sm:$0xff] }
 0xc85   : > { %v2572_v11 = vsel %vm1076_vm5, %v2568_v29, %v2542_v2  ;;  %v3901_v2 = vpack.c.bf16 %v2769_v1, %v2768_v0 }
 0xc87   : > { %2545 = vrot.lane.b32.xlu1 %v4549_v54, %s4170_s7 }
 0xc88   : > { %2543 = vrot.lane.b32.xlu0 %v4551_v55, %s4170_s7 }
 0xc8b   : > { %2561 = vrot.lane.b32.xlu1 %v3726_v62, %s4171_s21  ;;  %v2767_v62 = vld [vmem:[%s4308_s22 + $0x8] sm:$0xff]  ;;  %s4760_s22 = scalar_lea.vmem %s4731_s9, %s4264_s20 }
 0xc8c   : > { %2559 = vrot.lane.b32.xlu0 %v2510_v63, %s4171_s21  ;;  %v3897_v63 = vpack.c.bf16 %v2767_v62, %v2766_v61  ;;  %v2925_v61 = vld [vmem:[%s4322_s26 + $0x78] sm:$0xff] }
 0xc8e   : > { %3898 = vmatprep.subr.bf16.mxu1 %v3897_v63 }
 0xc8f   : > { %3900 = vmatpush3.bf16.msra.mxu1 %v3897_v63  ;;  %v3470_v63 = vld [vmem:[%s657_s15] ss:$0 sm:$0xff] }
 0xc90   : > { %3902 = vmatprep.subr.bf16.mxu1 %v3901_v2 }
 0xc93   : > { %3904 = vmatpush3.bf16.msra.mxu1 %v3901_v2 }
 0xcf1   : > { %v2558_v27 = vpop.permute.xlu1 %2557 }
 0xcf2   : > { %v2556_v54 = vpop.permute.xlu0 %2555  ;;  %v2577_v18 = vsel %vm2575_vm6, %v2572_v11, %v2558_v27 }
 0xcf3   : > { %v2576_v55 = vsel %vm2575_vm6, %v2571_v9, %v2556_v54 }
 0xcf4   : > { %3735 = vmatprep.mubr.msk.f32.mxu0 %vm699_vm1, %v2576_v55 }
 0xcf5   : > { %v2530_v19 = vpop.permute.xlu1 %2529  ;;  %3736 = vmatmul.mubr.msk.f32.vlgmr.msra.gmra.mrb[12].mxu0 %vm699_vm1, %v2577_v18 }
 0xcf6   : > { %v2528_v48 = vpop.permute.xlu0 %2527  ;;  %v2570_v30 = vsel %vm889_vm3, %v4465_v57, %v2530_v19 }
 0xcf7   : > { %v2569_v47 = vsel %vm889_vm3, %v4467_v58, %v2528_v48  ;;  %v3463_v58 = vld [vmem:[%s4759_s2] ss:$0 sm:$0xff] }
 0xcf8   : > { %v3468_v48 = vld [vmem:[%s4760_s22] ss:$0 sm:$0xff] }
 0xcf9   : > { %v2546_v21 = vpop.permute.xlu1 %2545 }
 0xcfa   : > { %v2544_v10 = vpop.permute.xlu0 %2543  ;;  %v2574_v15 = vsel %vm1076_vm5, %v2570_v30, %v2546_v21 }
 0xcfb   : > { %v2573_v8 = vsel %vm1076_vm5, %v2569_v47, %v2544_v10 }
 0xcfd   : > { %v2562_v22 = vpop.permute.xlu1 %2561 }
 0xcfe   : > { %v2560_v13 = vpop.permute.xlu0 %2559  ;;  %v2579_v24 = vsel %vm2575_vm6, %v2574_v15, %v2562_v22 }
 0xcff   : > { %v2578_v23 = vsel %vm2575_vm6, %v2573_v8, %v2560_v13  ;;  %v3469_v13 = vld [vmem:[%s649_s5] ss:$0 sm:$0xff] }
 0xd00   : > { %3738 = vmatprep.mubr.msk.f32.mxu0 %vm699_vm1, %v2578_v23 }
 0xd01   : > { %3739 = vmatmul.mubr.msk.f32.gmra.mrb[14].mxu0 %vm699_vm1, %v2579_v24 }
 0xdc8   : > { %v3737_v25 = vpop.f32.mrb[12].mxu0 }
 0xdc9   : > { %v4610_v57 = vadd.f32 %v3737_v25, %v3463_v58  ;;  %v2669_v26 = vpop.f32.mrb[13].mxu0 }
 0xdca   : > { %v2670_v31 = vadd.f32 %v3463_v58, %v2669_v26 }
 0xdcb   : > { %v2697_v32 = vsel %vm699_vm1, %v4610_v57, 0.0 }
 0xdcc   : > { %v4615_v33 = vadd.f32 %v2670_v31, %v4334_v6  ;;  %2698 = vadd.xlane.f32.xlu1 %v2697_v32 }
 0xdce   : > { %v2694_v34 = vsel %vm699_vm1, %v4615_v33, 0.0 }
 0xdcf   : > { %2695 = vadd.xlane.f32.xlu0 %v2694_v34 }
 0xdd4   : > { %v3740_v35 = vpop.f32.mrb[14].mxu0 }
 0xdd5   : > { %v2679_v36 = vpop.f32.mrb[15].mxu0  ;;  %v4622_v17 = vadd.f32 %v3740_v35, %v3463_v58 }
 0xdd6   : > { %v2680_v12 = vadd.f32 %v3463_v58, %v2679_v36 }
 0xdd7   : > { %v2703_v6 = vsel %vm699_vm1, %v4622_v17, 0.0 }
 0xdd8   : > { %v4620_v16 = vadd.f32 %v2680_v12, %v4336_v7 }
 0xdda   : > { %v2700_v37 = vsel %vm699_vm1, %v4620_v16, 0.0 }
 0xddb   : > { %2701 = vadd.xlane.f32.xlu0 %v2700_v37  ;;  %v2910_v37 = vld [vmem:[%s4322_s26] sm:$0xff] }
 0xddf   : > { %2704 = vadd.xlane.f32.xlu0 %v2703_v6  ;;  %v2911_v6 = vld [vmem:[%s4322_s26 + $0x8] sm:$0xff] }
 0xe59   : > { %v2699_v38 = vpop.xlane.xlu1 %2698 }
 0xe5a   : > { %v2707_v39 = vmul.f32 0.03125, %v2699_v38  ;;  %v3905_v38 = vpack.c.bf16 %v2911_v6, %v2910_v37 }
 0xe5c   : > { %v2711_v40 = vsub.f32 %v4610_v57, %v2707_v39  ;;  %v2696_v14 = vpop.xlane.xlu0 %2695  ;;  %3906 = vmatprep.subr.bf16.mxu0 %v3905_v38  ;;  %v2912_v39 = vld [vmem:[%s4322_s26 + $0x10] sm:$0xff] }
 0xe5d   : > { %v2706_v41 = vmul.f32 0.03125, %v2696_v14  ;;  %3908 = vmatpush3.bf16.msra.mxu0 %v3905_v38 }
 0xe5e   : > { %v2715_v42 = vmul.f32 %v2711_v40, %v2711_v40 }
 0xe5f   : > { %v2710_v7 = vsub.f32 %v4615_v33, %v2706_v41  ;;  %v2914_v41 = vld [vmem:[%s4322_s26 + $0x20] sm:$0xff] }
 0xe60   : > { %v2721_v43 = vsel %vm699_vm1, %v2715_v42, 0.0  ;;  %v2915_v42 = vld [vmem:[%s4322_s26 + $0x28] sm:$0xff] }
 0xe61   : > { %2722 = vadd.xlane.f32.xlu1 %v2721_v43  ;;  %v2714_v44 = vmul.f32 %v2710_v7, %v2710_v7  ;;  %v2916_v43 = vld [vmem:[%s4322_s26 + $0x30] sm:$0xff] }
 0xe63   : > { %v2718_v45 = vsel %vm699_vm1, %v2714_v44, 0.0  ;;  %v2917_v44 = vld [vmem:[%s4322_s26 + $0x38] sm:$0xff] }
 0xe64   : > { %2719 = vadd.xlane.f32.xlu0 %v2718_v45  ;;  %v3917_v45 = vpack.c.bf16 %v2917_v44, %v2916_v43 }
 0xe68   : > { %v2702_v46 = vpop.xlane.xlu0 %2701 }
 0xe69   : > { %v2708_v49 = vmul.f32 0.03125, %v2702_v46  ;;  %v2918_v46 = vld [vmem:[%s4322_s26 + $0x40] sm:$0xff] }
 0xe6b   : > { %v2712_v50 = vsub.f32 %v4620_v16, %v2708_v49  ;;  %v2919_v49 = vld [vmem:[%s4322_s26 + $0x48] sm:$0xff] }
 0xe6c   : > { %v2705_v51 = vpop.xlane.xlu0 %2704 }
 0xe6d   : > { %v2709_v52 = vmul.f32 0.03125, %v2705_v51  ;;  %v2716_v53 = vmul.f32 %v2712_v50, %v2712_v50  ;;  %v2920_v51 = vld [vmem:[%s4322_s26 + $0x50] sm:$0xff] }
 0xe6f   : > { %v2713_v20 = vsub.f32 %v4622_v17, %v2709_v52  ;;  %v2724_v56 = vsel %vm699_vm1, %v2716_v53, 0.0  ;;  %v2921_v52 = vld [vmem:[%s4322_s26 + $0x58] sm:$0xff] }
 0xe70   : > { %2725 = vadd.xlane.f32.xlu0 %v2724_v56  ;;  %v3925_v53 = vpack.c.bf16 %v2921_v52, %v2920_v51  ;;  %v2923_v56 = vld [vmem:[%s4322_s26 + $0x68] sm:$0xff] }
 0xe71   : > { %v2717_v59 = vmul.f32 %v2713_v20, %v2713_v20 }
 0xe73   : > { %v2727_v60 = vsel %vm699_vm1, %v2717_v59, 0.0 }
 0xe74   : > { %2728 = vadd.xlane.f32.xlu1 %v2727_v60  ;;  %v2924_v60 = vld [vmem:[%s4322_s26 + $0x70] sm:$0xff] }
 0xe75   : > { %v3933_v62 = vpack.c.bf16 %v2925_v61, %v2924_v60 }
 0xeee   : > { %v2723_v4 = vpop.xlane.xlu1 %2722 }
 0xeef   : > { %v2731_v5 = vmul.f32 0.03125, %v2723_v4 }
 0xef1   : > { %v2735_v27 = vadd.f32 1e-06, %v2731_v5  ;;  %v2720_v29 = vpop.xlane.xlu0 %2719 }
 0xef2   : > { %v2730_v9 = vmul.f32 0.03125, %v2720_v29 }
 0xef3   : > { %4115 = vrsqrt.f32 %v2735_v27 }
 0xef4   : > { %v2734_v54 = vadd.f32 1e-06, %v2730_v9 }
 0xef6   : > { %4117 = vrsqrt.f32 %v2734_v54 }
 0xefd   : > { %v4116_v11 = vpop.eup %4115  ;;  %v2726_v55 = vpop.xlane.xlu0 %2725 }
 0xefe   : > { %v2743_v18 = vmul.f32 %v4116_v11, %v2711_v40  ;;  %v2732_v19 = vmul.f32 0.03125, %v2726_v55  ;;  %v2913_v40 = vld [vmem:[%s4322_s26 + $0x18] sm:$0xff] }
 0xeff   : > { %v3909_v14 = vpack.c.bf16 %v2913_v40, %v2912_v39 }
 0xf00   : > { %v4118_v21 = vpop.eup %4117  ;;  %v2736_v10 = vadd.f32 1e-06, %v2732_v19  ;;  %v2753_v8 = vmul.f32 %v3468_v48, %v2743_v18 }
 0xf01   : > { %v2729_v47 = vpop.xlane.xlu1 %2728  ;;  %v2742_v22 = vmul.f32 %v4118_v21, %v2710_v7  ;;  %3910 = vmatprep.subr.bf16.mxu0 %v3909_v14  ;;  %v3913_v7 = vpack.c.bf16 %v2915_v42, %v2914_v41 }
 0xf02   : > { %4119 = vrsqrt.f32 %v2736_v10  ;;  %v2733_v30 = vmul.f32 0.03125, %v2729_v47  ;;  %v2763_v58 = vadd.f32 %v3469_v13, %v2753_v8  ;;  %3912 = vmatpush3.bf16.msra.mxu0 %v3909_v14 }
 0xf03   : > { %v2752_v15 = vmul.f32 %v3468_v48, %v2742_v22  ;;  %3914 = vmatprep.subr.bf16.mxu0 %v3913_v7 }
 0xf04   : > { %v2737_v23 = vadd.f32 1e-06, %v2733_v30 }
 0xf05   : > { %v2762_v24 = vadd.f32 %v3469_v13, %v2752_v15 }
 0xf06   : > { %4121 = vrsqrt.f32 %v2737_v23  ;;  %3916 = vmatpush3.bf16.msra.mxu0 %v3913_v7 }
 0xf07   : > { %3749 = vmatprep.mubr.msk.f32.mxu1 %vm699_vm1, %v2762_v24  ;;  %3918 = vmatprep.subr.bf16.mxu0 %v3917_v45 }
 0xf08   : > { %3750 = vmatmul.mubr.msk.f32.vlgmr.msra.gmra.mrb[24].mxu1 %vm699_vm1, %v2763_v58 }
 0xf0a   : > { %3920 = vmatpush3.bf16.msra.mxu0 %v3917_v45  ;;  %v3475_v45 = vld [vmem:[%s665_s27] ss:$0 sm:$0xff] }
 0xf0c   : > { %v4120_v25 = vpop.eup %4119 }
 0xf0d   : > { %v2744_v26 = vmul.f32 %v4120_v25, %v2712_v50  ;;  %v3921_v50 = vpack.c.bf16 %v2919_v49, %v2918_v46 }
 0xf0f   : > { %v2754_v31 = vmul.f32 %v3468_v48, %v2744_v26  ;;  %3922 = vmatprep.subr.bf16.mxu0 %v3921_v50 }
 0xf10   : > { %v4122_v32 = vpop.eup %4121  ;;  %3924 = vmatpush3.bf16.msra.mxu0 %v3921_v50 }
 0xf11   : > { %v2764_v34 = vadd.f32 %v3469_v13, %v2754_v31  ;;  %v2745_v35 = vmul.f32 %v4122_v32, %v2713_v20  ;;  %3926 = vmatprep.subr.bf16.mxu0 %v3925_v53  ;;  %v2922_v20 = vld [vmem:[%s4322_s26 + $0x60] sm:$0xff] }
 0xf12   : > { %v3929_v59 = vpack.c.bf16 %v2923_v56, %v2922_v20 }
 0xf13   : > { %3752 = vmatprep.mubr.msk.f32.mxu1 %vm699_vm1, %v2764_v34  ;;  %v2755_v36 = vmul.f32 %v3468_v48, %v2745_v35 }
 0xf14   : > { %3928 = vmatpush3.bf16.msra.mxu0 %v3925_v53 }
 0xf15   : > { %v2765_v12 = vadd.f32 %v3469_v13, %v2755_v36  ;;  %3930 = vmatprep.subr.bf16.mxu0 %v3929_v59 }
 0xf17   : > { %3753 = vmatmul.mubr.msk.f32.gmra.mrb[26].mxu1 %vm699_vm1, %v2765_v12 }
 0xf18   : > { %3932 = vmatpush3.bf16.msra.mxu0 %v3929_v59 }
 0xf19   : > { %3934 = vmatprep.subr.bf16.mxu0 %v3933_v62 }
 0xf1c   : > { %3936 = vmatpush3.bf16.msra.mxu0 %v3933_v62 }
 0xfdb   : > { %v3751_v0 = vpop.f32.mrb[24].mxu1 }
 0xfdc   : > { %v2861_v1 = vadd.f32 %v3751_v0, %v3470_v63  ;;  %v2855_v2 = vpop.f32.mrb[25].mxu1 }
 0xfdd   : > { %v2856_v4 = vadd.f32 %v3470_v63, %v2855_v2 }
 0xfde   : > { %v2875_v5 = vmul.f32 %v2861_v1, %v2861_v1 }
 0xfdf   : > { %v2874_v27 = vmul.f32 %v2856_v4, %v2856_v4 }
 0xfe0   : > { %v2879_v29 = vmul.f32 %v2875_v5, %v2861_v1 }
 0xfe1   : > { %v2878_v9 = vmul.f32 %v2874_v27, %v2856_v4 }
 0xfe2   : > { %v2883_v54 = vmul.f32 0.044715, %v2879_v29 }
 0xfe3   : > { %v2882_v11 = vmul.f32 0.044715, %v2878_v9 }
 0xfe4   : > { %v2887_v55 = vadd.f32 %v2883_v54, %v2861_v1 }
 0xfe5   : > { %v2886_v18 = vadd.f32 %v2882_v11, %v2856_v4 }
 0xfe6   : > { %v2891_v19 = vmul.f32 0.7978846, %v2887_v55 }
 0xfe7   : > { %v2890_v48 = vmul.f32 0.7978846, %v2886_v18 }
 0xfe8   : > { %4123 = vtanh.f32 %v2891_v19 }
 0xfe9   : > { %4125 = vtanh.f32 %v2890_v48 }
 0xfea   : > { %v3754_v21 = vpop.f32.mrb[26].mxu1 }
 0xfeb   : > { %v2871_v10 = vadd.f32 %v3754_v21, %v3470_v63  ;;  %v2865_v47 = vpop.f32.mrb[27].mxu1 }
 0xfec   : > { %v2866_v22 = vadd.f32 %v3470_v63, %v2865_v47 }
 0xfed   : > { %v2877_v30 = vmul.f32 %v2871_v10, %v2871_v10 }
 0xfee   : > { %v2876_v8 = vmul.f32 %v2866_v22, %v2866_v22 }
 0xfef   : > { %v2881_v13 = vmul.f32 %v2877_v30, %v2871_v10 }
 0xff0   : > { %v2880_v15 = vmul.f32 %v2876_v8, %v2866_v22 }
 0xff1   : > { %v2885_v23 = vmul.f32 0.044715, %v2881_v13 }
 0xff2   : > { %v4124_v24 = vpop.eup %4123  ;;  %v2884_v58 = vmul.f32 0.044715, %v2880_v15 }
 0xff3   : > { %v4126_v25 = vpop.eup %4125  ;;  %v2899_v26 = vadd.f32 1.0, %v4124_v24  ;;  %v2889_v31 = vadd.f32 %v2885_v23, %v2871_v10 }
 0xff4   : > { %v2888_v32 = vadd.f32 %v2884_v58, %v2866_v22  ;;  %v2898_v34 = vadd.f32 1.0, %v4126_v25 }
 0xff5   : > { %v2903_v35 = vmul.f32 0.5, %v2899_v26  ;;  %v2893_v36 = vmul.f32 0.7978846, %v2889_v31 }
 0xff6   : > { %v2892_v12 = vmul.f32 0.7978846, %v2888_v32  ;;  %v2902_v37 = vmul.f32 0.5, %v2898_v34 }
 0xff7   : > { %4127 = vtanh.f32 %v2893_v36  ;;  %v2907_v38 = vmul.f32 %v2903_v35, %v2861_v1 }
 0xff8   : > { %v2906_v6 = vmul.f32 %v2902_v37, %v2856_v4  ;;  %4129 = vtanh.f32 %v2892_v12 }
 0xffa   : > { %3787 = vmatprep.mubr.f32.mxu0 %v2906_v6 }
 0xffb   : > { %3788 = vmatmul.mubr.f32.vlgmr.msra.gmra.mrb[16].mxu0 %v2907_v38 }
0x1001   : > { %v4128_v39 = vpop.eup %4127 }
0x1002   : > { %v4130_v40 = vpop.eup %4129  ;;  %v2901_v14 = vadd.f32 1.0, %v4128_v39 }
0x1003   : > { %v2900_v41 = vadd.f32 1.0, %v4130_v40 }
0x1004   : > { %v2905_v42 = vmul.f32 0.5, %v2901_v14 }
0x1005   : > { %v2904_v7 = vmul.f32 0.5, %v2900_v41 }
0x1006   : > { %v2909_v44 = vmul.f32 %v2905_v42, %v2871_v10 }
0x1007   : > { %v2908_v43 = vmul.f32 %v2904_v7, %v2866_v22 }
0x1009   : > { %3790 = vmatprep.mubr.f32.mxu0 %v2908_v43 }
0x100a   : > { %3791 = vmatmul.mubr.f32.gmra.mrb[18].mxu0 %v2909_v44 }
0x10ce   : > { %v3789_v46 = vpop.f32.mrb[16].mxu0 }
0x10cf   : > { %v3005_v49 = vadd.f32 %v3789_v46, %v3475_v45  ;;  %v2999_v50 = vpop.f32.mrb[17].mxu0 }
0x10d0   : > { %v3000_v51 = vadd.f32 %v3475_v45, %v2999_v50 }
0x10d1   : > { %v3019_v52 = vadd.f32 %v3005_v49, %v4610_v57  ;;  %v3030_v57 = vld [vmem:[%s4761_s4] sm:$0xf] (!%p3476_p5) }
0x10d2   : > { %v3018_v53 = vadd.f32 %v3000_v51, %v4615_v33  ;;  %v3079_v0 = vmul.f32 (!%p3476_p5), %v3030_v57, %v3030_v57  ;;  %3793 = vmatprep.subr.msk.mxu0 (!%p3476_p5), %vm699_vm1, %v3030_v57  ;;  %3937 = vmatprep.subr.msk.mxu1 (!%p3476_p5), %vm699_vm1, %v3030_v57 }
0x10d3   : > { %v3032_v33 = vmul.f32 (!%p3476_p5), %v3019_v52, %v3019_v52  ;;  %3794 = vmatpush3.xpose.msk.msra.mxu0 (!%p3476_p5), %vm699_vm1, %v3030_v57  ;;  %3938 = vmatpush3.xpose.msk.msra.mxu1 (!%p3476_p5), %vm699_vm1, %v3030_v57 }
0x10d4   : > { %3022 = vst.msk [vmem:[#allocation2] sm:$0xff] %vm699_vm1, %v3018_v53  ;;  %3795 = vmatprep.mubr.msk.f32.mxu0 (!%p3476_p5), %vm699_vm1, %v3018_v53  ;;  %v3081_v1 = vsel (!%p3476_p5), %vm3080_vm7, %v3079_v0, 0.0 }
0x10d5   : > { %3082 = vadd.xlane.f32.xlu0 (!%p3476_p5), %v3081_v1 }
0x10d6   : > { %3796 = vmatmul.mubr.msk.f32.vlgmr.msra.gmra.mrb[0].mxu0 (!%p3476_p5), %vm699_vm1, %v3019_v52 }
0x10dd   : > { %v3792_v20 = vpop.f32.mrb[18].mxu0  ;;  %3029 = sbr.rel (%p3476_p5) target bundleno = 4620 (0x120c), region = 88 }
0x10de   : > { %v3015_v56 = vadd.f32 %v3792_v20, %v3475_v45  ;;  %v3009_v59 = vpop.f32.mrb[19].mxu0 }
0x10df   : > { %v3010_v60 = vadd.f32 %v3475_v45, %v3009_v59 }
0x10e0   : > { %v3021_v61 = vadd.f32 %v3015_v56, %v4622_v17  ;;  %v3038_v17 = vsel (!%p3476_p5), %vm699_vm1, %v3032_v33, 0.0 }
0x10e1   : > { %v3020_v62 = vadd.f32 %v3010_v60, %v4620_v16  ;;  %v3031_v16 = vmul.f32 (!%p3476_p5), %v3018_v53, %v3018_v53  ;;  %3039 = vadd.xlane.f32.xlu1 (!%p3476_p5), %v3038_v17 }
0x10e2   : > { %v3034_v5 = vmul.f32 (!%p3476_p5), %v3021_v61, %v3021_v61 }
0x10e3   : > { %3024 = vst.msk [vmem:[#allocation2 + $0x10] sm:$0xff] %vm699_vm1, %v3020_v62  ;;  %3798 = vmatprep.mubr.msk.f32.mxu1 (!%p3476_p5), %vm699_vm1, %v3020_v62  ;;  %v3033_v63 = vmul.f32 (!%p3476_p5), %v3020_v62, %v3020_v62  ;;  %v3035_v4 = vsel (!%p3476_p5), %vm699_vm1, %v3031_v16, 0.0 }
0x10e4   : > { %3799 = vmatmul.mubr.msk.f32.vlgmr.msra.gmra.mrb[0].mxu1 %vm699_vm1, %v3021_v61  ;;  %3036 = vadd.xlane.f32.xlu0 %v3035_v4  ;;  %v3044_v27 = vsel %vm699_vm1, %v3034_v5, 0.0 }
0x10e5   : > { %v3041_v2 = vsel %vm699_vm1, %v3033_v63, 0.0 }
0x10e6   : > { %3042 = vadd.xlane.f32.xlu1 %v3041_v2 }
0x10e8   : > { %3045 = vadd.xlane.f32.xlu0 %v3044_v27 }
0x1162   : > { %v3083_v29 = vpop.xlane.xlu0 %3082 }
0x1163   : > { %4131 = vrsqrt.f32 %v3083_v29  ;;  %vm3086_vm8 = vcmp.eq.f32.partialorder %v3083_v29, inf  ;;  %v3089_v11 = vand.u32 2147483648, %v3083_v29  ;;  %vm3088_vm9 = vcmp.eq.f32.partialorder %v3083_v29, 0.0 }
0x116d   : > { %v4132_v9 = vpop.eup %4131 }
0x116e   : > { %v3085_v54 = vmul.f32 %v4132_v9, %v3083_v29  ;;  %v3040_v22 = vpop.xlane.xlu1 %3039 }
0x116f   : > { %4133 = vrsqrt.f32 %v3040_v22  ;;  %vm3056_vm10 = vcmp.eq.f32.partialorder %v3040_v22, inf  ;;  %vm3058_vm13 = vcmp.eq.f32.partialorder %v3040_v22, 0.0  ;;  %v3059_v34 = vand.u32 2147483648, %v3040_v22 }
0x1170   : > { %v3087_v55 = vsel %vm3086_vm8, %v3083_v29, %v3085_v54 }
0x1171   : > { %v3090_v18 = vsel %vm3088_vm9, %v3089_v11, %v3087_v55  ;;  %v3037_v30 = vpop.xlane.xlu0 %3036 }
0x1172   : > { %v3091_v19 = vmax.f32 %v3090_v18, 1e-08  ;;  %vm3049_vm12 = vcmp.eq.f32.partialorder %v3037_v30, inf  ;;  %vm3051_vm0 = vcmp.eq.f32.partialorder %v3037_v30, 0.0  ;;  %v3052_v36 = vand.u32 2147483648, %v3037_v30 }
0x1173   : > { %v3043_v8 = vpop.xlane.xlu1 %3042 }
0x1174   : > { %3192 = vxpose.xlu1.b32.start.end [1/1] (short) (narrow) %v3091_v19, 8  ;;  %4135 = vrsqrt.f32 %v3043_v8  ;;  %vm3063_vm11 = vcmp.eq.f32.partialorder %v3043_v8, inf  ;;  %vm3065_vm15 = vcmp.eq.f32.partialorder %v3043_v8, 0.0  ;;  %v3066_v35 = vand.u32 2147483648, %v3043_v8 }
0x1175   : > { %v3046_v13 = vpop.xlane.xlu0 %3045  ;;  %4137 = vrsqrt.f32 %v3037_v30 }
0x1176   : > { %4139 = vrsqrt.f32 %v3046_v13  ;;  %vm3070_vm14 = vcmp.eq.f32.partialorder %v3046_v13, inf  ;;  %v3073_v38 = vand.u32 2147483648, %v3046_v13  ;;  %vm3072_vm1 = vcmp.eq.f32.partialorder %v3046_v13, 0.0 }
0x1179   : > { %v4134_v15 = vpop.eup %4133 }
0x117a   : > { %v3055_v25 = vmul.f32 %v4134_v15, %v3040_v22 }
0x117c   : > { %v3057_v12 = vsel %vm3056_vm10, %v3040_v22, %v3055_v25 }
0x117d   : > { %v3060_v40 = vsel %vm3058_vm13, %v3059_v34, %v3057_v12 }
0x117e   : > { %v4136_v23 = vpop.eup %4135  ;;  %v3076_v43 = vmax.f32 %v3060_v40, 1e-08 }
0x117f   : > { %v4138_v24 = vpop.eup %4137  ;;  %v3062_v26 = vmul.f32 %v4136_v23, %v3043_v8 }
0x1180   : > { %v4140_v58 = vpop.eup %4139  ;;  %v3048_v31 = vmul.f32 %v4138_v24, %v3037_v30 }
0x1181   : > { %v3069_v32 = vmul.f32 %v4140_v58, %v3046_v13  ;;  %v3064_v37 = vsel %vm3063_vm11, %v3043_v8, %v3062_v26 }
0x1182   : > { %v3050_v6 = vsel %vm3049_vm12, %v3037_v30, %v3048_v31  ;;  %v3067_v14 = vsel %vm3065_vm15, %v3066_v35, %v3064_v37 }
0x1183   : > { %v3071_v39 = vsel %vm3070_vm14, %v3046_v13, %v3069_v32  ;;  %v3053_v41 = vsel %vm3051_vm0, %v3052_v36, %v3050_v6  ;;  %v3077_v44 = vmax.f32 %v3067_v14, 1e-08 }
0x1184   : > { %v3074_v42 = vsel %vm3072_vm1, %v3073_v38, %v3071_v39  ;;  %v3075_v45 = vmax.f32 %v3053_v41, 1e-08 }
0x1185   : > { %v3078_v49 = vmax.f32 %v3074_v42, 1e-08 }
0x11a9   : > { %v3797_v48 = vpop.f32.mrb[0].mxu0 }
0x11aa   : > { %v3173_v10 = vpop.f32.mrb[1].mxu0 }
0x11b7   : > { %v4702_v21 = vpop.f32.mrb[0].mxu1 }
0x11b8   : > { %v3183_v47 = vpop.f32.mrb[1].mxu1 }
0x11f4   : > { %v3208_v7 = vpop.trf.xlu1 }
0x11f5   : > { %v3227_v46 = vrot.slane %v3208_v7, %v1069_v28 }
0x11f7   : > { %v3228_v50 = vmul.f32 %v3227_v46, %v3075_v45  ;;  %v3229_v51 = vmul.f32 %v3227_v46, %v3076_v43  ;;  %v3230_v52 = vmul.f32 %v3227_v46, %v3077_v44  ;;  %v3231_v53 = vmul.f32 %v3227_v46, %v3078_v49 }
0x11f9   : > { %4141 = vrcp.f32 %v3228_v50 }
0x11fa   : > { %4143 = vrcp.f32 %v3229_v51 }
0x11fb   : > { %4145 = vrcp.f32 %v3230_v52 }
0x11fc   : > { %4147 = vrcp.f32 %v3231_v53 }
0x1203   : > { %v4142_v20 = vpop.eup %4141 }
0x1204   : > { %v4144_v56 = vpop.eup %4143  ;;  %v3233_v59 = vmul.f32 %v4142_v20, %v3173_v10 }
0x1205   : > { %v4146_v60 = vpop.eup %4145  ;;  %v3235_v61 = vmul.f32 %v4144_v56, %v3797_v48 }
0x1206   : > { %v4148_v62 = vpop.eup %4147  ;;  %v3240_v57 = vsub.f32 1.0, %v3233_v59  ;;  %v3237_v33 = vmul.f32 %v4146_v60, %v3183_v47 }
0x1207   : > { %v3241_v3 = vsub.f32 1.0, %v3235_v61  ;;  %v3239_v28 = vmul.f32 %v4148_v62, %v4702_v21 }
0x1208   : > { %3245 = vst.msk [vmem:[%s4762_s16] sm:$0xff] %vm3244_vm2, %v3240_v57  ;;  %v3242_v63 = vsub.f32 1.0, %v3237_v33 }
0x1209   : > { %3246 = vst.msk [vmem:[%s4762_s16 + $0x8] sm:$0xff] %vm3244_vm2, %v3241_v3  ;;  %v3243_v0 = vsub.f32 1.0, %v3239_v28 }
0x120a   : > { %3247 = vst.msk [vmem:[%s4762_s16 + $0x10] sm:$0xff] %vm3244_vm2, %v3242_v63 }
0x120b   : > { %3248 = vst.msk [vmem:[%s4762_s16 + $0x18] sm:$0xff] %vm3244_vm2, %v3243_v0 }
0x120c PF: > { %s4763_s23 = sld [smem:[#allocation3_spill]] }
0x1212   : > { %s25_s18 = sadd.s32 1, %s4763_s23  }
0x1213   : > { %p22_p6 = scmp.ge.s32.totalorder %s25_s18, 7  }
0x1215   :  { %24 = sbr.rel (!%p22_p6) target bundleno = 7 (0x7), region = 150 }

</bundles_post_ra>
